<compile_context>
chip_gen: v6e
topology: v6e:2x2x1
jax: 0.10.0
libtpu: 0.0.40
codegen_flags: <defaults>
</compile_context>

<pallas_src>
import math

import jax
import jax.numpy as jnp
from jax.experimental import pallas as pl
from jax.experimental.pallas import tpu as pltpu  # noqa: F401  (kept for TPU backend symbols)

# Model dims (small, consistent with the module)
VOCAB = 64     # vocab_size
MAXLEN = 16    # max_length
B = 2          # batch
S = 8          # seq length
E = 32         # embed_size
H = 4          # num_heads
D = E // H     # head_dim
HID = 4 * E    # feed-forward hidden
L = 2          # num_layers
EPS = 1e-5     # nn.LayerNorm default eps
BS = B * S


def _layernorm(x, gamma, beta):
    # x: (BS, E); gamma/beta: (1, E); biased variance == nn.LayerNorm
    mu = jnp.mean(x, axis=-1, keepdims=True)
    xc = x - mu
    var = jnp.mean(xc * xc, axis=-1, keepdims=True)
    return xc * jax.lax.rsqrt(var + EPS) * gamma + beta


def encoder_kernel(x_ref, mask_ref, wqkv_ref, wo_ref, wf1_ref, wf2_ref, vec_ref,
                   out_ref, attn_ref):
    """Full L-layer encoder stack in one invocation.

    x_ref    (BS, E)        embedded inputs (batch folded into rows)
    mask_ref (B, S)         additive key mask: 0 = keep, -1e9 = masked
    wqkv_ref (L, E, 3E)     fused q|k|v weights, (in, out) layout
    wo_ref   (L, E, E)
    wf1_ref  (L, E, HID)
    wf2_ref  (L, HID, E)
    vec_ref  (L, 8, HID)    rows: b_qkv | b_f1 | b_o | g1 | beta1 | b_f2 | g2 | beta2
    out_ref  (BS, E)
    attn_ref (L, B*H, S, S)
    """
    scale = 1.0 / math.sqrt(D)
    x = x_ref[...]                 # (BS, E)
    mask_add = mask_ref[...]       # (B, S)

    for layer in range(L):         # static unroll over layers
        wqkv = wqkv_ref[layer]     # (E, 3E)
        wo = wo_ref[layer]         # (E, E)
        wf1 = wf1_ref[layer]       # (E, HID)
        wf2 = wf2_ref[layer]       # (HID, E)
        v = vec_ref[layer]         # (8, HID)
        b_qkv = v[0:1, 0:3 * E]
        b_f1 = v[1:2, :]
        b_o = v[2:3, 0:E]
        g1 = v[3:4, 0:E]
        be1 = v[4:5, 0:E]
        b_f2 = v[5:6, 0:E]
        g2 = v[6:7, 0:E]
        be2 = v[7:8, 0:E]

        # --- fused QKV projection over all B*S rows at once ---
        qkv = jnp.dot(x, wqkv, preferred_element_type=jnp.float32) + b_qkv   # (BS, 3E)

        # --- multi-head self attention (per-batch, per-head static unroll) ---
        per_batch = []
        for b in range(B):
            qkv_b = qkv[b * S:(b + 1) * S]           # (S, 3E) sublane slice
            m_b = mask_add[b:b + 1, :]               # (1, S)  additive key mask
            acc = None                               # per-batch fc_out accumulator (S, E)
            for h in range(H):
                qh = qkv_b[:, h * D:(h + 1) * D]                       # (S, D)
                kh = qkv_b[:, E + h * D:E + (h + 1) * D]               # (S, D)
                vh = qkv_b[:, 2 * E + h * D:2 * E + (h + 1) * D]       # (S, D)
                s = jnp.dot(qh, kh.T, preferred_element_type=jnp.float32) * scale + m_b
                s = s - jnp.max(s, axis=-1, keepdims=True)
                p = jnp.exp(s)
                p = p * pl.reciprocal(jnp.sum(p, axis=-1, keepdims=True), approx=True)
                attn_ref[layer, b * H + h] = p
                ctx_h = jnp.dot(p, vh, preferred_element_type=jnp.float32)   # (S, D)
                # fc_out(ctx) == sum_h ctx_h @ W_o[h*D:(h+1)*D, :]; accumulate directly,
                # avoiding any lane-axis concatenate / ctx materialization.
                contrib = jnp.dot(ctx_h, wo[h * D:(h + 1) * D, :],
                                  preferred_element_type=jnp.float32)        # (S, E)
                acc = contrib if acc is None else acc + contrib
            per_batch.append(acc)
        attn_out = jnp.concatenate(per_batch, axis=0) + b_o                  # (BS, E)

        # TODO(synk): nn.Dropout is identity here (inference mode); no RNG dropout applied.
        # --- residual + LayerNorm 1 ---
        x1 = _layernorm(x + attn_out, g1, be1)

        # --- FeedForward: Linear -> ReLU -> (Dropout) -> Linear ---
        hid = jnp.dot(x1, wf1, preferred_element_type=jnp.float32) + b_f1
        hid = jnp.maximum(hid, 0.0)
        ff = jnp.dot(hid, wf2, preferred_element_type=jnp.float32) + b_f2

        # --- residual + LayerNorm 2 ---
        x = _layernorm(x1 + ff, g2, be2)

    out_ref[...] = x


def transformer_encoder(token_ids, attention_mask, params):
    (tok_emb, pos_emb, w_qkv, w_o, w_f1, w_f2, vecs) = params

    # TODO(synk): token/position embedding gather is data-dependent; done as plain-JAX glue.
    positions = jnp.arange(S)
    x0 = tok_emb[token_ids] + pos_emb[positions][None, :, :]      # (B, S, E)
    x0 = x0.reshape(BS, E).astype(jnp.float32)

    # CLSorLM == 0: per-sample key padding mask; precompute additive form once.
    mask_add = (attention_mask.astype(jnp.float32) - 1.0) * 1e9   # (B, S): 0 keep, -1e9 mask

    # Advisory cost hint for the XLA scheduler.
    flops_layer = (2 * BS * E * (3 * E)                              # fused qkv
                   + B * H * (2 * S * S * D + 2 * S * S * D + 2 * S * D * E)  # qk, pv, o
                   + 2 * BS * E * HID + 2 * BS * HID * E)            # ffn
    param_elems = L * (E * 3 * E + E * E + E * HID + HID * E + 8 * HID)
    bytes_accessed = 4 * (BS * E + B * S + param_elems + BS * E + L * B * H * S * S)
    transcendentals = L * (B * H * S * S + B * H * S + 2 * BS)
    cost = pl.CostEstimate(flops=int(L * flops_layer),
                           transcendentals=int(transcendentals),
                           bytes_accessed=int(bytes_accessed))

    out2d, attn = pl.pallas_call(
        encoder_kernel,
        out_shape=(jax.ShapeDtypeStruct((BS, E), jnp.float32),
                   jax.ShapeDtypeStruct((L, B * H, S, S), jnp.float32)),
        cost_estimate=cost,
    )(x0, mask_add, w_qkv, w_o, w_f1, w_f2, vecs)

    out = out2d.reshape(B, S, E)
    attention_maps = [attn[l].reshape(B, H, S, S) for l in range(L)]
    return out, attention_maps


def init_params(key):
    # PyTorch nn.Linear stores weight as (out, in) and computes x @ W.T + b.
    # Weights here are pre-transposed to (in, out) (pure glue) so the kernel does x @ W + b,
    # and q|k|v are fused column-wise; all 1-D params are packed into one (8, HID) slab/layer.
    ks = jax.random.split(key, 2 + 6 * L)
    tok_emb = jax.random.normal(ks[0], (VOCAB, E), jnp.float32)
    pos_emb = jax.random.normal(ks[1], (MAXLEN, E), jnp.float32)

    def lin(k, fan_in, fan_out):
        bound = 1.0 / math.sqrt(fan_in)
        kw, kb = jax.random.split(k)
        w = jax.random.uniform(kw, (fan_in, fan_out), jnp.float32, -bound, bound)
        b = jax.random.uniform(kb, (fan_out,), jnp.float32, -bound, bound)
        return w, b

    def pad(vec):
        return jnp.pad(vec, (0, HID - vec.shape[0]))

    w_qkv, w_o, w_f1, w_f2, vecs = [], [], [], [], []
    idx = 2
    for _ in range(L):
        wq, bq = lin(ks[idx], E, E); idx += 1
        wk, bk = lin(ks[idx], E, E); idx += 1
        wv, bv = lin(ks[idx], E, E); idx += 1
        wo, bo = lin(ks[idx], E, E); idx += 1
        wf1, bf1 = lin(ks[idx], E, HID); idx += 1
        wf2, bf2 = lin(ks[idx], HID, E); idx += 1
        g1 = jnp.ones((E,), jnp.float32); be1 = jnp.zeros((E,), jnp.float32)
        g2 = jnp.ones((E,), jnp.float32); be2 = jnp.zeros((E,), jnp.float32)

        w_qkv.append(jnp.concatenate([wq, wk, wv], axis=1))      # (E, 3E)
        w_o.append(wo)
        w_f1.append(wf1)
        w_f2.append(wf2)
        vecs.append(jnp.stack([
            pad(jnp.concatenate([bq, bk, bv])),                  # row 0: b_qkv (96, padded)
            bf1,                                                 # row 1: b_f1 (128)
            pad(bo), pad(g1), pad(be1), pad(bf2), pad(g2), pad(be2),
        ], axis=0))                                              # (8, HID)

    return (tok_emb, pos_emb,
            jnp.stack(w_qkv), jnp.stack(w_o),
            jnp.stack(w_f1), jnp.stack(w_f2), jnp.stack(vecs))


if __name__ == "__main__":
    key = jax.random.PRNGKey(0)
    k_tok, k_param = jax.random.split(key)

    token_ids = jax.random.randint(k_tok, (B, S), 0, VOCAB)
    lengths = jnp.array([6, S])                                   # per-sample valid lengths
    attention_mask = (jnp.arange(S)[None, :] < lengths[:, None]).astype(jnp.float32)  # (B, S)

    params = init_params(k_param)
    out, attention_maps = transformer_encoder(token_ids, attention_mask, params)
    jax.block_until_ready((out, attention_maps))

    assert out.shape == (B, S, E)
    assert len(attention_maps) == L
    assert attention_maps[0].shape == (B, H, S, S)
    print("KERNEL_OK")
</pallas_src>

<mosaic_0001>
module attributes {stable_mosaic.version = 11 : i64} {
  func.func @encoder_kernel(%arg0: memref<16x32xf32, #tpu.memory_space<vmem>>, %arg1: memref<2x8xf32, #tpu.memory_space<vmem>>, %arg2: memref<2x32x96xf32, #tpu.memory_space<vmem>>, %arg3: memref<2x32x32xf32, #tpu.memory_space<vmem>>, %arg4: memref<2x32x128xf32, #tpu.memory_space<vmem>>, %arg5: memref<2x128x32xf32, #tpu.memory_space<vmem>>, %arg6: memref<2x8x128xf32, #tpu.memory_space<vmem>>, %arg7: memref<16x32xf32, #tpu.memory_space<vmem>>, %arg8: memref<2x8x8x8xf32, #tpu.memory_space<vmem>>) attributes {dimension_semantics = [], scalar_prefetch = 0 : i64, scratch_operands = 0 : i64, tpu.core_type = #tpu.core_type<tc>} {
    %c0 = arith.constant 0 : index
    %c0_0 = arith.constant 0 : index
    %0 = vector.load %arg0[%c0, %c0_0] : memref<16x32xf32, #tpu.memory_space<vmem>>, vector<16x32xf32>
    %c0_1 = arith.constant 0 : index
    %c0_2 = arith.constant 0 : index
    %1 = vector.load %arg1[%c0_1, %c0_2] : memref<2x8xf32, #tpu.memory_space<vmem>>, vector<2x8xf32>
    %c0_3 = arith.constant 0 : index
    %c0_4 = arith.constant 0 : index
    %c0_5 = arith.constant 0 : index
    %2 = vector.load %arg2[%c0_3, %c0_4, %c0_5] : memref<2x32x96xf32, #tpu.memory_space<vmem>>, vector<1x32x96xf32>
    %3 = vector.shape_cast %2 : vector<1x32x96xf32> to vector<32x96xf32>
    %c0_6 = arith.constant 0 : index
    %c0_7 = arith.constant 0 : index
    %c0_8 = arith.constant 0 : index
    %4 = vector.load %arg3[%c0_6, %c0_7, %c0_8] : memref<2x32x32xf32, #tpu.memory_space<vmem>>, vector<1x32x32xf32>
    %5 = vector.shape_cast %4 : vector<1x32x32xf32> to vector<32x32xf32>
    %c0_9 = arith.constant 0 : index
    %c0_10 = arith.constant 0 : index
    %c0_11 = arith.constant 0 : index
    %6 = vector.load %arg4[%c0_9, %c0_10, %c0_11] : memref<2x32x128xf32, #tpu.memory_space<vmem>>, vector<1x32x128xf32>
    %7 = vector.shape_cast %6 : vector<1x32x128xf32> to vector<32x128xf32>
    %c0_12 = arith.constant 0 : index
    %c0_13 = arith.constant 0 : index
    %c0_14 = arith.constant 0 : index
    %8 = vector.load %arg5[%c0_12, %c0_13, %c0_14] : memref<2x128x32xf32, #tpu.memory_space<vmem>>, vector<1x128x32xf32>
    %9 = vector.shape_cast %8 : vector<1x128x32xf32> to vector<128x32xf32>
    %c0_15 = arith.constant 0 : index
    %c0_16 = arith.constant 0 : index
    %c0_17 = arith.constant 0 : index
    %10 = vector.load %arg6[%c0_15, %c0_16, %c0_17] : memref<2x8x128xf32, #tpu.memory_space<vmem>>, vector<1x8x128xf32>
    %11 = vector.shape_cast %10 : vector<1x8x128xf32> to vector<8x128xf32>
    %12 = vector.extract_strided_slice %11 {offsets = [0, 0], sizes = [1, 96], strides = [1, 1]} : vector<8x128xf32> to vector<1x96xf32>
    %13 = vector.extract_strided_slice %11 {offsets = [1, 0], sizes = [1, 128], strides = [1, 1]} : vector<8x128xf32> to vector<1x128xf32>
    %14 = vector.extract_strided_slice %11 {offsets = [2, 0], sizes = [1, 32], strides = [1, 1]} : vector<8x128xf32> to vector<1x32xf32>
    %15 = vector.extract_strided_slice %11 {offsets = [3, 0], sizes = [1, 32], strides = [1, 1]} : vector<8x128xf32> to vector<1x32xf32>
    %16 = vector.extract_strided_slice %11 {offsets = [4, 0], sizes = [1, 32], strides = [1, 1]} : vector<8x128xf32> to vector<1x32xf32>
    %17 = vector.extract_strided_slice %11 {offsets = [5, 0], sizes = [1, 32], strides = [1, 1]} : vector<8x128xf32> to vector<1x32xf32>
    %18 = vector.extract_strided_slice %11 {offsets = [6, 0], sizes = [1, 32], strides = [1, 1]} : vector<8x128xf32> to vector<1x32xf32>
    %19 = vector.extract_strided_slice %11 {offsets = [7, 0], sizes = [1, 32], strides = [1, 1]} : vector<8x128xf32> to vector<1x32xf32>
    %cst = arith.constant dense<0.000000e+00> : vector<16x96xf32>
    %20 = tpu.matmul %0, %3, %cst {dimension_numbers = #tpu.dot_dimension_numbers<[1], [0], [0], [1], [0, 0, 1, 1], [], []>} : vector<16x32xf32>, vector<32x96xf32>, vector<16x96xf32> -> vector<16x96xf32>
    %21 = vector.broadcast %12 : vector<1x96xf32> to vector<16x96xf32>
    %22 = arith.addf %20, %21 : vector<16x96xf32>
    %23 = vector.extract_strided_slice %22 {offsets = [0, 0], sizes = [8, 96], strides = [1, 1]} : vector<16x96xf32> to vector<8x96xf32>
    %24 = vector.extract_strided_slice %1 {offsets = [0, 0], sizes = [1, 8], strides = [1, 1]} : vector<2x8xf32> to vector<1x8xf32>
    %25 = vector.extract_strided_slice %23 {offsets = [0, 0], sizes = [8, 8], strides = [1, 1]} : vector<8x96xf32> to vector<8x8xf32>
    %26 = vector.extract_strided_slice %23 {offsets = [0, 32], sizes = [8, 8], strides = [1, 1]} : vector<8x96xf32> to vector<8x8xf32>
    %27 = vector.extract_strided_slice %23 {offsets = [0, 64], sizes = [8, 8], strides = [1, 1]} : vector<8x96xf32> to vector<8x8xf32>
    %28 = tpu.transpose %26, [1, 0] : vector<8x8xf32> -> vector<8x8xf32>
    %cst_18 = arith.constant dense<0.000000e+00> : vector<8x8xf32>
    %29 = tpu.matmul %25, %28, %cst_18 {dimension_numbers = #tpu.dot_dimension_numbers<[1], [0], [0], [1], [0, 0, 1, 1], [], []>} : vector<8x8xf32>, vector<8x8xf32>, vector<8x8xf32> -> vector<8x8xf32>
    %cst_19 = arith.constant 0.353553385 : f32
    %30 = vector.broadcast %cst_19 : f32 to vector<8x8xf32>
    %31 = arith.mulf %29, %30 : vector<8x8xf32>
    %32 = vector.broadcast %24 : vector<1x8xf32> to vector<8x8xf32>
    %33 = arith.addf %31, %32 : vector<8x8xf32>
    %cst_20 = arith.constant dense<0xFF800000> : vector<8xf32>
    %34 = vector.multi_reduction <maximumf>, %33, %cst_20 [1] : vector<8x8xf32> to vector<8xf32>
    %35 = vector.shape_cast %34 : vector<8xf32> to vector<8x1xf32>
    %36 = vector.broadcast %35 : vector<8x1xf32> to vector<8x8xf32>
    %37 = arith.subf %33, %36 : vector<8x8xf32>
    %38 = math.exp %37 : vector<8x8xf32>
    %cst_21 = arith.constant dense<0.000000e+00> : vector<8xf32>
    %39 = vector.multi_reduction <add>, %38, %cst_21 [1] : vector<8x8xf32> to vector<8xf32>
    %40 = vector.shape_cast %39 : vector<8xf32> to vector<8x1xf32>
    %41 = tpu.reciprocal %40 {approx = true} : vector<8x1xf32> -> vector<8x1xf32>
    %42 = vector.broadcast %41 : vector<8x1xf32> to vector<8x8xf32>
    %43 = arith.mulf %38, %42 : vector<8x8xf32>
    %c0_22 = arith.constant 0 : index
    %c0_23 = arith.constant 0 : index
    %c0_24 = arith.constant 0 : index
    %c0_25 = arith.constant 0 : index
    %44 = vector.load %arg8[%c0_22, %c0_23, %c0_24, %c0_25] : memref<2x8x8x8xf32, #tpu.memory_space<vmem>>, vector<1x1x8x8xf32>
    %45 = vector.shape_cast %44 : vector<1x1x8x8xf32> to vector<8x8xf32>
    %46 = vector.shape_cast %43 : vector<8x8xf32> to vector<1x1x8x8xf32>
    tpu.vector_store %arg8[%c0_22, %c0_23, %c0_24, %c0_25], %46 {strides = array<i32>} : memref<2x8x8x8xf32, #tpu.memory_space<vmem>>, vector<1x1x8x8xf32>,
    %cst_26 = arith.constant dense<0.000000e+00> : vector<8x8xf32>
    %47 = tpu.matmul %43, %27, %cst_26 {dimension_numbers = #tpu.dot_dimension_numbers<[1], [0], [0], [1], [0, 0, 1, 1], [], []>} : vector<8x8xf32>, vector<8x8xf32>, vector<8x8xf32> -> vector<8x8xf32>
    %48 = vector.extract_strided_slice %5 {offsets = [0, 0], sizes = [8, 32], strides = [1, 1]} : vector<32x32xf32> to vector<8x32xf32>
    %cst_27 = arith.constant dense<0.000000e+00> : vector<8x32xf32>
    %49 = tpu.matmul %47, %48, %cst_27 {dimension_numbers = #tpu.dot_dimension_numbers<[1], [0], [0], [1], [0, 0, 1, 1], [], []>} : vector<8x8xf32>, vector<8x32xf32>, vector<8x32xf32> -> vector<8x32xf32>
    %50 = vector.extract_strided_slice %23 {offsets = [0, 8], sizes = [8, 8], strides = [1, 1]} : vector<8x96xf32> to vector<8x8xf32>
    %51 = vector.extract_strided_slice %23 {offsets = [0, 40], sizes = [8, 8], strides = [1, 1]} : vector<8x96xf32> to vector<8x8xf32>
    %52 = vector.extract_strided_slice %23 {offsets = [0, 72], sizes = [8, 8], strides = [1, 1]} : vector<8x96xf32> to vector<8x8xf32>
    %53 = tpu.transpose %51, [1, 0] : vector<8x8xf32> -> vector<8x8xf32>
    %cst_28 = arith.constant dense<0.000000e+00> : vector<8x8xf32>
    %54 = tpu.matmul %50, %53, %cst_28 {dimension_numbers = #tpu.dot_dimension_numbers<[1], [0], [0], [1], [0, 0, 1, 1], [], []>} : vector<8x8xf32>, vector<8x8xf32>, vector<8x8xf32> -> vector<8x8xf32>
    %cst_29 = arith.constant 0.353553385 : f32
    %55 = vector.broadcast %cst_29 : f32 to vector<8x8xf32>
    %56 = arith.mulf %54, %55 : vector<8x8xf32>
    %57 = vector.broadcast %24 : vector<1x8xf32> to vector<8x8xf32>
    %58 = arith.addf %56, %57 : vector<8x8xf32>
    %cst_30 = arith.constant dense<0xFF800000> : vector<8xf32>
    %59 = vector.multi_reduction <maximumf>, %58, %cst_30 [1] : vector<8x8xf32> to vector<8xf32>
    %60 = vector.shape_cast %59 : vector<8xf32> to vector<8x1xf32>
    %61 = vector.broadcast %60 : vector<8x1xf32> to vector<8x8xf32>
    %62 = arith.subf %58, %61 : vector<8x8xf32>
    %63 = math.exp %62 : vector<8x8xf32>
    %cst_31 = arith.constant dense<0.000000e+00> : vector<8xf32>
    %64 = vector.multi_reduction <add>, %63, %cst_31 [1] : vector<8x8xf32> to vector<8xf32>
    %65 = vector.shape_cast %64 : vector<8xf32> to vector<8x1xf32>
    %66 = tpu.reciprocal %65 {approx = true} : vector<8x1xf32> -> vector<8x1xf32>
    %67 = vector.broadcast %66 : vector<8x1xf32> to vector<8x8xf32>
    %68 = arith.mulf %63, %67 : vector<8x8xf32>
    %c0_32 = arith.constant 0 : index
    %c1 = arith.constant 1 : index
    %c0_33 = arith.constant 0 : index
    %c0_34 = arith.constant 0 : index
    %69 = vector.load %arg8[%c0_32, %c1, %c0_33, %c0_34] : memref<2x8x8x8xf32, #tpu.memory_space<vmem>>, vector<1x1x8x8xf32>
    %70 = vector.shape_cast %69 : vector<1x1x8x8xf32> to vector<8x8xf32>
    %71 = vector.shape_cast %68 : vector<8x8xf32> to vector<1x1x8x8xf32>
    tpu.vector_store %arg8[%c0_32, %c1, %c0_33, %c0_34], %71 {strides = array<i32>} : memref<2x8x8x8xf32, #tpu.memory_space<vmem>>, vector<1x1x8x8xf32>,
    %cst_35 = arith.constant dense<0.000000e+00> : vector<8x8xf32>
    %72 = tpu.matmul %68, %52, %cst_35 {dimension_numbers = #tpu.dot_dimension_numbers<[1], [0], [0], [1], [0, 0, 1, 1], [], []>} : vector<8x8xf32>, vector<8x8xf32>, vector<8x8xf32> -> vector<8x8xf32>
    %73 = vector.extract_strided_slice %5 {offsets = [8, 0], sizes = [8, 32], strides = [1, 1]} : vector<32x32xf32> to vector<8x32xf32>
    %cst_36 = arith.constant dense<0.000000e+00> : vector<8x32xf32>
    %74 = tpu.matmul %72, %73, %cst_36 {dimension_numbers = #tpu.dot_dimension_numbers<[1], [0], [0], [1], [0, 0, 1, 1], [], []>} : vector<8x8xf32>, vector<8x32xf32>, vector<8x32xf32> -> vector<8x32xf32>
    %75 = arith.addf %49, %74 : vector<8x32xf32>
    %76 = vector.extract_strided_slice %23 {offsets = [0, 16], sizes = [8, 8], strides = [1, 1]} : vector<8x96xf32> to vector<8x8xf32>
    %77 = vector.extract_strided_slice %23 {offsets = [0, 48], sizes = [8, 8], strides = [1, 1]} : vector<8x96xf32> to vector<8x8xf32>
    %78 = vector.extract_strided_slice %23 {offsets = [0, 80], sizes = [8, 8], strides = [1, 1]} : vector<8x96xf32> to vector<8x8xf32>
    %79 = tpu.transpose %77, [1, 0] : vector<8x8xf32> -> vector<8x8xf32>
    %cst_37 = arith.constant dense<0.000000e+00> : vector<8x8xf32>
    %80 = tpu.matmul %76, %79, %cst_37 {dimension_numbers = #tpu.dot_dimension_numbers<[1], [0], [0], [1], [0, 0, 1, 1], [], []>} : vector<8x8xf32>, vector<8x8xf32>, vector<8x8xf32> -> vector<8x8xf32>
    %cst_38 = arith.constant 0.353553385 : f32
    %81 = vector.broadcast %cst_38 : f32 to vector<8x8xf32>
    %82 = arith.mulf %80, %81 : vector<8x8xf32>
    %83 = vector.broadcast %24 : vector<1x8xf32> to vector<8x8xf32>
    %84 = arith.addf %82, %83 : vector<8x8xf32>
    %cst_39 = arith.constant dense<0xFF800000> : vector<8xf32>
    %85 = vector.multi_reduction <maximumf>, %84, %cst_39 [1] : vector<8x8xf32> to vector<8xf32>
    %86 = vector.shape_cast %85 : vector<8xf32> to vector<8x1xf32>
    %87 = vector.broadcast %86 : vector<8x1xf32> to vector<8x8xf32>
    %88 = arith.subf %84, %87 : vector<8x8xf32>
    %89 = math.exp %88 : vector<8x8xf32>
    %cst_40 = arith.constant dense<0.000000e+00> : vector<8xf32>
    %90 = vector.multi_reduction <add>, %89, %cst_40 [1] : vector<8x8xf32> to vector<8xf32>
    %91 = vector.shape_cast %90 : vector<8xf32> to vector<8x1xf32>
    %92 = tpu.reciprocal %91 {approx = true} : vector<8x1xf32> -> vector<8x1xf32>
    %93 = vector.broadcast %92 : vector<8x1xf32> to vector<8x8xf32>
    %94 = arith.mulf %89, %93 : vector<8x8xf32>
    %c0_41 = arith.constant 0 : index
    %c2 = arith.constant 2 : index
    %c0_42 = arith.constant 0 : index
    %c0_43 = arith.constant 0 : index
    %95 = vector.load %arg8[%c0_41, %c2, %c0_42, %c0_43] : memref<2x8x8x8xf32, #tpu.memory_space<vmem>>, vector<1x1x8x8xf32>
    %96 = vector.shape_cast %95 : vector<1x1x8x8xf32> to vector<8x8xf32>
    %97 = vector.shape_cast %94 : vector<8x8xf32> to vector<1x1x8x8xf32>
    tpu.vector_store %arg8[%c0_41, %c2, %c0_42, %c0_43], %97 {strides = array<i32>} : memref<2x8x8x8xf32, #tpu.memory_space<vmem>>, vector<1x1x8x8xf32>,
    %cst_44 = arith.constant dense<0.000000e+00> : vector<8x8xf32>
    %98 = tpu.matmul %94, %78, %cst_44 {dimension_numbers = #tpu.dot_dimension_numbers<[1], [0], [0], [1], [0, 0, 1, 1], [], []>} : vector<8x8xf32>, vector<8x8xf32>, vector<8x8xf32> -> vector<8x8xf32>
    %99 = vector.extract_strided_slice %5 {offsets = [16, 0], sizes = [8, 32], strides = [1, 1]} : vector<32x32xf32> to vector<8x32xf32>
    %cst_45 = arith.constant dense<0.000000e+00> : vector<8x32xf32>
    %100 = tpu.matmul %98, %99, %cst_45 {dimension_numbers = #tpu.dot_dimension_numbers<[1], [0], [0], [1], [0, 0, 1, 1], [], []>} : vector<8x8xf32>, vector<8x32xf32>, vector<8x32xf32> -> vector<8x32xf32>
    %101 = arith.addf %75, %100 : vector<8x32xf32>
    %102 = vector.extract_strided_slice %23 {offsets = [0, 24], sizes = [8, 8], strides = [1, 1]} : vector<8x96xf32> to vector<8x8xf32>
    %103 = vector.extract_strided_slice %23 {offsets = [0, 56], sizes = [8, 8], strides = [1, 1]} : vector<8x96xf32> to vector<8x8xf32>
    %104 = vector.extract_strided_slice %23 {offsets = [0, 88], sizes = [8, 8], strides = [1, 1]} : vector<8x96xf32> to vector<8x8xf32>
    %105 = tpu.transpose %103, [1, 0] : vector<8x8xf32> -> vector<8x8xf32>
    %cst_46 = arith.constant dense<0.000000e+00> : vector<8x8xf32>
    %106 = tpu.matmul %102, %105, %cst_46 {dimension_numbers = #tpu.dot_dimension_numbers<[1], [0], [0], [1], [0, 0, 1, 1], [], []>} : vector<8x8xf32>, vector<8x8xf32>, vector<8x8xf32> -> vector<8x8xf32>
    %cst_47 = arith.constant 0.353553385 : f32
    %107 = vector.broadcast %cst_47 : f32 to vector<8x8xf32>
    %108 = arith.mulf %106, %107 : vector<8x8xf32>
    %109 = vector.broadcast %24 : vector<1x8xf32> to vector<8x8xf32>
    %110 = arith.addf %108, %109 : vector<8x8xf32>
    %cst_48 = arith.constant dense<0xFF800000> : vector<8xf32>
    %111 = vector.multi_reduction <maximumf>, %110, %cst_48 [1] : vector<8x8xf32> to vector<8xf32>
    %112 = vector.shape_cast %111 : vector<8xf32> to vector<8x1xf32>
    %113 = vector.broadcast %112 : vector<8x1xf32> to vector<8x8xf32>
    %114 = arith.subf %110, %113 : vector<8x8xf32>
    %115 = math.exp %114 : vector<8x8xf32>
    %cst_49 = arith.constant dense<0.000000e+00> : vector<8xf32>
    %116 = vector.multi_reduction <add>, %115, %cst_49 [1] : vector<8x8xf32> to vector<8xf32>
    %117 = vector.shape_cast %116 : vector<8xf32> to vector<8x1xf32>
    %118 = tpu.reciprocal %117 {approx = true} : vector<8x1xf32> -> vector<8x1xf32>
    %119 = vector.broadcast %118 : vector<8x1xf32> to vector<8x8xf32>
    %120 = arith.mulf %115, %119 : vector<8x8xf32>
    %c0_50 = arith.constant 0 : index
    %c3 = arith.constant 3 : index
    %c0_51 = arith.constant 0 : index
    %c0_52 = arith.constant 0 : index
    %121 = vector.load %arg8[%c0_50, %c3, %c0_51, %c0_52] : memref<2x8x8x8xf32, #tpu.memory_space<vmem>>, vector<1x1x8x8xf32>
    %122 = vector.shape_cast %121 : vector<1x1x8x8xf32> to vector<8x8xf32>
    %123 = vector.shape_cast %120 : vector<8x8xf32> to vector<1x1x8x8xf32>
    tpu.vector_store %arg8[%c0_50, %c3, %c0_51, %c0_52], %123 {strides = array<i32>} : memref<2x8x8x8xf32, #tpu.memory_space<vmem>>, vector<1x1x8x8xf32>,
    %cst_53 = arith.constant dense<0.000000e+00> : vector<8x8xf32>
    %124 = tpu.matmul %120, %104, %cst_53 {dimension_numbers = #tpu.dot_dimension_numbers<[1], [0], [0], [1], [0, 0, 1, 1], [], []>} : vector<8x8xf32>, vector<8x8xf32>, vector<8x8xf32> -> vector<8x8xf32>
    %125 = vector.extract_strided_slice %5 {offsets = [24, 0], sizes = [8, 32], strides = [1, 1]} : vector<32x32xf32> to vector<8x32xf32>
    %cst_54 = arith.constant dense<0.000000e+00> : vector<8x32xf32>
    %126 = tpu.matmul %124, %125, %cst_54 {dimension_numbers = #tpu.dot_dimension_numbers<[1], [0], [0], [1], [0, 0, 1, 1], [], []>} : vector<8x8xf32>, vector<8x32xf32>, vector<8x32xf32> -> vector<8x32xf32>
    %127 = arith.addf %101, %126 : vector<8x32xf32>
    %128 = vector.extract_strided_slice %22 {offsets = [8, 0], sizes = [8, 96], strides = [1, 1]} : vector<16x96xf32> to vector<8x96xf32>
    %129 = vector.extract_strided_slice %1 {offsets = [1, 0], sizes = [1, 8], strides = [1, 1]} : vector<2x8xf32> to vector<1x8xf32>
    %130 = vector.extract_strided_slice %128 {offsets = [0, 0], sizes = [8, 8], strides = [1, 1]} : vector<8x96xf32> to vector<8x8xf32>
    %131 = vector.extract_strided_slice %128 {offsets = [0, 32], sizes = [8, 8], strides = [1, 1]} : vector<8x96xf32> to vector<8x8xf32>
    %132 = vector.extract_strided_slice %128 {offsets = [0, 64], sizes = [8, 8], strides = [1, 1]} : vector<8x96xf32> to vector<8x8xf32>
    %133 = tpu.transpose %131, [1, 0] : vector<8x8xf32> -> vector<8x8xf32>
    %cst_55 = arith.constant dense<0.000000e+00> : vector<8x8xf32>
    %134 = tpu.matmul %130, %133, %cst_55 {dimension_numbers = #tpu.dot_dimension_numbers<[1], [0], [0], [1], [0, 0, 1, 1], [], []>} : vector<8x8xf32>, vector<8x8xf32>, vector<8x8xf32> -> vector<8x8xf32>
    %cst_56 = arith.constant 0.353553385 : f32
    %135 = vector.broadcast %cst_56 : f32 to vector<8x8xf32>
    %136 = arith.mulf %134, %135 : vector<8x8xf32>
    %137 = vector.broadcast %129 : vector<1x8xf32> to vector<8x8xf32>
    %138 = arith.addf %136, %137 : vector<8x8xf32>
    %cst_57 = arith.constant dense<0xFF800000> : vector<8xf32>
    %139 = vector.multi_reduction <maximumf>, %138, %cst_57 [1] : vector<8x8xf32> to vector<8xf32>
    %140 = vector.shape_cast %139 : vector<8xf32> to vector<8x1xf32>
    %141 = vector.broadcast %140 : vector<8x1xf32> to vector<8x8xf32>
    %142 = arith.subf %138, %141 : vector<8x8xf32>
    %143 = math.exp %142 : vector<8x8xf32>
    %cst_58 = arith.constant dense<0.000000e+00> : vector<8xf32>
    %144 = vector.multi_reduction <add>, %143, %cst_58 [1] : vector<8x8xf32> to vector<8xf32>
    %145 = vector.shape_cast %144 : vector<8xf32> to vector<8x1xf32>
    %146 = tpu.reciprocal %145 {approx = true} : vector<8x1xf32> -> vector<8x1xf32>
    %147 = vector.broadcast %146 : vector<8x1xf32> to vector<8x8xf32>
    %148 = arith.mulf %143, %147 : vector<8x8xf32>
    %c0_59 = arith.constant 0 : index
    %c4 = arith.constant 4 : index
    %c0_60 = arith.constant 0 : index
    %c0_61 = arith.constant 0 : index
    %149 = vector.load %arg8[%c0_59, %c4, %c0_60, %c0_61] : memref<2x8x8x8xf32, #tpu.memory_space<vmem>>, vector<1x1x8x8xf32>
    %150 = vector.shape_cast %149 : vector<1x1x8x8xf32> to vector<8x8xf32>
    %151 = vector.shape_cast %148 : vector<8x8xf32> to vector<1x1x8x8xf32>
    tpu.vector_store %arg8[%c0_59, %c4, %c0_60, %c0_61], %151 {strides = array<i32>} : memref<2x8x8x8xf32, #tpu.memory_space<vmem>>, vector<1x1x8x8xf32>,
    %cst_62 = arith.constant dense<0.000000e+00> : vector<8x8xf32>
    %152 = tpu.matmul %148, %132, %cst_62 {dimension_numbers = #tpu.dot_dimension_numbers<[1], [0], [0], [1], [0, 0, 1, 1], [], []>} : vector<8x8xf32>, vector<8x8xf32>, vector<8x8xf32> -> vector<8x8xf32>
    %153 = vector.extract_strided_slice %5 {offsets = [0, 0], sizes = [8, 32], strides = [1, 1]} : vector<32x32xf32> to vector<8x32xf32>
    %cst_63 = arith.constant dense<0.000000e+00> : vector<8x32xf32>
    %154 = tpu.matmul %152, %153, %cst_63 {dimension_numbers = #tpu.dot_dimension_numbers<[1], [0], [0], [1], [0, 0, 1, 1], [], []>} : vector<8x8xf32>, vector<8x32xf32>, vector<8x32xf32> -> vector<8x32xf32>
    %155 = vector.extract_strided_slice %128 {offsets = [0, 8], sizes = [8, 8], strides = [1, 1]} : vector<8x96xf32> to vector<8x8xf32>
    %156 = vector.extract_strided_slice %128 {offsets = [0, 40], sizes = [8, 8], strides = [1, 1]} : vector<8x96xf32> to vector<8x8xf32>
    %157 = vector.extract_strided_slice %128 {offsets = [0, 72], sizes = [8, 8], strides = [1, 1]} : vector<8x96xf32> to vector<8x8xf32>
    %158 = tpu.transpose %156, [1, 0] : vector<8x8xf32> -> vector<8x8xf32>
    %cst_64 = arith.constant dense<0.000000e+00> : vector<8x8xf32>
    %159 = tpu.matmul %155, %158, %cst_64 {dimension_numbers = #tpu.dot_dimension_numbers<[1], [0], [0], [1], [0, 0, 1, 1], [], []>} : vector<8x8xf32>, vector<8x8xf32>, vector<8x8xf32> -> vector<8x8xf32>
    %cst_65 = arith.constant 0.353553385 : f32
    %160 = vector.broadcast %cst_65 : f32 to vector<8x8xf32>
    %161 = arith.mulf %159, %160 : vector<8x8xf32>
    %162 = vector.broadcast %129 : vector<1x8xf32> to vector<8x8xf32>
    %163 = arith.addf %161, %162 : vector<8x8xf32>
    %cst_66 = arith.constant dense<0xFF800000> : vector<8xf32>
    %164 = vector.multi_reduction <maximumf>, %163, %cst_66 [1] : vector<8x8xf32> to vector<8xf32>
    %165 = vector.shape_cast %164 : vector<8xf32> to vector<8x1xf32>
    %166 = vector.broadcast %165 : vector<8x1xf32> to vector<8x8xf32>
    %167 = arith.subf %163, %166 : vector<8x8xf32>
    %168 = math.exp %167 : vector<8x8xf32>
    %cst_67 = arith.constant dense<0.000000e+00> : vector<8xf32>
    %169 = vector.multi_reduction <add>, %168, %cst_67 [1] : vector<8x8xf32> to vector<8xf32>
    %170 = vector.shape_cast %169 : vector<8xf32> to vector<8x1xf32>
    %171 = tpu.reciprocal %170 {approx = true} : vector<8x1xf32> -> vector<8x1xf32>
    %172 = vector.broadcast %171 : vector<8x1xf32> to vector<8x8xf32>
    %173 = arith.mulf %168, %172 : vector<8x8xf32>
    %c0_68 = arith.constant 0 : index
    %c5 = arith.constant 5 : index
    %c0_69 = arith.constant 0 : index
    %c0_70 = arith.constant 0 : index
    %174 = vector.load %arg8[%c0_68, %c5, %c0_69, %c0_70] : memref<2x8x8x8xf32, #tpu.memory_space<vmem>>, vector<1x1x8x8xf32>
    %175 = vector.shape_cast %174 : vector<1x1x8x8xf32> to vector<8x8xf32>
    %176 = vector.shape_cast %173 : vector<8x8xf32> to vector<1x1x8x8xf32>
    tpu.vector_store %arg8[%c0_68, %c5, %c0_69, %c0_70], %176 {strides = array<i32>} : memref<2x8x8x8xf32, #tpu.memory_space<vmem>>, vector<1x1x8x8xf32>,
    %cst_71 = arith.constant dense<0.000000e+00> : vector<8x8xf32>
    %177 = tpu.matmul %173, %157, %cst_71 {dimension_numbers = #tpu.dot_dimension_numbers<[1], [0], [0], [1], [0, 0, 1, 1], [], []>} : vector<8x8xf32>, vector<8x8xf32>, vector<8x8xf32> -> vector<8x8xf32>
    %178 = vector.extract_strided_slice %5 {offsets = [8, 0], sizes = [8, 32], strides = [1, 1]} : vector<32x32xf32> to vector<8x32xf32>
    %cst_72 = arith.constant dense<0.000000e+00> : vector<8x32xf32>
    %179 = tpu.matmul %177, %178, %cst_72 {dimension_numbers = #tpu.dot_dimension_numbers<[1], [0], [0], [1], [0, 0, 1, 1], [], []>} : vector<8x8xf32>, vector<8x32xf32>, vector<8x32xf32> -> vector<8x32xf32>
    %180 = arith.addf %154, %179 : vector<8x32xf32>
    %181 = vector.extract_strided_slice %128 {offsets = [0, 16], sizes = [8, 8], strides = [1, 1]} : vector<8x96xf32> to vector<8x8xf32>
    %182 = vector.extract_strided_slice %128 {offsets = [0, 48], sizes = [8, 8], strides = [1, 1]} : vector<8x96xf32> to vector<8x8xf32>
    %183 = vector.extract_strided_slice %128 {offsets = [0, 80], sizes = [8, 8], strides = [1, 1]} : vector<8x96xf32> to vector<8x8xf32>
    %184 = tpu.transpose %182, [1, 0] : vector<8x8xf32> -> vector<8x8xf32>
    %cst_73 = arith.constant dense<0.000000e+00> : vector<8x8xf32>
    %185 = tpu.matmul %181, %184, %cst_73 {dimension_numbers = #tpu.dot_dimension_numbers<[1], [0], [0], [1], [0, 0, 1, 1], [], []>} : vector<8x8xf32>, vector<8x8xf32>, vector<8x8xf32> -> vector<8x8xf32>
    %cst_74 = arith.constant 0.353553385 : f32
    %186 = vector.broadcast %cst_74 : f32 to vector<8x8xf32>
    %187 = arith.mulf %185, %186 : vector<8x8xf32>
    %188 = vector.broadcast %129 : vector<1x8xf32> to vector<8x8xf32>
    %189 = arith.addf %187, %188 : vector<8x8xf32>
    %cst_75 = arith.constant dense<0xFF800000> : vector<8xf32>
    %190 = vector.multi_reduction <maximumf>, %189, %cst_75 [1] : vector<8x8xf32> to vector<8xf32>
    %191 = vector.shape_cast %190 : vector<8xf32> to vector<8x1xf32>
    %192 = vector.broadcast %191 : vector<8x1xf32> to vector<8x8xf32>
    %193 = arith.subf %189, %192 : vector<8x8xf32>
    %194 = math.exp %193 : vector<8x8xf32>
    %cst_76 = arith.constant dense<0.000000e+00> : vector<8xf32>
    %195 = vector.multi_reduction <add>, %194, %cst_76 [1] : vector<8x8xf32> to vector<8xf32>
    %196 = vector.shape_cast %195 : vector<8xf32> to vector<8x1xf32>
    %197 = tpu.reciprocal %196 {approx = true} : vector<8x1xf32> -> vector<8x1xf32>
    %198 = vector.broadcast %197 : vector<8x1xf32> to vector<8x8xf32>
    %199 = arith.mulf %194, %198 : vector<8x8xf32>
    %c0_77 = arith.constant 0 : index
    %c6 = arith.constant 6 : index
    %c0_78 = arith.constant 0 : index
    %c0_79 = arith.constant 0 : index
    %200 = vector.load %arg8[%c0_77, %c6, %c0_78, %c0_79] : memref<2x8x8x8xf32, #tpu.memory_space<vmem>>, vector<1x1x8x8xf32>
    %201 = vector.shape_cast %200 : vector<1x1x8x8xf32> to vector<8x8xf32>
    %202 = vector.shape_cast %199 : vector<8x8xf32> to vector<1x1x8x8xf32>
    tpu.vector_store %arg8[%c0_77, %c6, %c0_78, %c0_79], %202 {strides = array<i32>} : memref<2x8x8x8xf32, #tpu.memory_space<vmem>>, vector<1x1x8x8xf32>,
    %cst_80 = arith.constant dense<0.000000e+00> : vector<8x8xf32>
    %203 = tpu.matmul %199, %183, %cst_80 {dimension_numbers = #tpu.dot_dimension_numbers<[1], [0], [0], [1], [0, 0, 1, 1], [], []>} : vector<8x8xf32>, vector<8x8xf32>, vector<8x8xf32> -> vector<8x8xf32>
    %204 = vector.extract_strided_slice %5 {offsets = [16, 0], sizes = [8, 32], strides = [1, 1]} : vector<32x32xf32> to vector<8x32xf32>
    %cst_81 = arith.constant dense<0.000000e+00> : vector<8x32xf32>
    %205 = tpu.matmul %203, %204, %cst_81 {dimension_numbers = #tpu.dot_dimension_numbers<[1], [0], [0], [1], [0, 0, 1, 1], [], []>} : vector<8x8xf32>, vector<8x32xf32>, vector<8x32xf32> -> vector<8x32xf32>
    %206 = arith.addf %180, %205 : vector<8x32xf32>
    %207 = vector.extract_strided_slice %128 {offsets = [0, 24], sizes = [8, 8], strides = [1, 1]} : vector<8x96xf32> to vector<8x8xf32>
    %208 = vector.extract_strided_slice %128 {offsets = [0, 56], sizes = [8, 8], strides = [1, 1]} : vector<8x96xf32> to vector<8x8xf32>
    %209 = vector.extract_strided_slice %128 {offsets = [0, 88], sizes = [8, 8], strides = [1, 1]} : vector<8x96xf32> to vector<8x8xf32>
    %210 = tpu.transpose %208, [1, 0] : vector<8x8xf32> -> vector<8x8xf32>
    %cst_82 = arith.constant dense<0.000000e+00> : vector<8x8xf32>
    %211 = tpu.matmul %207, %210, %cst_82 {dimension_numbers = #tpu.dot_dimension_numbers<[1], [0], [0], [1], [0, 0, 1, 1], [], []>} : vector<8x8xf32>, vector<8x8xf32>, vector<8x8xf32> -> vector<8x8xf32>
    %cst_83 = arith.constant 0.353553385 : f32
    %212 = vector.broadcast %cst_83 : f32 to vector<8x8xf32>
    %213 = arith.mulf %211, %212 : vector<8x8xf32>
    %214 = vector.broadcast %129 : vector<1x8xf32> to vector<8x8xf32>
    %215 = arith.addf %213, %214 : vector<8x8xf32>
    %cst_84 = arith.constant dense<0xFF800000> : vector<8xf32>
    %216 = vector.multi_reduction <maximumf>, %215, %cst_84 [1] : vector<8x8xf32> to vector<8xf32>
    %217 = vector.shape_cast %216 : vector<8xf32> to vector<8x1xf32>
    %218 = vector.broadcast %217 : vector<8x1xf32> to vector<8x8xf32>
    %219 = arith.subf %215, %218 : vector<8x8xf32>
    %220 = math.exp %219 : vector<8x8xf32>
    %cst_85 = arith.constant dense<0.000000e+00> : vector<8xf32>
    %221 = vector.multi_reduction <add>, %220, %cst_85 [1] : vector<8x8xf32> to vector<8xf32>
    %222 = vector.shape_cast %221 : vector<8xf32> to vector<8x1xf32>
    %223 = tpu.reciprocal %222 {approx = true} : vector<8x1xf32> -> vector<8x1xf32>
    %224 = vector.broadcast %223 : vector<8x1xf32> to vector<8x8xf32>
    %225 = arith.mulf %220, %224 : vector<8x8xf32>
    %c0_86 = arith.constant 0 : index
    %c7 = arith.constant 7 : index
    %c0_87 = arith.constant 0 : index
    %c0_88 = arith.constant 0 : index
    %226 = vector.load %arg8[%c0_86, %c7, %c0_87, %c0_88] : memref<2x8x8x8xf32, #tpu.memory_space<vmem>>, vector<1x1x8x8xf32>
    %227 = vector.shape_cast %226 : vector<1x1x8x8xf32> to vector<8x8xf32>
    %228 = vector.shape_cast %225 : vector<8x8xf32> to vector<1x1x8x8xf32>
    tpu.vector_store %arg8[%c0_86, %c7, %c0_87, %c0_88], %228 {strides = array<i32>} : memref<2x8x8x8xf32, #tpu.memory_space<vmem>>, vector<1x1x8x8xf32>,
    %cst_89 = arith.constant dense<0.000000e+00> : vector<8x8xf32>
    %229 = tpu.matmul %225, %209, %cst_89 {dimension_numbers = #tpu.dot_dimension_numbers<[1], [0], [0], [1], [0, 0, 1, 1], [], []>} : vector<8x8xf32>, vector<8x8xf32>, vector<8x8xf32> -> vector<8x8xf32>
    %230 = vector.extract_strided_slice %5 {offsets = [24, 0], sizes = [8, 32], strides = [1, 1]} : vector<32x32xf32> to vector<8x32xf32>
    %cst_90 = arith.constant dense<0.000000e+00> : vector<8x32xf32>
    %231 = tpu.matmul %229, %230, %cst_90 {dimension_numbers = #tpu.dot_dimension_numbers<[1], [0], [0], [1], [0, 0, 1, 1], [], []>} : vector<8x8xf32>, vector<8x32xf32>, vector<8x32xf32> -> vector<8x32xf32>
    %232 = arith.addf %206, %231 : vector<8x32xf32>
    %233 = tpu.concatenate %127, %232 in 0 : vector<8x32xf32>, vector<8x32xf32> -> vector<16x32xf32>
    %234 = vector.broadcast %14 : vector<1x32xf32> to vector<16x32xf32>
    %235 = arith.addf %233, %234 : vector<16x32xf32>
    %236 = arith.addf %0, %235 : vector<16x32xf32>
    %cst_91 = arith.constant dense<0.000000e+00> : vector<16xf32>
    %237 = vector.multi_reduction <add>, %236, %cst_91 [1] : vector<16x32xf32> to vector<16xf32>
    %238 = vector.shape_cast %237 : vector<16xf32> to vector<16x1xf32>
    %cst_92 = arith.constant 3.200000e+01 : f32
    %239 = vector.broadcast %cst_92 : f32 to vector<16x1xf32>
    %240 = arith.divf %238, %239 : vector<16x1xf32>
    %241 = vector.broadcast %240 : vector<16x1xf32> to vector<16x32xf32>
    %242 = arith.subf %236, %241 : vector<16x32xf32>
    %243 = arith.mulf %242, %242 : vector<16x32xf32>
    %cst_93 = arith.constant dense<0.000000e+00> : vector<16xf32>
    %244 = vector.multi_reduction <add>, %243, %cst_93 [1] : vector<16x32xf32> to vector<16xf32>
    %245 = vector.shape_cast %244 : vector<16xf32> to vector<16x1xf32>
    %cst_94 = arith.constant 3.200000e+01 : f32
    %246 = vector.broadcast %cst_94 : f32 to vector<16x1xf32>
    %247 = arith.divf %245, %246 : vector<16x1xf32>
    %cst_95 = arith.constant 9.99999974E-6 : f32
    %248 = vector.broadcast %cst_95 : f32 to vector<16x1xf32>
    %249 = arith.addf %247, %248 : vector<16x1xf32>
    %250 = math.rsqrt %249 : vector<16x1xf32>
    %251 = vector.broadcast %250 : vector<16x1xf32> to vector<16x32xf32>
    %252 = arith.mulf %242, %251 : vector<16x32xf32>
    %253 = vector.broadcast %15 : vector<1x32xf32> to vector<16x32xf32>
    %254 = arith.mulf %252, %253 : vector<16x32xf32>
    %255 = vector.broadcast %16 : vector<1x32xf32> to vector<16x32xf32>
    %256 = arith.addf %254, %255 : vector<16x32xf32>
    %cst_96 = arith.constant dense<0.000000e+00> : vector<16x128xf32>
    %257 = tpu.matmul %256, %7, %cst_96 {dimension_numbers = #tpu.dot_dimension_numbers<[1], [0], [0], [1], [0, 0, 1, 1], [], []>} : vector<16x32xf32>, vector<32x128xf32>, vector<16x128xf32> -> vector<16x128xf32>
    %258 = vector.broadcast %13 : vector<1x128xf32> to vector<16x128xf32>
    %259 = arith.addf %257, %258 : vector<16x128xf32>
    %cst_97 = arith.constant 0.000000e+00 : f32
    %260 = vector.broadcast %cst_97 : f32 to vector<16x128xf32>
    %261 = arith.maximumf %259, %260 : vector<16x128xf32>
    %cst_98 = arith.constant dense<0.000000e+00> : vector<16x32xf32>
    %262 = tpu.matmul %261, %9, %cst_98 {dimension_numbers = #tpu.dot_dimension_numbers<[1], [0], [0], [1], [0, 0, 1, 1], [], []>} : vector<16x128xf32>, vector<128x32xf32>, vector<16x32xf32> -> vector<16x32xf32>
    %263 = vector.broadcast %17 : vector<1x32xf32> to vector<16x32xf32>
    %264 = arith.addf %262, %263 : vector<16x32xf32>
    %265 = arith.addf %256, %264 : vector<16x32xf32>
    %cst_99 = arith.constant dense<0.000000e+00> : vector<16xf32>
    %266 = vector.multi_reduction <add>, %265, %cst_99 [1] : vector<16x32xf32> to vector<16xf32>
    %267 = vector.shape_cast %266 : vector<16xf32> to vector<16x1xf32>
    %cst_100 = arith.constant 3.200000e+01 : f32
    %268 = vector.broadcast %cst_100 : f32 to vector<16x1xf32>
    %269 = arith.divf %267, %268 : vector<16x1xf32>
    %270 = vector.broadcast %269 : vector<16x1xf32> to vector<16x32xf32>
    %271 = arith.subf %265, %270 : vector<16x32xf32>
    %272 = arith.mulf %271, %271 : vector<16x32xf32>
    %cst_101 = arith.constant dense<0.000000e+00> : vector<16xf32>
    %273 = vector.multi_reduction <add>, %272, %cst_101 [1] : vector<16x32xf32> to vector<16xf32>
    %274 = vector.shape_cast %273 : vector<16xf32> to vector<16x1xf32>
    %cst_102 = arith.constant 3.200000e+01 : f32
    %275 = vector.broadcast %cst_102 : f32 to vector<16x1xf32>
    %276 = arith.divf %274, %275 : vector<16x1xf32>
    %cst_103 = arith.constant 9.99999974E-6 : f32
    %277 = vector.broadcast %cst_103 : f32 to vector<16x1xf32>
    %278 = arith.addf %276, %277 : vector<16x1xf32>
    %279 = math.rsqrt %278 : vector<16x1xf32>
    %280 = vector.broadcast %279 : vector<16x1xf32> to vector<16x32xf32>
    %281 = arith.mulf %271, %280 : vector<16x32xf32>
    %282 = vector.broadcast %18 : vector<1x32xf32> to vector<16x32xf32>
    %283 = arith.mulf %281, %282 : vector<16x32xf32>
    %284 = vector.broadcast %19 : vector<1x32xf32> to vector<16x32xf32>
    %285 = arith.addf %283, %284 : vector<16x32xf32>
    %c1_104 = arith.constant 1 : index
    %c0_105 = arith.constant 0 : index
    %c0_106 = arith.constant 0 : index
    %286 = vector.load %arg2[%c1_104, %c0_105, %c0_106] : memref<2x32x96xf32, #tpu.memory_space<vmem>>, vector<1x32x96xf32>
    %287 = vector.shape_cast %286 : vector<1x32x96xf32> to vector<32x96xf32>
    %c1_107 = arith.constant 1 : index
    %c0_108 = arith.constant 0 : index
    %c0_109 = arith.constant 0 : index
    %288 = vector.load %arg3[%c1_107, %c0_108, %c0_109] : memref<2x32x32xf32, #tpu.memory_space<vmem>>, vector<1x32x32xf32>
    %289 = vector.shape_cast %288 : vector<1x32x32xf32> to vector<32x32xf32>
    %c1_110 = arith.constant 1 : index
    %c0_111 = arith.constant 0 : index
    %c0_112 = arith.constant 0 : index
    %290 = vector.load %arg4[%c1_110, %c0_111, %c0_112] : memref<2x32x128xf32, #tpu.memory_space<vmem>>, vector<1x32x128xf32>
    %291 = vector.shape_cast %290 : vector<1x32x128xf32> to vector<32x128xf32>
    %c1_113 = arith.constant 1 : index
    %c0_114 = arith.constant 0 : index
    %c0_115 = arith.constant 0 : index
    %292 = vector.load %arg5[%c1_113, %c0_114, %c0_115] : memref<2x128x32xf32, #tpu.memory_space<vmem>>, vector<1x128x32xf32>
    %293 = vector.shape_cast %292 : vector<1x128x32xf32> to vector<128x32xf32>
    %c1_116 = arith.constant 1 : index
    %c0_117 = arith.constant 0 : index
    %c0_118 = arith.constant 0 : index
    %294 = vector.load %arg6[%c1_116, %c0_117, %c0_118] : memref<2x8x128xf32, #tpu.memory_space<vmem>>, vector<1x8x128xf32>
    %295 = vector.shape_cast %294 : vector<1x8x128xf32> to vector<8x128xf32>
    %296 = vector.extract_strided_slice %295 {offsets = [0, 0], sizes = [1, 96], strides = [1, 1]} : vector<8x128xf32> to vector<1x96xf32>
    %297 = vector.extract_strided_slice %295 {offsets = [1, 0], sizes = [1, 128], strides = [1, 1]} : vector<8x128xf32> to vector<1x128xf32>
    %298 = vector.extract_strided_slice %295 {offsets = [2, 0], sizes = [1, 32], strides = [1, 1]} : vector<8x128xf32> to vector<1x32xf32>
    %299 = vector.extract_strided_slice %295 {offsets = [3, 0], sizes = [1, 32], strides = [1, 1]} : vector<8x128xf32> to vector<1x32xf32>
    %300 = vector.extract_strided_slice %295 {offsets = [4, 0], sizes = [1, 32], strides = [1, 1]} : vector<8x128xf32> to vector<1x32xf32>
    %301 = vector.extract_strided_slice %295 {offsets = [5, 0], sizes = [1, 32], strides = [1, 1]} : vector<8x128xf32> to vector<1x32xf32>
    %302 = vector.extract_strided_slice %295 {offsets = [6, 0], sizes = [1, 32], strides = [1, 1]} : vector<8x128xf32> to vector<1x32xf32>
    %303 = vector.extract_strided_slice %295 {offsets = [7, 0], sizes = [1, 32], strides = [1, 1]} : vector<8x128xf32> to vector<1x32xf32>
    %cst_119 = arith.constant dense<0.000000e+00> : vector<16x96xf32>
    %304 = tpu.matmul %285, %287, %cst_119 {dimension_numbers = #tpu.dot_dimension_numbers<[1], [0], [0], [1], [0, 0, 1, 1], [], []>} : vector<16x32xf32>, vector<32x96xf32>, vector<16x96xf32> -> vector<16x96xf32>
    %305 = vector.broadcast %296 : vector<1x96xf32> to vector<16x96xf32>
    %306 = arith.addf %304, %305 : vector<16x96xf32>
    %307 = vector.extract_strided_slice %306 {offsets = [0, 0], sizes = [8, 96], strides = [1, 1]} : vector<16x96xf32> to vector<8x96xf32>
    %308 = vector.extract_strided_slice %1 {offsets = [0, 0], sizes = [1, 8], strides = [1, 1]} : vector<2x8xf32> to vector<1x8xf32>
    %309 = vector.extract_strided_slice %307 {offsets = [0, 0], sizes = [8, 8], strides = [1, 1]} : vector<8x96xf32> to vector<8x8xf32>
    %310 = vector.extract_strided_slice %307 {offsets = [0, 32], sizes = [8, 8], strides = [1, 1]} : vector<8x96xf32> to vector<8x8xf32>
    %311 = vector.extract_strided_slice %307 {offsets = [0, 64], sizes = [8, 8], strides = [1, 1]} : vector<8x96xf32> to vector<8x8xf32>
    %312 = tpu.transpose %310, [1, 0] : vector<8x8xf32> -> vector<8x8xf32>
    %cst_120 = arith.constant dense<0.000000e+00> : vector<8x8xf32>
    %313 = tpu.matmul %309, %312, %cst_120 {dimension_numbers = #tpu.dot_dimension_numbers<[1], [0], [0], [1], [0, 0, 1, 1], [], []>} : vector<8x8xf32>, vector<8x8xf32>, vector<8x8xf32> -> vector<8x8xf32>
    %cst_121 = arith.constant 0.353553385 : f32
    %314 = vector.broadcast %cst_121 : f32 to vector<8x8xf32>
    %315 = arith.mulf %313, %314 : vector<8x8xf32>
    %316 = vector.broadcast %308 : vector<1x8xf32> to vector<8x8xf32>
    %317 = arith.addf %315, %316 : vector<8x8xf32>
    %cst_122 = arith.constant dense<0xFF800000> : vector<8xf32>
    %318 = vector.multi_reduction <maximumf>, %317, %cst_122 [1] : vector<8x8xf32> to vector<8xf32>
    %319 = vector.shape_cast %318 : vector<8xf32> to vector<8x1xf32>
    %320 = vector.broadcast %319 : vector<8x1xf32> to vector<8x8xf32>
    %321 = arith.subf %317, %320 : vector<8x8xf32>
    %322 = math.exp %321 : vector<8x8xf32>
    %cst_123 = arith.constant dense<0.000000e+00> : vector<8xf32>
    %323 = vector.multi_reduction <add>, %322, %cst_123 [1] : vector<8x8xf32> to vector<8xf32>
    %324 = vector.shape_cast %323 : vector<8xf32> to vector<8x1xf32>
    %325 = tpu.reciprocal %324 {approx = true} : vector<8x1xf32> -> vector<8x1xf32>
    %326 = vector.broadcast %325 : vector<8x1xf32> to vector<8x8xf32>
    %327 = arith.mulf %322, %326 : vector<8x8xf32>
    %c1_124 = arith.constant 1 : index
    %c0_125 = arith.constant 0 : index
    %c0_126 = arith.constant 0 : index
    %c0_127 = arith.constant 0 : index
    %328 = vector.load %arg8[%c1_124, %c0_125, %c0_126, %c0_127] : memref<2x8x8x8xf32, #tpu.memory_space<vmem>>, vector<1x1x8x8xf32>
    %329 = vector.shape_cast %328 : vector<1x1x8x8xf32> to vector<8x8xf32>
    %330 = vector.shape_cast %327 : vector<8x8xf32> to vector<1x1x8x8xf32>
    tpu.vector_store %arg8[%c1_124, %c0_125, %c0_126, %c0_127], %330 {strides = array<i32>} : memref<2x8x8x8xf32, #tpu.memory_space<vmem>>, vector<1x1x8x8xf32>,
    %cst_128 = arith.constant dense<0.000000e+00> : vector<8x8xf32>
    %331 = tpu.matmul %327, %311, %cst_128 {dimension_numbers = #tpu.dot_dimension_numbers<[1], [0], [0], [1], [0, 0, 1, 1], [], []>} : vector<8x8xf32>, vector<8x8xf32>, vector<8x8xf32> -> vector<8x8xf32>
    %332 = vector.extract_strided_slice %289 {offsets = [0, 0], sizes = [8, 32], strides = [1, 1]} : vector<32x32xf32> to vector<8x32xf32>
    %cst_129 = arith.constant dense<0.000000e+00> : vector<8x32xf32>
    %333 = tpu.matmul %331, %332, %cst_129 {dimension_numbers = #tpu.dot_dimension_numbers<[1], [0], [0], [1], [0, 0, 1, 1], [], []>} : vector<8x8xf32>, vector<8x32xf32>, vector<8x32xf32> -> vector<8x32xf32>
    %334 = vector.extract_strided_slice %307 {offsets = [0, 8], sizes = [8, 8], strides = [1, 1]} : vector<8x96xf32> to vector<8x8xf32>
    %335 = vector.extract_strided_slice %307 {offsets = [0, 40], sizes = [8, 8], strides = [1, 1]} : vector<8x96xf32> to vector<8x8xf32>
    %336 = vector.extract_strided_slice %307 {offsets = [0, 72], sizes = [8, 8], strides = [1, 1]} : vector<8x96xf32> to vector<8x8xf32>
    %337 = tpu.transpose %335, [1, 0] : vector<8x8xf32> -> vector<8x8xf32>
    %cst_130 = arith.constant dense<0.000000e+00> : vector<8x8xf32>
    %338 = tpu.matmul %334, %337, %cst_130 {dimension_numbers = #tpu.dot_dimension_numbers<[1], [0], [0], [1], [0, 0, 1, 1], [], []>} : vector<8x8xf32>, vector<8x8xf32>, vector<8x8xf32> -> vector<8x8xf32>
    %cst_131 = arith.constant 0.353553385 : f32
    %339 = vector.broadcast %cst_131 : f32 to vector<8x8xf32>
    %340 = arith.mulf %338, %339 : vector<8x8xf32>
    %341 = vector.broadcast %308 : vector<1x8xf32> to vector<8x8xf32>
    %342 = arith.addf %340, %341 : vector<8x8xf32>
    %cst_132 = arith.constant dense<0xFF800000> : vector<8xf32>
    %343 = vector.multi_reduction <maximumf>, %342, %cst_132 [1] : vector<8x8xf32> to vector<8xf32>
    %344 = vector.shape_cast %343 : vector<8xf32> to vector<8x1xf32>
    %345 = vector.broadcast %344 : vector<8x1xf32> to vector<8x8xf32>
    %346 = arith.subf %342, %345 : vector<8x8xf32>
    %347 = math.exp %346 : vector<8x8xf32>
    %cst_133 = arith.constant dense<0.000000e+00> : vector<8xf32>
    %348 = vector.multi_reduction <add>, %347, %cst_133 [1] : vector<8x8xf32> to vector<8xf32>
    %349 = vector.shape_cast %348 : vector<8xf32> to vector<8x1xf32>
    %350 = tpu.reciprocal %349 {approx = true} : vector<8x1xf32> -> vector<8x1xf32>
    %351 = vector.broadcast %350 : vector<8x1xf32> to vector<8x8xf32>
    %352 = arith.mulf %347, %351 : vector<8x8xf32>
    %c1_134 = arith.constant 1 : index
    %c1_135 = arith.constant 1 : index
    %c0_136 = arith.constant 0 : index
    %c0_137 = arith.constant 0 : index
    %353 = vector.load %arg8[%c1_134, %c1_135, %c0_136, %c0_137] : memref<2x8x8x8xf32, #tpu.memory_space<vmem>>, vector<1x1x8x8xf32>
    %354 = vector.shape_cast %353 : vector<1x1x8x8xf32> to vector<8x8xf32>
    %355 = vector.shape_cast %352 : vector<8x8xf32> to vector<1x1x8x8xf32>
    tpu.vector_store %arg8[%c1_134, %c1_135, %c0_136, %c0_137], %355 {strides = array<i32>} : memref<2x8x8x8xf32, #tpu.memory_space<vmem>>, vector<1x1x8x8xf32>,
    %cst_138 = arith.constant dense<0.000000e+00> : vector<8x8xf32>
    %356 = tpu.matmul %352, %336, %cst_138 {dimension_numbers = #tpu.dot_dimension_numbers<[1], [0], [0], [1], [0, 0, 1, 1], [], []>} : vector<8x8xf32>, vector<8x8xf32>, vector<8x8xf32> -> vector<8x8xf32>
    %357 = vector.extract_strided_slice %289 {offsets = [8, 0], sizes = [8, 32], strides = [1, 1]} : vector<32x32xf32> to vector<8x32xf32>
    %cst_139 = arith.constant dense<0.000000e+00> : vector<8x32xf32>
    %358 = tpu.matmul %356, %357, %cst_139 {dimension_numbers = #tpu.dot_dimension_numbers<[1], [0], [0], [1], [0, 0, 1, 1], [], []>} : vector<8x8xf32>, vector<8x32xf32>, vector<8x32xf32> -> vector<8x32xf32>
    %359 = arith.addf %333, %358 : vector<8x32xf32>
    %360 = vector.extract_strided_slice %307 {offsets = [0, 16], sizes = [8, 8], strides = [1, 1]} : vector<8x96xf32> to vector<8x8xf32>
    %361 = vector.extract_strided_slice %307 {offsets = [0, 48], sizes = [8, 8], strides = [1, 1]} : vector<8x96xf32> to vector<8x8xf32>
    %362 = vector.extract_strided_slice %307 {offsets = [0, 80], sizes = [8, 8], strides = [1, 1]} : vector<8x96xf32> to vector<8x8xf32>
    %363 = tpu.transpose %361, [1, 0] : vector<8x8xf32> -> vector<8x8xf32>
    %cst_140 = arith.constant dense<0.000000e+00> : vector<8x8xf32>
    %364 = tpu.matmul %360, %363, %cst_140 {dimension_numbers = #tpu.dot_dimension_numbers<[1], [0], [0], [1], [0, 0, 1, 1], [], []>} : vector<8x8xf32>, vector<8x8xf32>, vector<8x8xf32> -> vector<8x8xf32>
    %cst_141 = arith.constant 0.353553385 : f32
    %365 = vector.broadcast %cst_141 : f32 to vector<8x8xf32>
    %366 = arith.mulf %364, %365 : vector<8x8xf32>
    %367 = vector.broadcast %308 : vector<1x8xf32> to vector<8x8xf32>
    %368 = arith.addf %366, %367 : vector<8x8xf32>
    %cst_142 = arith.constant dense<0xFF800000> : vector<8xf32>
    %369 = vector.multi_reduction <maximumf>, %368, %cst_142 [1] : vector<8x8xf32> to vector<8xf32>
    %370 = vector.shape_cast %369 : vector<8xf32> to vector<8x1xf32>
    %371 = vector.broadcast %370 : vector<8x1xf32> to vector<8x8xf32>
    %372 = arith.subf %368, %371 : vector<8x8xf32>
    %373 = math.exp %372 : vector<8x8xf32>
    %cst_143 = arith.constant dense<0.000000e+00> : vector<8xf32>
    %374 = vector.multi_reduction <add>, %373, %cst_143 [1] : vector<8x8xf32> to vector<8xf32>
    %375 = vector.shape_cast %374 : vector<8xf32> to vector<8x1xf32>
    %376 = tpu.reciprocal %375 {approx = true} : vector<8x1xf32> -> vector<8x1xf32>
    %377 = vector.broadcast %376 : vector<8x1xf32> to vector<8x8xf32>
    %378 = arith.mulf %373, %377 : vector<8x8xf32>
    %c1_144 = arith.constant 1 : index
    %c2_145 = arith.constant 2 : index
    %c0_146 = arith.constant 0 : index
    %c0_147 = arith.constant 0 : index
    %379 = vector.load %arg8[%c1_144, %c2_145, %c0_146, %c0_147] : memref<2x8x8x8xf32, #tpu.memory_space<vmem>>, vector<1x1x8x8xf32>
    %380 = vector.shape_cast %379 : vector<1x1x8x8xf32> to vector<8x8xf32>
    %381 = vector.shape_cast %378 : vector<8x8xf32> to vector<1x1x8x8xf32>
    tpu.vector_store %arg8[%c1_144, %c2_145, %c0_146, %c0_147], %381 {strides = array<i32>} : memref<2x8x8x8xf32, #tpu.memory_space<vmem>>, vector<1x1x8x8xf32>,
    %cst_148 = arith.constant dense<0.000000e+00> : vector<8x8xf32>
    %382 = tpu.matmul %378, %362, %cst_148 {dimension_numbers = #tpu.dot_dimension_numbers<[1], [0], [0], [1], [0, 0, 1, 1], [], []>} : vector<8x8xf32>, vector<8x8xf32>, vector<8x8xf32> -> vector<8x8xf32>
    %383 = vector.extract_strided_slice %289 {offsets = [16, 0], sizes = [8, 32], strides = [1, 1]} : vector<32x32xf32> to vector<8x32xf32>
    %cst_149 = arith.constant dense<0.000000e+00> : vector<8x32xf32>
    %384 = tpu.matmul %382, %383, %cst_149 {dimension_numbers = #tpu.dot_dimension_numbers<[1], [0], [0], [1], [0, 0, 1, 1], [], []>} : vector<8x8xf32>, vector<8x32xf32>, vector<8x32xf32> -> vector<8x32xf32>
    %385 = arith.addf %359, %384 : vector<8x32xf32>
    %386 = vector.extract_strided_slice %307 {offsets = [0, 24], sizes = [8, 8], strides = [1, 1]} : vector<8x96xf32> to vector<8x8xf32>
    %387 = vector.extract_strided_slice %307 {offsets = [0, 56], sizes = [8, 8], strides = [1, 1]} : vector<8x96xf32> to vector<8x8xf32>
    %388 = vector.extract_strided_slice %307 {offsets = [0, 88], sizes = [8, 8], strides = [1, 1]} : vector<8x96xf32> to vector<8x8xf32>
    %389 = tpu.transpose %387, [1, 0] : vector<8x8xf32> -> vector<8x8xf32>
    %cst_150 = arith.constant dense<0.000000e+00> : vector<8x8xf32>
    %390 = tpu.matmul %386, %389, %cst_150 {dimension_numbers = #tpu.dot_dimension_numbers<[1], [0], [0], [1], [0, 0, 1, 1], [], []>} : vector<8x8xf32>, vector<8x8xf32>, vector<8x8xf32> -> vector<8x8xf32>
    %cst_151 = arith.constant 0.353553385 : f32
    %391 = vector.broadcast %cst_151 : f32 to vector<8x8xf32>
    %392 = arith.mulf %390, %391 : vector<8x8xf32>
    %393 = vector.broadcast %308 : vector<1x8xf32> to vector<8x8xf32>
    %394 = arith.addf %392, %393 : vector<8x8xf32>
    %cst_152 = arith.constant dense<0xFF800000> : vector<8xf32>
    %395 = vector.multi_reduction <maximumf>, %394, %cst_152 [1] : vector<8x8xf32> to vector<8xf32>
    %396 = vector.shape_cast %395 : vector<8xf32> to vector<8x1xf32>
    %397 = vector.broadcast %396 : vector<8x1xf32> to vector<8x8xf32>
    %398 = arith.subf %394, %397 : vector<8x8xf32>
    %399 = math.exp %398 : vector<8x8xf32>
    %cst_153 = arith.constant dense<0.000000e+00> : vector<8xf32>
    %400 = vector.multi_reduction <add>, %399, %cst_153 [1] : vector<8x8xf32> to vector<8xf32>
    %401 = vector.shape_cast %400 : vector<8xf32> to vector<8x1xf32>
    %402 = tpu.reciprocal %401 {approx = true} : vector<8x1xf32> -> vector<8x1xf32>
    %403 = vector.broadcast %402 : vector<8x1xf32> to vector<8x8xf32>
    %404 = arith.mulf %399, %403 : vector<8x8xf32>
    %c1_154 = arith.constant 1 : index
    %c3_155 = arith.constant 3 : index
    %c0_156 = arith.constant 0 : index
    %c0_157 = arith.constant 0 : index
    %405 = vector.load %arg8[%c1_154, %c3_155, %c0_156, %c0_157] : memref<2x8x8x8xf32, #tpu.memory_space<vmem>>, vector<1x1x8x8xf32>
    %406 = vector.shape_cast %405 : vector<1x1x8x8xf32> to vector<8x8xf32>
    %407 = vector.shape_cast %404 : vector<8x8xf32> to vector<1x1x8x8xf32>
    tpu.vector_store %arg8[%c1_154, %c3_155, %c0_156, %c0_157], %407 {strides = array<i32>} : memref<2x8x8x8xf32, #tpu.memory_space<vmem>>, vector<1x1x8x8xf32>,
    %cst_158 = arith.constant dense<0.000000e+00> : vector<8x8xf32>
    %408 = tpu.matmul %404, %388, %cst_158 {dimension_numbers = #tpu.dot_dimension_numbers<[1], [0], [0], [1], [0, 0, 1, 1], [], []>} : vector<8x8xf32>, vector<8x8xf32>, vector<8x8xf32> -> vector<8x8xf32>
    %409 = vector.extract_strided_slice %289 {offsets = [24, 0], sizes = [8, 32], strides = [1, 1]} : vector<32x32xf32> to vector<8x32xf32>
    %cst_159 = arith.constant dense<0.000000e+00> : vector<8x32xf32>
    %410 = tpu.matmul %408, %409, %cst_159 {dimension_numbers = #tpu.dot_dimension_numbers<[1], [0], [0], [1], [0, 0, 1, 1], [], []>} : vector<8x8xf32>, vector<8x32xf32>, vector<8x32xf32> -> vector<8x32xf32>
    %411 = arith.addf %385, %410 : vector<8x32xf32>
    %412 = vector.extract_strided_slice %306 {offsets = [8, 0], sizes = [8, 96], strides = [1, 1]} : vector<16x96xf32> to vector<8x96xf32>
    %413 = vector.extract_strided_slice %1 {offsets = [1, 0], sizes = [1, 8], strides = [1, 1]} : vector<2x8xf32> to vector<1x8xf32>
    %414 = vector.extract_strided_slice %412 {offsets = [0, 0], sizes = [8, 8], strides = [1, 1]} : vector<8x96xf32> to vector<8x8xf32>
    %415 = vector.extract_strided_slice %412 {offsets = [0, 32], sizes = [8, 8], strides = [1, 1]} : vector<8x96xf32> to vector<8x8xf32>
    %416 = vector.extract_strided_slice %412 {offsets = [0, 64], sizes = [8, 8], strides = [1, 1]} : vector<8x96xf32> to vector<8x8xf32>
    %417 = tpu.transpose %415, [1, 0] : vector<8x8xf32> -> vector<8x8xf32>
    %cst_160 = arith.constant dense<0.000000e+00> : vector<8x8xf32>
    %418 = tpu.matmul %414, %417, %cst_160 {dimension_numbers = #tpu.dot_dimension_numbers<[1], [0], [0], [1], [0, 0, 1, 1], [], []>} : vector<8x8xf32>, vector<8x8xf32>, vector<8x8xf32> -> vector<8x8xf32>
    %cst_161 = arith.constant 0.353553385 : f32
    %419 = vector.broadcast %cst_161 : f32 to vector<8x8xf32>
    %420 = arith.mulf %418, %419 : vector<8x8xf32>
    %421 = vector.broadcast %413 : vector<1x8xf32> to vector<8x8xf32>
    %422 = arith.addf %420, %421 : vector<8x8xf32>
    %cst_162 = arith.constant dense<0xFF800000> : vector<8xf32>
    %423 = vector.multi_reduction <maximumf>, %422, %cst_162 [1] : vector<8x8xf32> to vector<8xf32>
    %424 = vector.shape_cast %423 : vector<8xf32> to vector<8x1xf32>
    %425 = vector.broadcast %424 : vector<8x1xf32> to vector<8x8xf32>
    %426 = arith.subf %422, %425 : vector<8x8xf32>
    %427 = math.exp %426 : vector<8x8xf32>
    %cst_163 = arith.constant dense<0.000000e+00> : vector<8xf32>
    %428 = vector.multi_reduction <add>, %427, %cst_163 [1] : vector<8x8xf32> to vector<8xf32>
    %429 = vector.shape_cast %428 : vector<8xf32> to vector<8x1xf32>
    %430 = tpu.reciprocal %429 {approx = true} : vector<8x1xf32> -> vector<8x1xf32>
    %431 = vector.broadcast %430 : vector<8x1xf32> to vector<8x8xf32>
    %432 = arith.mulf %427, %431 : vector<8x8xf32>
    %c1_164 = arith.constant 1 : index
    %c4_165 = arith.constant 4 : index
    %c0_166 = arith.constant 0 : index
    %c0_167 = arith.constant 0 : index
    %433 = vector.load %arg8[%c1_164, %c4_165, %c0_166, %c0_167] : memref<2x8x8x8xf32, #tpu.memory_space<vmem>>, vector<1x1x8x8xf32>
    %434 = vector.shape_cast %433 : vector<1x1x8x8xf32> to vector<8x8xf32>
    %435 = vector.shape_cast %432 : vector<8x8xf32> to vector<1x1x8x8xf32>
    tpu.vector_store %arg8[%c1_164, %c4_165, %c0_166, %c0_167], %435 {strides = array<i32>} : memref<2x8x8x8xf32, #tpu.memory_space<vmem>>, vector<1x1x8x8xf32>,
    %cst_168 = arith.constant dense<0.000000e+00> : vector<8x8xf32>
    %436 = tpu.matmul %432, %416, %cst_168 {dimension_numbers = #tpu.dot_dimension_numbers<[1], [0], [0], [1], [0, 0, 1, 1], [], []>} : vector<8x8xf32>, vector<8x8xf32>, vector<8x8xf32> -> vector<8x8xf32>
    %437 = vector.extract_strided_slice %289 {offsets = [0, 0], sizes = [8, 32], strides = [1, 1]} : vector<32x32xf32> to vector<8x32xf32>
    %cst_169 = arith.constant dense<0.000000e+00> : vector<8x32xf32>
    %438 = tpu.matmul %436, %437, %cst_169 {dimension_numbers = #tpu.dot_dimension_numbers<[1], [0], [0], [1], [0, 0, 1, 1], [], []>} : vector<8x8xf32>, vector<8x32xf32>, vector<8x32xf32> -> vector<8x32xf32>
    %439 = vector.extract_strided_slice %412 {offsets = [0, 8], sizes = [8, 8], strides = [1, 1]} : vector<8x96xf32> to vector<8x8xf32>
    %440 = vector.extract_strided_slice %412 {offsets = [0, 40], sizes = [8, 8], strides = [1, 1]} : vector<8x96xf32> to vector<8x8xf32>
    %441 = vector.extract_strided_slice %412 {offsets = [0, 72], sizes = [8, 8], strides = [1, 1]} : vector<8x96xf32> to vector<8x8xf32>
    %442 = tpu.transpose %440, [1, 0] : vector<8x8xf32> -> vector<8x8xf32>
    %cst_170 = arith.constant dense<0.000000e+00> : vector<8x8xf32>
    %443 = tpu.matmul %439, %442, %cst_170 {dimension_numbers = #tpu.dot_dimension_numbers<[1], [0], [0], [1], [0, 0, 1, 1], [], []>} : vector<8x8xf32>, vector<8x8xf32>, vector<8x8xf32> -> vector<8x8xf32>
    %cst_171 = arith.constant 0.353553385 : f32
    %444 = vector.broadcast %cst_171 : f32 to vector<8x8xf32>
    %445 = arith.mulf %443, %444 : vector<8x8xf32>
    %446 = vector.broadcast %413 : vector<1x8xf32> to vector<8x8xf32>
    %447 = arith.addf %445, %446 : vector<8x8xf32>
    %cst_172 = arith.constant dense<0xFF800000> : vector<8xf32>
    %448 = vector.multi_reduction <maximumf>, %447, %cst_172 [1] : vector<8x8xf32> to vector<8xf32>
    %449 = vector.shape_cast %448 : vector<8xf32> to vector<8x1xf32>
    %450 = vector.broadcast %449 : vector<8x1xf32> to vector<8x8xf32>
    %451 = arith.subf %447, %450 : vector<8x8xf32>
    %452 = math.exp %451 : vector<8x8xf32>
    %cst_173 = arith.constant dense<0.000000e+00> : vector<8xf32>
    %453 = vector.multi_reduction <add>, %452, %cst_173 [1] : vector<8x8xf32> to vector<8xf32>
    %454 = vector.shape_cast %453 : vector<8xf32> to vector<8x1xf32>
    %455 = tpu.reciprocal %454 {approx = true} : vector<8x1xf32> -> vector<8x1xf32>
    %456 = vector.broadcast %455 : vector<8x1xf32> to vector<8x8xf32>
    %457 = arith.mulf %452, %456 : vector<8x8xf32>
    %c1_174 = arith.constant 1 : index
    %c5_175 = arith.constant 5 : index
    %c0_176 = arith.constant 0 : index
    %c0_177 = arith.constant 0 : index
    %458 = vector.load %arg8[%c1_174, %c5_175, %c0_176, %c0_177] : memref<2x8x8x8xf32, #tpu.memory_space<vmem>>, vector<1x1x8x8xf32>
    %459 = vector.shape_cast %458 : vector<1x1x8x8xf32> to vector<8x8xf32>
    %460 = vector.shape_cast %457 : vector<8x8xf32> to vector<1x1x8x8xf32>
    tpu.vector_store %arg8[%c1_174, %c5_175, %c0_176, %c0_177], %460 {strides = array<i32>} : memref<2x8x8x8xf32, #tpu.memory_space<vmem>>, vector<1x1x8x8xf32>,
    %cst_178 = arith.constant dense<0.000000e+00> : vector<8x8xf32>
    %461 = tpu.matmul %457, %441, %cst_178 {dimension_numbers = #tpu.dot_dimension_numbers<[1], [0], [0], [1], [0, 0, 1, 1], [], []>} : vector<8x8xf32>, vector<8x8xf32>, vector<8x8xf32> -> vector<8x8xf32>
    %462 = vector.extract_strided_slice %289 {offsets = [8, 0], sizes = [8, 32], strides = [1, 1]} : vector<32x32xf32> to vector<8x32xf32>
    %cst_179 = arith.constant dense<0.000000e+00> : vector<8x32xf32>
    %463 = tpu.matmul %461, %462, %cst_179 {dimension_numbers = #tpu.dot_dimension_numbers<[1], [0], [0], [1], [0, 0, 1, 1], [], []>} : vector<8x8xf32>, vector<8x32xf32>, vector<8x32xf32> -> vector<8x32xf32>
    %464 = arith.addf %438, %463 : vector<8x32xf32>
    %465 = vector.extract_strided_slice %412 {offsets = [0, 16], sizes = [8, 8], strides = [1, 1]} : vector<8x96xf32> to vector<8x8xf32>
    %466 = vector.extract_strided_slice %412 {offsets = [0, 48], sizes = [8, 8], strides = [1, 1]} : vector<8x96xf32> to vector<8x8xf32>
    %467 = vector.extract_strided_slice %412 {offsets = [0, 80], sizes = [8, 8], strides = [1, 1]} : vector<8x96xf32> to vector<8x8xf32>
    %468 = tpu.transpose %466, [1, 0] : vector<8x8xf32> -> vector<8x8xf32>
    %cst_180 = arith.constant dense<0.000000e+00> : vector<8x8xf32>
    %469 = tpu.matmul %465, %468, %cst_180 {dimension_numbers = #tpu.dot_dimension_numbers<[1], [0], [0], [1], [0, 0, 1, 1], [], []>} : vector<8x8xf32>, vector<8x8xf32>, vector<8x8xf32> -> vector<8x8xf32>
    %cst_181 = arith.constant 0.353553385 : f32
    %470 = vector.broadcast %cst_181 : f32 to vector<8x8xf32>
    %471 = arith.mulf %469, %470 : vector<8x8xf32>
    %472 = vector.broadcast %413 : vector<1x8xf32> to vector<8x8xf32>
    %473 = arith.addf %471, %472 : vector<8x8xf32>
    %cst_182 = arith.constant dense<0xFF800000> : vector<8xf32>
    %474 = vector.multi_reduction <maximumf>, %473, %cst_182 [1] : vector<8x8xf32> to vector<8xf32>
    %475 = vector.shape_cast %474 : vector<8xf32> to vector<8x1xf32>
    %476 = vector.broadcast %475 : vector<8x1xf32> to vector<8x8xf32>
    %477 = arith.subf %473, %476 : vector<8x8xf32>
    %478 = math.exp %477 : vector<8x8xf32>
    %cst_183 = arith.constant dense<0.000000e+00> : vector<8xf32>
    %479 = vector.multi_reduction <add>, %478, %cst_183 [1] : vector<8x8xf32> to vector<8xf32>
    %480 = vector.shape_cast %479 : vector<8xf32> to vector<8x1xf32>
    %481 = tpu.reciprocal %480 {approx = true} : vector<8x1xf32> -> vector<8x1xf32>
    %482 = vector.broadcast %481 : vector<8x1xf32> to vector<8x8xf32>
    %483 = arith.mulf %478, %482 : vector<8x8xf32>
    %c1_184 = arith.constant 1 : index
    %c6_185 = arith.constant 6 : index
    %c0_186 = arith.constant 0 : index
    %c0_187 = arith.constant 0 : index
    %484 = vector.load %arg8[%c1_184, %c6_185, %c0_186, %c0_187] : memref<2x8x8x8xf32, #tpu.memory_space<vmem>>, vector<1x1x8x8xf32>
    %485 = vector.shape_cast %484 : vector<1x1x8x8xf32> to vector<8x8xf32>
    %486 = vector.shape_cast %483 : vector<8x8xf32> to vector<1x1x8x8xf32>
    tpu.vector_store %arg8[%c1_184, %c6_185, %c0_186, %c0_187], %486 {strides = array<i32>} : memref<2x8x8x8xf32, #tpu.memory_space<vmem>>, vector<1x1x8x8xf32>,
    %cst_188 = arith.constant dense<0.000000e+00> : vector<8x8xf32>
    %487 = tpu.matmul %483, %467, %cst_188 {dimension_numbers = #tpu.dot_dimension_numbers<[1], [0], [0], [1], [0, 0, 1, 1], [], []>} : vector<8x8xf32>, vector<8x8xf32>, vector<8x8xf32> -> vector<8x8xf32>
    %488 = vector.extract_strided_slice %289 {offsets = [16, 0], sizes = [8, 32], strides = [1, 1]} : vector<32x32xf32> to vector<8x32xf32>
    %cst_189 = arith.constant dense<0.000000e+00> : vector<8x32xf32>
    %489 = tpu.matmul %487, %488, %cst_189 {dimension_numbers = #tpu.dot_dimension_numbers<[1], [0], [0], [1], [0, 0, 1, 1], [], []>} : vector<8x8xf32>, vector<8x32xf32>, vector<8x32xf32> -> vector<8x32xf32>
    %490 = arith.addf %464, %489 : vector<8x32xf32>
    %491 = vector.extract_strided_slice %412 {offsets = [0, 24], sizes = [8, 8], strides = [1, 1]} : vector<8x96xf32> to vector<8x8xf32>
    %492 = vector.extract_strided_slice %412 {offsets = [0, 56], sizes = [8, 8], strides = [1, 1]} : vector<8x96xf32> to vector<8x8xf32>
    %493 = vector.extract_strided_slice %412 {offsets = [0, 88], sizes = [8, 8], strides = [1, 1]} : vector<8x96xf32> to vector<8x8xf32>
    %494 = tpu.transpose %492, [1, 0] : vector<8x8xf32> -> vector<8x8xf32>
    %cst_190 = arith.constant dense<0.000000e+00> : vector<8x8xf32>
    %495 = tpu.matmul %491, %494, %cst_190 {dimension_numbers = #tpu.dot_dimension_numbers<[1], [0], [0], [1], [0, 0, 1, 1], [], []>} : vector<8x8xf32>, vector<8x8xf32>, vector<8x8xf32> -> vector<8x8xf32>
    %cst_191 = arith.constant 0.353553385 : f32
    %496 = vector.broadcast %cst_191 : f32 to vector<8x8xf32>
    %497 = arith.mulf %495, %496 : vector<8x8xf32>
    %498 = vector.broadcast %413 : vector<1x8xf32> to vector<8x8xf32>
    %499 = arith.addf %497, %498 : vector<8x8xf32>
    %cst_192 = arith.constant dense<0xFF800000> : vector<8xf32>
    %500 = vector.multi_reduction <maximumf>, %499, %cst_192 [1] : vector<8x8xf32> to vector<8xf32>
    %501 = vector.shape_cast %500 : vector<8xf32> to vector<8x1xf32>
    %502 = vector.broadcast %501 : vector<8x1xf32> to vector<8x8xf32>
    %503 = arith.subf %499, %502 : vector<8x8xf32>
    %504 = math.exp %503 : vector<8x8xf32>
    %cst_193 = arith.constant dense<0.000000e+00> : vector<8xf32>
    %505 = vector.multi_reduction <add>, %504, %cst_193 [1] : vector<8x8xf32> to vector<8xf32>
    %506 = vector.shape_cast %505 : vector<8xf32> to vector<8x1xf32>
    %507 = tpu.reciprocal %506 {approx = true} : vector<8x1xf32> -> vector<8x1xf32>
    %508 = vector.broadcast %507 : vector<8x1xf32> to vector<8x8xf32>
    %509 = arith.mulf %504, %508 : vector<8x8xf32>
    %c1_194 = arith.constant 1 : index
    %c7_195 = arith.constant 7 : index
    %c0_196 = arith.constant 0 : index
    %c0_197 = arith.constant 0 : index
    %510 = vector.load %arg8[%c1_194, %c7_195, %c0_196, %c0_197] : memref<2x8x8x8xf32, #tpu.memory_space<vmem>>, vector<1x1x8x8xf32>
    %511 = vector.shape_cast %510 : vector<1x1x8x8xf32> to vector<8x8xf32>
    %512 = vector.shape_cast %509 : vector<8x8xf32> to vector<1x1x8x8xf32>
    tpu.vector_store %arg8[%c1_194, %c7_195, %c0_196, %c0_197], %512 {strides = array<i32>} : memref<2x8x8x8xf32, #tpu.memory_space<vmem>>, vector<1x1x8x8xf32>,
    %cst_198 = arith.constant dense<0.000000e+00> : vector<8x8xf32>
    %513 = tpu.matmul %509, %493, %cst_198 {dimension_numbers = #tpu.dot_dimension_numbers<[1], [0], [0], [1], [0, 0, 1, 1], [], []>} : vector<8x8xf32>, vector<8x8xf32>, vector<8x8xf32> -> vector<8x8xf32>
    %514 = vector.extract_strided_slice %289 {offsets = [24, 0], sizes = [8, 32], strides = [1, 1]} : vector<32x32xf32> to vector<8x32xf32>
    %cst_199 = arith.constant dense<0.000000e+00> : vector<8x32xf32>
    %515 = tpu.matmul %513, %514, %cst_199 {dimension_numbers = #tpu.dot_dimension_numbers<[1], [0], [0], [1], [0, 0, 1, 1], [], []>} : vector<8x8xf32>, vector<8x32xf32>, vector<8x32xf32> -> vector<8x32xf32>
    %516 = arith.addf %490, %515 : vector<8x32xf32>
    %517 = tpu.concatenate %411, %516 in 0 : vector<8x32xf32>, vector<8x32xf32> -> vector<16x32xf32>
    %518 = vector.broadcast %298 : vector<1x32xf32> to vector<16x32xf32>
    %519 = arith.addf %517, %518 : vector<16x32xf32>
    %520 = arith.addf %285, %519 : vector<16x32xf32>
    %cst_200 = arith.constant dense<0.000000e+00> : vector<16xf32>
    %521 = vector.multi_reduction <add>, %520, %cst_200 [1] : vector<16x32xf32> to vector<16xf32>
    %522 = vector.shape_cast %521 : vector<16xf32> to vector<16x1xf32>
    %cst_201 = arith.constant 3.200000e+01 : f32
    %523 = vector.broadcast %cst_201 : f32 to vector<16x1xf32>
    %524 = arith.divf %522, %523 : vector<16x1xf32>
    %525 = vector.broadcast %524 : vector<16x1xf32> to vector<16x32xf32>
    %526 = arith.subf %520, %525 : vector<16x32xf32>
    %527 = arith.mulf %526, %526 : vector<16x32xf32>
    %cst_202 = arith.constant dense<0.000000e+00> : vector<16xf32>
    %528 = vector.multi_reduction <add>, %527, %cst_202 [1] : vector<16x32xf32> to vector<16xf32>
    %529 = vector.shape_cast %528 : vector<16xf32> to vector<16x1xf32>
    %cst_203 = arith.constant 3.200000e+01 : f32
    %530 = vector.broadcast %cst_203 : f32 to vector<16x1xf32>
    %531 = arith.divf %529, %530 : vector<16x1xf32>
    %cst_204 = arith.constant 9.99999974E-6 : f32
    %532 = vector.broadcast %cst_204 : f32 to vector<16x1xf32>
    %533 = arith.addf %531, %532 : vector<16x1xf32>
    %534 = math.rsqrt %533 : vector<16x1xf32>
    %535 = vector.broadcast %534 : vector<16x1xf32> to vector<16x32xf32>
    %536 = arith.mulf %526, %535 : vector<16x32xf32>
    %537 = vector.broadcast %299 : vector<1x32xf32> to vector<16x32xf32>
    %538 = arith.mulf %536, %537 : vector<16x32xf32>
    %539 = vector.broadcast %300 : vector<1x32xf32> to vector<16x32xf32>
    %540 = arith.addf %538, %539 : vector<16x32xf32>
    %cst_205 = arith.constant dense<0.000000e+00> : vector<16x128xf32>
    %541 = tpu.matmul %540, %291, %cst_205 {dimension_numbers = #tpu.dot_dimension_numbers<[1], [0], [0], [1], [0, 0, 1, 1], [], []>} : vector<16x32xf32>, vector<32x128xf32>, vector<16x128xf32> -> vector<16x128xf32>
    %542 = vector.broadcast %297 : vector<1x128xf32> to vector<16x128xf32>
    %543 = arith.addf %541, %542 : vector<16x128xf32>
    %cst_206 = arith.constant 0.000000e+00 : f32
    %544 = vector.broadcast %cst_206 : f32 to vector<16x128xf32>
    %545 = arith.maximumf %543, %544 : vector<16x128xf32>
    %cst_207 = arith.constant dense<0.000000e+00> : vector<16x32xf32>
    %546 = tpu.matmul %545, %293, %cst_207 {dimension_numbers = #tpu.dot_dimension_numbers<[1], [0], [0], [1], [0, 0, 1, 1], [], []>} : vector<16x128xf32>, vector<128x32xf32>, vector<16x32xf32> -> vector<16x32xf32>
    %547 = vector.broadcast %301 : vector<1x32xf32> to vector<16x32xf32>
    %548 = arith.addf %546, %547 : vector<16x32xf32>
    %549 = arith.addf %540, %548 : vector<16x32xf32>
    %cst_208 = arith.constant dense<0.000000e+00> : vector<16xf32>
    %550 = vector.multi_reduction <add>, %549, %cst_208 [1] : vector<16x32xf32> to vector<16xf32>
    %551 = vector.shape_cast %550 : vector<16xf32> to vector<16x1xf32>
    %cst_209 = arith.constant 3.200000e+01 : f32
    %552 = vector.broadcast %cst_209 : f32 to vector<16x1xf32>
    %553 = arith.divf %551, %552 : vector<16x1xf32>
    %554 = vector.broadcast %553 : vector<16x1xf32> to vector<16x32xf32>
    %555 = arith.subf %549, %554 : vector<16x32xf32>
    %556 = arith.mulf %555, %555 : vector<16x32xf32>
    %cst_210 = arith.constant dense<0.000000e+00> : vector<16xf32>
    %557 = vector.multi_reduction <add>, %556, %cst_210 [1] : vector<16x32xf32> to vector<16xf32>
    %558 = vector.shape_cast %557 : vector<16xf32> to vector<16x1xf32>
    %cst_211 = arith.constant 3.200000e+01 : f32
    %559 = vector.broadcast %cst_211 : f32 to vector<16x1xf32>
    %560 = arith.divf %558, %559 : vector<16x1xf32>
    %cst_212 = arith.constant 9.99999974E-6 : f32
    %561 = vector.broadcast %cst_212 : f32 to vector<16x1xf32>
    %562 = arith.addf %560, %561 : vector<16x1xf32>
    %563 = math.rsqrt %562 : vector<16x1xf32>
    %564 = vector.broadcast %563 : vector<16x1xf32> to vector<16x32xf32>
    %565 = arith.mulf %555, %564 : vector<16x32xf32>
    %566 = vector.broadcast %302 : vector<1x32xf32> to vector<16x32xf32>
    %567 = arith.mulf %565, %566 : vector<16x32xf32>
    %568 = vector.broadcast %303 : vector<1x32xf32> to vector<16x32xf32>
    %569 = arith.addf %567, %568 : vector<16x32xf32>
    %c0_213 = arith.constant 0 : index
    %c0_214 = arith.constant 0 : index
    %570 = vector.load %arg7[%c0_213, %c0_214] : memref<16x32xf32, #tpu.memory_space<vmem>>, vector<16x32xf32>
    tpu.vector_store %arg7[%c0_213, %c0_214], %569 {strides = array<i32>} : memref<16x32xf32, #tpu.memory_space<vmem>>, vector<16x32xf32>,
    return
  }
}

</mosaic_0001>

<bundles_post_ra>
// kernel: tpu_custom_call.1
= control target key start
LH: loop header
LB: loop body
LE: loop exit
PB: predicated region body
PF: predicated region fallthrough
CT: control target
= control target key end

     0   :  { %14 = vsyncpa [#allocation3], 0  ;;  %vm66_vm0 = vcmask 261120   ;;  %s6253_s0 = inlined_call_operand.vmem [shape: f32[16,32], index: 0, kind: input, shape index: {}]   ;;  %s6254_s1 = inlined_call_operand.vmem [shape: f32[2,8], index: 1, kind: input, shape index: {}]   ;;  %s6255_s2 = inlined_call_operand.vmem [shape: f32[2,32,96], index: 2, kind: input, shape index: {}]   ;;  %s6256_s3 = inlined_call_operand.vmem [shape: f32[2,32,32], index: 3, kind: input, shape index: {}]   ;;  %s6257_s4 = inlined_call_operand.vmem [shape: f32[2,32,128], index: 4, kind: input, shape index: {}]   ;;  %s6258_s5 = inlined_call_operand.vmem [shape: f32[2,128,32], index: 5, kind: input, shape index: {}]   ;;  %s6259_s6 = inlined_call_operand.vmem [shape: f32[2,8,128], index: 6, kind: input, shape index: {}]   ;;  %s6260_s7 = inlined_call_operand.hbm [shape: f32[16,32], index: 7, kind: output, shape index: {0}]   ;;  %s6261_s8 = inlined_call_operand.hbm [shape: f32[2,8,8,8], index: 8, kind: output, shape index: {1}]  }
   0x1   :  { %v36_v0 = vld [vmem:[%s6255_s2 + $0x18] sm:$0xff]  ;;  %v35_v1 = vld [vmem:[%s6255_s2 + $0x10] sm:$0xff]  ;;  %v5513_v2 = vld [vmem:[%s6253_s0] sm:$0xff] }
   0x2   :  { %4947 = vmatprep.subr.mxu0 %v36_v0  ;;  %v34_v3 = vld [vmem:[%s6255_s2 + $0x8] sm:$0xff]  ;;  %4955 = vmatprep.mubr.msk.f32.mxu0 %vm66_vm0, %v5513_v2 }
   0x3   :  { %4948 = vmatpush3.msra.mxu0 %v36_v0 }
   0x4   :  { %15 = vsyncpa [#allocation5], 0  ;;  %4949 = vmatprep.subr.mxu0 %v35_v1  ;;  %v33_v4 = vld [vmem:[%s6255_s2] sm:$0xff]  ;;  %v5526_v5 = vld [vmem:[%s6253_s0 + $0x8] sm:$0xff]  ;;  %v5442_v6 = vmov 0.0   ;;  %v62_v7 = vlaneseq  ;;  %vm5443_vm1 = vmmov 0  }
   0x5   :  { %4950 = vmatpush3.msra.mxu0 %v35_v1  ;;  %4983 = vmatprep.subr.mxu1 %v5442_v6  ;;  %v5544_v10 = vld [vmem:[%s6259_s6] sm:$0xff]  ;;  %s5444_s18 = smov 64   ;;  %s5445_s19 = smov 96   ;;  %vm151_vm2 = vcmask 64512   ;;  %v5613_v54 = vld [vmem:[%s6256_s3 + $0x8] sm:$0xff] }
   0x6   :  { %4951 = vmatprep.subr.mxu0 %v34_v3  ;;  %v5532_v8 = vshrl.u32 %v62_v7, 7  ;;  %4985 = vmatprep.mubr.msk.f32.mxu1 %vm5443_vm1, %v5442_v6  ;;  %s5446_s20 = smov 88   ;;  %v5568_v18 = vld [vmem:[%s6254_s1] sm:$0x3]  ;;  %s5447_s1 = smov 120  }
   0x7   :  { %4952 = vmatpush3.msra.mxu0 %v34_v3  ;;  %v5591_v35 = vld [vmem:[%s6256_s3] sm:$0xff]  ;;  %s5448_s25 = smov 56   ;;  %s5449_s26 = smov 80  }
   0x8   :  { %4953 = vmatprep.subr.mxu0 %v33_v4  ;;  %v5535_v9 = vsub.s32 0, %v5532_v8  ;;  %4984 = vmatpush3.msra.mxu1 %v5591_v35  ;;  %s5450_s27 = smov 112   ;;  %s5451_s30 = smov 48  }
   0x9   :  { %4954 = vmatpush3.msra.mxu0 %v33_v4  ;;  %4993 = vmatprep.subr.mxu1 %v5442_v6  ;;  %s5452_s9 = smov 72   ;;  %s5453_s10 = smov 104  }
   0xa   :  { %4956 = vmatmul.mubr.msk.f32.vlgmr.msra.gmra.mxu0 %vm66_vm0, %v5526_v5  ;;  %4958 = vmatprep.subr.mxu0 %v5442_v6  ;;  %v65_v11 = vrot.slane %v5544_v10, %v5535_v9  ;;  %v5572_v19 = vrot.slane %v5568_v18, %v5535_v9  ;;  %s5454_s11 = smov 40  }
   0xb   :  { %4960 = vmatprep.mubr.msk.f32.mxu0 %vm5443_vm1, %v5442_v6 }
  0xca   :  { %v4957_v12 = vpop.f32.mrf.mxu0 }
  0xcb   :  { %v5548_v13 = vadd.f32 %v4957_v12, %v65_v11 }
  0xcc   :  { %v139_v14 = vpop.f32.mrf.mxu0 }
  0xcd   :  { %v5550_v15 = vadd.f32 %v139_v14, %v65_v11 }
  0xcf   :  { %244 = vrot.lane.b32.xlu1 %v5550_v15, %s5444_s18  ;;  %149 = vrot.lane.b32.xlu0 %v5550_v15, %s5445_s19 }
  0xd3   :  { %322 = vrot.lane.b32.xlu1 %v5550_v15, %s5446_s20 }
 0x141   :  { %v150_v16 = vpop.permute.xlu0 %149  ;;  %v245_v17 = vpop.permute.xlu1 %244 }
 0x142   :  { %4959 = vmatpush3.xpose.msk.msra.mxu0 %vm151_vm2, %v150_v16  ;;  %v5646_v16 = vld [vmem:[%s6256_s3 + $0x10] sm:$0xff] }
 0x143   :  { %4963 = vmatprep.subr.mxu0 %v5442_v6 }
 0x145   :  { %4961 = vmatmul.mubr.msk.f32.vlgmr.msra.gmra.mxu0 %vm151_vm2, %v5550_v15  ;;  %v323_v30 = vpop.permute.xlu1 %322 }
 0x146   :  { %4964 = vmatpush3.msra.mxu0 %v245_v17  ;;  %4965 = vmatprep.mubr.msk.f32.mxu0 %vm5443_vm1, %v5442_v6 }
 0x147   :  { %4968 = vmatprep.subr.mxu0 %v5442_v6 }
 0x205   :  { %v222_v20 = vpop.f32.mrf.mxu0 }
 0x206   :  { %v226_v21 = vmul.f32 0.35355338, %v222_v20 }
 0x207   :  { %v4962_v22 = vpop.f32.mrf.mxu0 }
 0x208   :  { %v231_v23 = vadd.f32 %v5572_v19, %v226_v21 }
 0x20a   :  { %v232_v24 = vsel %vm151_vm2, %v231_v23, -inf }
 0x20b   :  { %233 = vmax.xlane.f32.xlu0 %v232_v24 }
 0x294   :  { %v234_v25 = vpop.xlane.xlu0 %233 }
 0x295   :  { %v235_v26 = vsub.f32 %v231_v23, %v234_v25 }
 0x297   :  { %v236_v27 = vmul.f32 1.442695, %v235_v26 }
 0x299   :  { %5318 = vpow2.f32 %v236_v27 }
 0x2a6   :  { %v5319_v28 = vpop.eup %5318 }
 0x2a7   :  { %v238_v29 = vsel %vm151_vm2, %v5319_v28, 0.0 }
 0x2a8   :  { %239 = vadd.xlane.f32.xlu1 %v238_v29 }
 0x2b9   :  { %320 = vrot.lane.b32.xlu1 %v5550_v15, %s5447_s1 }
 0x331   :  { %v240_v31 = vpop.xlane.xlu1 %239 }
 0x332   :  { %5320 = vrcp.f32 %v240_v31 }
 0x335   :  { %v321_v34 = vpop.permute.xlu1 %320 }
 0x33f   :  { %v5321_v32 = vpop.eup %5320 }
 0x340   :  { %v242_v33 = vmul.f32 %v5321_v32, %v5319_v28 }
 0x342   :  { %243 = vst.msk [vmem:[#allocation4] sm:$0xff] %vm151_vm2, %v242_v33  ;;  %4966 = vmatmul.mubr.msk.f32.vlgmr.msra.gmra.mxu0 %vm151_vm2, %v242_v33 }
 0x343   :  { %4969 = vmatpush3.xpose.msk.msra.mxu0 %vm151_vm2, %v323_v30  ;;  %4970 = vmatprep.mubr.msk.f32.mxu0 %vm5443_vm1, %v5442_v6 }
 0x344   :  { %4973 = vmatprep.subr.mxu0 %v5442_v6 }
 0x346   :  { %4971 = vmatmul.mubr.msk.f32.vlgmr.msra.gmra.mxu0 %vm151_vm2, %v321_v34 }
 0x347   :  { %4975 = vmatprep.mubr.msk.f32.mxu0 %vm5443_vm1, %v5442_v6 }
 0x402   :  { %v316_v36 = vpop.f32.mrf.mxu0 }
 0x403   :  { %4986 = vmatmul.mubr.msk.f32.vlgmr.msra.gmra.mxu1 %vm151_vm2, %v316_v36 }
 0x404   :  { %v4967_v37 = vpop.f32.mrf.mxu0  ;;  %4995 = vmatprep.mubr.msk.f32.mxu1 %vm5443_vm1, %v5442_v6 }
 0x406   :  { %v394_v38 = vpop.f32.mrf.mxu0 }
 0x407   :  { %v398_v39 = vmul.f32 0.35355338, %v394_v38 }
 0x408   :  { %v4972_v40 = vpop.f32.mrf.mxu0 }
 0x409   :  { %v399_v41 = vadd.f32 %v398_v39, %v5572_v19 }
 0x40b   :  { %v400_v42 = vsel %vm151_vm2, %v399_v41, -inf }
 0x40c   :  { %401 = vmax.xlane.f32.xlu1 %v400_v42 }
 0x495   :  { %v402_v43 = vpop.xlane.xlu1 %401 }
 0x496   :  { %v403_v44 = vsub.f32 %v399_v41, %v402_v43 }
 0x498   :  { %v404_v45 = vmul.f32 1.442695, %v403_v44 }
 0x49a   :  { %5322 = vpow2.f32 %v404_v45 }
 0x4a7   :  { %v5323_v46 = vpop.eup %5322 }
 0x4a8   :  { %v406_v47 = vsel %vm151_vm2, %v5323_v46, 0.0 }
 0x4a9   :  { %407 = vadd.xlane.f32.xlu0 %v406_v47  ;;  %v5694_v47 = vld [vmem:[%s6256_s3 + $0x18] sm:$0xff] }
 0x4bf   :  { %413 = vrot.lane.b32.xlu0 %v5550_v15, %s5448_s25 }
 0x4c3   :  { %v5603_v48 = vpop.f32.mrf.mxu1  ;;  %637 = vrot.lane.b32.xlu0 %v5550_v15, %s5449_s26 }
 0x4c5   :  { %v4987_v49 = vpop.f32.mrf.mxu1 }
 0x4c7   :  { %635 = vrot.lane.b32.xlu0 %v5550_v15, %s5450_s27 }
 0x532   :  { %v408_v50 = vpop.xlane.xlu0 %407 }
 0x533   :  { %5324 = vrcp.f32 %v408_v50 }
 0x536   :  { %v414_v51 = vpop.permute.xlu0 %413 }
 0x537   :  { %4974 = vmatpush3.msra.mxu0 %v414_v51 }
 0x538   :  { %4978 = vmatprep.subr.mxu0 %v5442_v6 }
 0x53a   :  { %v638_v55 = vpop.permute.xlu0 %637 }
 0x53e   :  { %v636_v58 = vpop.permute.xlu0 %635 }
 0x540   :  { %v5325_v52 = vpop.eup %5324 }
 0x541   :  { %v410_v53 = vmul.f32 %v5325_v52, %v5323_v46 }
 0x543   :  { %412 = vst.msk [vmem:[#allocation4 + $0x8] sm:$0xff] %vm151_vm2, %v410_v53  ;;  %4976 = vmatmul.mubr.msk.f32.vlgmr.msra.gmra.mxu0 %vm151_vm2, %v410_v53 }
 0x544   :  { %4979 = vmatpush3.msra.mxu0 %v5613_v54  ;;  %4980 = vmatprep.mubr.msk.f32.mxu0 %vm5443_vm1, %v5442_v6 }
 0x545   :  { %4988 = vmatprep.subr.mxu0 %v5442_v6 }
 0x603   :  { %v485_v56 = vpop.f32.mrf.mxu0 }
 0x604   :  { %4981 = vmatmul.mubr.msk.f32.vlgmr.msra.gmra.mxu0 %vm151_vm2, %v485_v56 }
 0x605   :  { %4989 = vmatpush3.xpose.msk.msra.mxu0 %vm151_vm2, %v638_v55  ;;  %v4977_v57 = vpop.f32.mrf.mxu0  ;;  %4990 = vmatprep.mubr.msk.f32.mxu0 %vm5443_vm1, %v5442_v6 }
 0x606   :  { %4998 = vmatprep.subr.mxu0 %v5442_v6 }
 0x608   :  { %4991 = vmatmul.mubr.msk.f32.vlgmr.msra.gmra.mxu0 %vm151_vm2, %v636_v58 }
 0x609   :  { %5000 = vmatprep.mubr.msk.f32.mxu0 %vm5443_vm1, %v5442_v6  ;;  %4999 = vmatpush3.msra.mxu0 %v5646_v16 }
 0x60a   :  { %5008 = vmatprep.subr.mxu0 %v5442_v6 }
 0x6c4   :  { %v5629_v59 = vpop.f32.mrf.mxu0 }
 0x6c5   :  { %v632_v37 = vadd.f32 %v5603_v48, %v5629_v59  ;;  %v5699_v48 = vsub.s32 1, %v5532_v8 }
 0x6c6   :  { %v4982_v60 = vpop.f32.mrf.mxu0 }
 0x6c7   :  { %v5706_v51 = vrot.slane %v5568_v18, %v5699_v48 }
 0x6c8   :  { %v709_v61 = vpop.f32.mrf.mxu0 }
 0x6c9   :  { %v713_v62 = vmul.f32 0.35355338, %v709_v61 }
 0x6ca   :  { %v4992_v63 = vpop.f32.mrf.mxu0 }
 0x6cb   :  { %v714_v0 = vadd.f32 %v713_v62, %v5572_v19 }
 0x6cd   :  { %v715_v1 = vsel %vm151_vm2, %v714_v0, -inf }
 0x6ce   :  { %716 = vmax.xlane.f32.xlu1 %v715_v1 }
 0x6df   :  { %728 = vrot.lane.b32.xlu1 %v5550_v15, %s5451_s30 }
 0x6e3   :  { %880 = vrot.lane.b32.xlu1 %v5550_v15, %s5452_s9 }
 0x6e7   :  { %878 = vrot.lane.b32.xlu1 %v5550_v15, %s5453_s10 }
 0x757   :  { %v717_v3 = vpop.xlane.xlu1 %716 }
 0x758   :  { %v718_v4 = vsub.f32 %v714_v0, %v717_v3 }
 0x75a   :  { %v719_v7 = vmul.f32 1.442695, %v718_v4 }
 0x75b   :  { %v729_v11 = vpop.permute.xlu1 %728 }
 0x75c   :  { %5326 = vpow2.f32 %v719_v7  ;;  %4994 = vmatpush3.msra.mxu1 %v729_v11 }
 0x75d   :  { %5003 = vmatprep.subr.mxu1 %v5442_v6 }
 0x75f   :  { %v881_v21 = vpop.permute.xlu1 %880 }
 0x769   :  { %v5327_v12 = vpop.eup %5326 }
 0x76a   :  { %v721_v14 = vsel %vm151_vm2, %v5327_v12, 0.0 }
 0x76b   :  { %722 = vadd.xlane.f32.xlu0 %v721_v14 }
 0x781   :  { %971 = vrot.lane.b32.xlu0 %v5550_v15, %s5454_s11  ;;  %v879_v15 = vpop.permute.xlu1 %878 }
 0x7f4   :  { %v723_v17 = vpop.xlane.xlu0 %722 }
 0x7f5   :  { %5328 = vrcp.f32 %v723_v17 }
 0x7f8   :  { %v972_v24 = vpop.permute.xlu0 %971 }
 0x802   :  { %v5329_v20 = vpop.eup %5328 }
 0x803   :  { %v725_v22 = vmul.f32 %v5329_v20, %v5327_v12 }
 0x805   :  { %727 = vst.msk [vmem:[#allocation4 + $0x10] sm:$0xff] %vm151_vm2, %v725_v22  ;;  %4996 = vmatmul.mubr.msk.f32.vlgmr.msra.gmra.mxu1 %vm151_vm2, %v725_v22 }
 0x806   :  { %5004 = vmatpush3.xpose.msk.msra.mxu1 %vm151_vm2, %v881_v21  ;;  %5005 = vmatprep.mubr.msk.f32.mxu1 %vm5443_vm1, %v5442_v6 }
 0x807   :  { %5013 = vmatprep.subr.mxu1 %v5442_v6 }
 0x809   :  { %5006 = vmatmul.mubr.msk.f32.vlgmr.msra.gmra.mxu1 %vm151_vm2, %v879_v15 }
 0x80a   :  { %5015 = vmatprep.mubr.msk.f32.mxu1 %vm5443_vm1, %v5442_v6  ;;  %5014 = vmatpush3.msra.mxu1 %v5694_v47 }
 0x80b   :  { %5023 = vmatprep.subr.mxu1 %v5442_v6 }
 0x8c5   :  { %v800_v23 = vpop.f32.mrf.mxu1 }
 0x8c6   :  { %5001 = vmatmul.mubr.msk.f32.vlgmr.msra.gmra.mxu0 %vm151_vm2, %v800_v23 }
 0x8c7   :  { %5009 = vmatpush3.msra.mxu0 %v972_v24  ;;  %v4997_v25 = vpop.f32.mrf.mxu1  ;;  %5010 = vmatprep.mubr.msk.f32.mxu0 %vm5443_vm1, %v5442_v6 }
 0x8c8   :  { %5018 = vmatprep.subr.mxu0 %v5442_v6 }
 0x8c9   :  { %v952_v26 = vpop.f32.mrf.mxu1 }
 0x8ca   :  { %v956_v27 = vmul.f32 0.35355338, %v952_v26 }
 0x8cb   :  { %v5007_v28 = vpop.f32.mrf.mxu1 }
 0x8cc   :  { %v957_v29 = vadd.f32 %v956_v27, %v5572_v19 }
 0x8ce   :  { %v958_v30 = vsel %vm151_vm2, %v957_v29, -inf }
 0x8cf   :  { %959 = vmax.xlane.f32.xlu1 %v958_v30 }
 0x8e0   :  { %1293 = vrot.lane.b32.xlu1 %v5548_v13, %s5447_s1 }
 0x958   :  { %v960_v31 = vpop.xlane.xlu1 %959 }
 0x959   :  { %v961_v32 = vsub.f32 %v957_v29, %v960_v31 }
 0x95b   :  { %v962_v33 = vmul.f32 1.442695, %v961_v32 }
 0x95c   :  { %v1294_v46 = vpop.permute.xlu1 %1293 }
 0x95d   :  { %5330 = vpow2.f32 %v962_v33 }
 0x96a   :  { %v5331_v34 = vpop.eup %5330 }
 0x96b   :  { %v964_v36 = vsel %vm151_vm2, %v5331_v34, 0.0 }
 0x96c   :  { %965 = vadd.xlane.f32.xlu0 %v964_v36 }
 0x982   :  { %1122 = vrot.lane.b32.xlu0 %v5548_v13, %s5445_s19 }
 0x986   :  { %1295 = vrot.lane.b32.xlu0 %v5548_v13, %s5446_s20  ;;  %v873_v38 = vpop.f32.mrf.mxu0 }
 0x987   :  { %v877_v39 = vadd.f32 %v873_v38, %v632_v37 }
 0x988   :  { %v5002_v40 = vpop.f32.mrf.mxu0 }
 0x9f5   :  { %v966_v41 = vpop.xlane.xlu0 %965 }
 0x9f6   :  { %5332 = vrcp.f32 %v966_v41 }
 0x9f9   :  { %v1123_v43 = vpop.permute.xlu0 %1122 }
 0x9fd   :  { %v1296_v45 = vpop.permute.xlu0 %1295 }
 0xa03   :  { %v5333_v42 = vpop.eup %5332 }
 0xa04   :  { %v968_v44 = vmul.f32 %v5333_v42, %v5331_v34 }
 0xa06   :  { %970 = vst.msk [vmem:[#allocation4 + $0x18] sm:$0xff] %vm151_vm2, %v968_v44  ;;  %5011 = vmatmul.mubr.msk.f32.vlgmr.msra.gmra.mxu0 %vm151_vm2, %v968_v44 }
 0xa07   :  { %5019 = vmatpush3.xpose.msk.msra.mxu0 %vm151_vm2, %v1123_v43  ;;  %5020 = vmatprep.mubr.msk.f32.mxu0 %vm5443_vm1, %v5442_v6 }
 0xa08   :  { %5028 = vmatprep.subr.mxu0 %v5442_v6 }
 0xa0a   :  { %5021 = vmatmul.mubr.msk.f32.vlgmr.msra.gmra.mxu0 %vm151_vm2, %v5548_v13 }
 0xa0b   :  { %5029 = vmatpush3.xpose.msk.msra.mxu0 %vm151_vm2, %v1296_v45  ;;  %5030 = vmatprep.mubr.msk.f32.mxu0 %vm5443_vm1, %v5442_v6 }
 0xa0c   :  { %5038 = vmatprep.subr.mxu0 %v5442_v6 }
 0xa0e   :  { %5031 = vmatmul.mubr.msk.f32.vlgmr.msra.gmra.mxu0 %vm151_vm2, %v1294_v46 }
 0xa0f   :  { %5039 = vmatpush3.msra.mxu0 %v5613_v54  ;;  %5040 = vmatprep.mubr.msk.f32.mxu0 %vm5443_vm1, %v5442_v6 }
 0xa10   :  { %5048 = vmatprep.subr.mxu0 %v5442_v6 }
 0xac6   :  { %v1043_v49 = vpop.f32.mrf.mxu0 }
 0xac7   :  { %5016 = vmatmul.mubr.msk.f32.vlgmr.msra.gmra.mxu1 %vm151_vm2, %v1043_v49 }
 0xac8   :  { %v5012_v50 = vpop.f32.mrf.mxu0  ;;  %5025 = vmatprep.mubr.msk.f32.mxu1 %vm5443_vm1, %v5442_v6 }
 0xaca   :  { %v1194_v52 = vpop.f32.mrf.mxu0 }
 0xacb   :  { %v1198_v53 = vmul.f32 0.35355338, %v1194_v52 }
 0xacc   :  { %v5022_v54 = vpop.f32.mrf.mxu0 }
 0xacd   :  { %v1203_v55 = vadd.f32 %v5706_v51, %v1198_v53 }
 0xace   :  { %v1367_v56 = vpop.f32.mrf.mxu0 }
 0xacf   :  { %v1371_v57 = vmul.f32 0.35355338, %v1367_v56  ;;  %v1204_v58 = vsel %vm151_vm2, %v1203_v55, -inf }
 0xad0   :  { %1205 = vmax.xlane.f32.xlu0 %v1204_v58  ;;  %v5032_v59 = vpop.f32.mrf.mxu0 }
 0xad1   :  { %v1372_v60 = vadd.f32 %v1371_v57, %v5706_v51 }
 0xad3   :  { %v1373_v61 = vsel %vm151_vm2, %v1372_v60, -inf }
 0xad4   :  { %1374 = vmax.xlane.f32.xlu1 %v1373_v61 }
 0xae5   :  { %1386 = vrot.lane.b32.xlu1 %v5548_v13, %s5448_s25 }
 0xb59   :  { %v1206_v18 = vpop.xlane.xlu0 %1205 }
 0xb5a   :  { %v1207_v62 = vsub.f32 %v1203_v55, %v1206_v18 }
 0xb5c   :  { %v1208_v63 = vmul.f32 1.442695, %v1207_v62 }
 0xb5d   :  { %v1375_v0 = vpop.xlane.xlu1 %1374 }
 0xb5e   :  { %5334 = vpow2.f32 %v1208_v63  ;;  %v1376_v1 = vsub.f32 %v1372_v60, %v1375_v0 }
 0xb60   :  { %v1377_v3 = vmul.f32 1.442695, %v1376_v1 }
 0xb61   :  { %v1387_v25 = vpop.permute.xlu1 %1386 }
 0xb62   :  { %5336 = vpow2.f32 %v1377_v3  ;;  %v2096_v3 = vsub.s32 2, %v5532_v8 }
 0xb6b   :  { %v5335_v4 = vpop.eup %5334 }
 0xb6c   :  { %v1210_v7 = vsel %vm151_vm2, %v5335_v4, 0.0 }
 0xb6d   :  { %1211 = vadd.xlane.f32.xlu0 %v1210_v7 }
 0xb6f   :  { %v5337_v11 = vpop.eup %5336 }
 0xb70   :  { %v1379_v12 = vsel %vm151_vm2, %v5337_v11, 0.0 }
 0xb71   :  { %1380 = vadd.xlane.f32.xlu0 %v1379_v12 }
 0xb87   :  { %v1116_v14 = vpop.f32.mrf.mxu1  ;;  %1217 = vrot.lane.b32.xlu0 %v5548_v13, %s5444_s18 }
 0xb88   :  { %v5718_v17 = vadd.f32 %v1116_v14, %v877_v39 }
 0xb89   :  { %v5017_v20 = vpop.f32.mrf.mxu1 }
 0xb8b   :  { %1610 = vrot.lane.b32.xlu0 %v5548_v13, %s5449_s26 }
 0xb8f   :  { %1608 = vrot.lane.b32.xlu0 %v5548_v13, %s5450_s27 }
 0xbf6   :  { %v1212_v21 = vpop.xlane.xlu0 %1211 }
 0xbf7   :  { %5338 = vrcp.f32 %v1212_v21 }
 0xbfa   :  { %v1381_v22 = vpop.xlane.xlu0 %1380 }
 0xbfb   :  { %5340 = vrcp.f32 %v1381_v22 }
 0xbfe   :  { %v1218_v15 = vpop.permute.xlu0 %1217 }
 0xbff   :  { %5024 = vmatpush3.msra.mxu1 %v1218_v15 }
 0xc00   :  { %5033 = vmatprep.subr.mxu1 %v5442_v6 }
 0xc02   :  { %v1611_v29 = vpop.permute.xlu0 %1610 }
 0xc04   :  { %v5339_v23 = vpop.eup %5338 }
 0xc05   :  { %v1214_v24 = vmul.f32 %v5339_v23, %v5335_v4  ;;  %v2097_v4 = vrot.slane %v5544_v10, %v2096_v3 }
 0xc07   :  { %1216 = vst.msk [vmem:[#allocation4 + $0x20] sm:$0xff] %vm151_vm2, %v1214_v24  ;;  %5026 = vmatmul.mubr.msk.f32.vlgmr.msra.gmra.mxu1 %vm151_vm2, %v1214_v24  ;;  %v2098_v7 = vadd.f32 %v2097_v4, %v5718_v17 }
 0xc08   :  { %v5341_v26 = vpop.eup %5340  ;;  %5034 = vmatpush3.msra.mxu1 %v1387_v25  ;;  %5035 = vmatprep.mubr.msk.f32.mxu1 %vm5443_vm1, %v5442_v6 }
 0xc09   :  { %v1383_v27 = vmul.f32 %v5341_v26, %v5337_v11  ;;  %5043 = vmatprep.subr.mxu1 %v5442_v6  ;;  %v2100_v14 = vadd.f32 %v2098_v7, %v5513_v2 }
 0xc0b   :  { %1385 = vst.msk [vmem:[#allocation4 + $0x28] sm:$0xff] %vm151_vm2, %v1383_v27  ;;  %5036 = vmatmul.mubr.msk.f32.vlgmr.msra.gmra.mxu1 %vm151_vm2, %v1383_v27 }
 0xc0c   :  { %5044 = vmatpush3.msra.mxu1 %v5591_v35  ;;  %5045 = vmatprep.mubr.msk.f32.mxu1 %vm5443_vm1, %v5442_v6  ;;  %v1609_v35 = vpop.permute.xlu0 %1608 }
 0xc0d   :  { %5053 = vmatprep.subr.mxu1 %v5442_v6 }
 0xcc7   :  { %v1289_v28 = vpop.f32.mrf.mxu1 }
 0xcc8   :  { %5046 = vmatmul.mubr.msk.f32.vlgmr.msra.gmra.mxu1 %vm151_vm2, %v1289_v28 }
 0xcc9   :  { %v5027_v30 = vpop.f32.mrf.mxu1  ;;  %5055 = vmatprep.mubr.msk.f32.mxu1 %vm5443_vm1, %v5442_v6 }
 0xccb   :  { %v1458_v31 = vpop.f32.mrf.mxu1 }
 0xccc   :  { %5041 = vmatmul.mubr.msk.f32.vlgmr.msra.gmra.mxu0 %vm151_vm2, %v1458_v31 }
 0xccd   :  { %5049 = vmatpush3.xpose.msk.msra.mxu0 %vm151_vm2, %v1611_v29  ;;  %v5037_v32 = vpop.f32.mrf.mxu1  ;;  %5050 = vmatprep.mubr.msk.f32.mxu0 %vm5443_vm1, %v5442_v6 }
 0xcce   :  { %5058 = vmatprep.subr.mxu0 %v5442_v6 }
 0xcd0   :  { %5051 = vmatmul.mubr.msk.f32.vlgmr.msra.gmra.mxu0 %vm151_vm2, %v1609_v35 }
 0xcd1   :  { %5059 = vmatpush3.msra.mxu0 %v5646_v16  ;;  %5060 = vmatprep.mubr.msk.f32.mxu0 %vm5443_vm1, %v5442_v6 }
 0xcd2   :  { %5068 = vmatprep.subr.mxu0 %v5442_v6 }
 0xd88   :  { %v1604_v33 = vpop.f32.mrf.mxu1 }
 0xd8a   :  { %v5047_v34 = vpop.f32.mrf.mxu1 }
 0xd8c   :  { %v1531_v36 = vpop.f32.mrf.mxu0 }
 0xd8d   :  { %v1605_v37 = vadd.f32 %v1604_v33, %v1531_v36 }
 0xd8e   :  { %v5042_v38 = vpop.f32.mrf.mxu0 }
 0xd90   :  { %v1682_v39 = vpop.f32.mrf.mxu0 }
 0xd91   :  { %v1686_v40 = vmul.f32 0.35355338, %v1682_v39 }
 0xd92   :  { %v5052_v41 = vpop.f32.mrf.mxu0 }
 0xd93   :  { %v1687_v42 = vadd.f32 %v1686_v40, %v5706_v51 }
 0xd95   :  { %v1688_v43 = vsel %vm151_vm2, %v1687_v42, -inf }
 0xd96   :  { %1689 = vmax.xlane.f32.xlu1 %v1688_v43 }
 0xda7   :  { %1853 = vrot.lane.b32.xlu1 %v5548_v13, %s5452_s9 }
 0xdab   :  { %1851 = vrot.lane.b32.xlu1 %v5548_v13, %s5453_s10 }
 0xe1f   :  { %v1690_v16 = vpop.xlane.xlu1 %1689 }
 0xe20   :  { %v1691_v44 = vsub.f32 %v1687_v42, %v1690_v16  ;;  %v2137_v16 = vsub.s32 4, %v5532_v8 }
 0xe22   :  { %v1692_v45 = vmul.f32 1.442695, %v1691_v44 }
 0xe23   :  { %v1854_v54 = vpop.permute.xlu1 %1853 }
 0xe24   :  { %5342 = vpow2.f32 %v1692_v45 }
 0xe27   :  { %v1852_v56 = vpop.permute.xlu1 %1851 }
 0xe31   :  { %v5343_v46 = vpop.eup %5342 }
 0xe32   :  { %v1694_v49 = vsel %vm151_vm2, %v5343_v46, 0.0 }
 0xe33   :  { %1695 = vadd.xlane.f32.xlu0 %v1694_v49  ;;  %v2138_v49 = vrot.slane %v5544_v10, %v2137_v16 }
 0xe49   :  { %1701 = vrot.lane.b32.xlu0 %v5548_v13, %s5451_s30 }
 0xebc   :  { %v1696_v50 = vpop.xlane.xlu0 %1695 }
 0xebd   :  { %5344 = vrcp.f32 %v1696_v50 }
 0xec0   :  { %v1702_v52 = vpop.permute.xlu0 %1701 }
 0xec1   :  { %5054 = vmatpush3.msra.mxu1 %v1702_v52 }
 0xec2   :  { %5063 = vmatprep.subr.mxu1 %v5442_v6 }
 0xeca   :  { %v5345_v53 = vpop.eup %5344 }
 0xecb   :  { %v1698_v55 = vmul.f32 %v5345_v53, %v5343_v46  ;;  %v44_v53 = vld [vmem:[%s6257_s4 + $0x18] sm:$0xff] }
 0xecd   :  { %1700 = vst.msk [vmem:[#allocation4 + $0x30] sm:$0xff] %vm151_vm2, %v1698_v55  ;;  %5056 = vmatmul.mubr.msk.f32.vlgmr.msra.gmra.mxu1 %vm151_vm2, %v1698_v55  ;;  %v42_v55 = vld [vmem:[%s6257_s4 + $0x8] sm:$0xff] }
 0xece   :  { %5064 = vmatpush3.xpose.msk.msra.mxu1 %vm151_vm2, %v1854_v54  ;;  %5065 = vmatprep.mubr.msk.f32.mxu1 %vm5443_vm1, %v5442_v6  ;;  %v43_v54 = vld [vmem:[%s6257_s4 + $0x10] sm:$0xff] }
 0xecf   :  { %5073 = vmatprep.subr.mxu1 %v5442_v6 }
 0xed1   :  { %5066 = vmatmul.mubr.msk.f32.vlgmr.msra.gmra.mxu1 %vm151_vm2, %v1852_v56  ;;  %v41_v56 = vld [vmem:[%s6257_s4] sm:$0xff] }
 0xed2   :  { %5074 = vmatpush3.msra.mxu1 %v5694_v47  ;;  %5075 = vmatprep.mubr.msk.f32.mxu1 %vm5443_vm1, %v5442_v6 }
 0xf8d   :  { %v1773_v57 = vpop.f32.mrf.mxu1 }
 0xf8e   :  { %5061 = vmatmul.mubr.msk.f32.vlgmr.msra.gmra.mxu0 %vm151_vm2, %v1773_v57  ;;  %v60_v57 = vld [vmem:[%s6258_s5 + $0x78] sm:$0xff] }
 0xf8f   :  { %v5057_v58 = vpop.f32.mrf.mxu1  ;;  %5070 = vmatprep.mubr.msk.f32.mxu0 %vm5443_vm1, %v5442_v6  ;;  %5089 = vmatprep.subr.mxu1 %v60_v57 }
 0xf90   :  { %v59_v58 = vld [vmem:[%s6258_s5 + $0x70] sm:$0xff] }
 0xf91   :  { %v1925_v59 = vpop.f32.mrf.mxu1 }
 0xf92   :  { %v1929_v60 = vmul.f32 0.35355338, %v1925_v59  ;;  %v58_v59 = vld [vmem:[%s6258_s5 + $0x68] sm:$0xff] }
 0xf93   :  { %v5067_v61 = vpop.f32.mrf.mxu1 }
 0xf94   :  { %v1930_v18 = vadd.f32 %v1929_v60, %v5706_v51  ;;  %v57_v60 = vld [vmem:[%s6258_s5 + $0x60] sm:$0xff]  ;;  %v56_v61 = vld [vmem:[%s6258_s5 + $0x58] sm:$0xff] }
 0xf96   :  { %v1931_v62 = vsel %vm151_vm2, %v1930_v18, -inf }
 0xf97   :  { %1932 = vmax.xlane.f32.xlu0 %v1931_v62  ;;  %v54_v62 = vld [vmem:[%s6258_s5 + $0x48] sm:$0xff] }
 0xfad   :  { %1944 = vrot.lane.b32.xlu0 %v5548_v13, %s5454_s11  ;;  %v2102_v13 = vsel %vm66_vm0, %v2100_v14, 0.0 }
0x1020   :  { %v1933_v47 = vpop.xlane.xlu0 %1932 }
0x1021   :  { %v1934_v63 = vsub.f32 %v1930_v18, %v1933_v47  ;;  %v55_v18 = vld [vmem:[%s6258_s5 + $0x50] sm:$0xff]  ;;  %v53_v47 = vld [vmem:[%s6258_s5 + $0x40] sm:$0xff] }
0x1023   :  { %v1935_v0 = vmul.f32 1.442695, %v1934_v63  ;;  %v52_v63 = vld [vmem:[%s6258_s5 + $0x38] sm:$0xff] }
0x1024   :  { %v1945_v1 = vpop.permute.xlu0 %1944 }
0x1025   :  { %5346 = vpow2.f32 %v1935_v0  ;;  %5069 = vmatpush3.msra.mxu0 %v1945_v1  ;;  %v51_v0 = vld [vmem:[%s6258_s5 + $0x30] sm:$0xff]  ;;  %v50_v1 = vld [vmem:[%s6258_s5 + $0x28] sm:$0xff] }
0x1026   :  { %5078 = vmatprep.subr.mxu0 %v44_v53 }
0x1032   :  { %v5347_v11 = vpop.eup %5346 }
0x1033   :  { %v1937_v12 = vsel %vm151_vm2, %v5347_v11, 0.0 }
0x1034   :  { %1938 = vadd.xlane.f32.xlu1 %v1937_v12 }
0x1038   :  { %2103 = vadd.xlane.f32.xlu1 %v2102_v13 }
0x104e   :  { %v1846_v20 = vpop.f32.mrf.mxu0 }
0x104f   :  { %v1850_v21 = vadd.f32 %v1846_v20, %v1605_v37 }
0x1050   :  { %v5062_v22 = vpop.f32.mrf.mxu0 }
0x1051   :  { %v48_v22 = vld [vmem:[%s6258_s5 + $0x18] sm:$0xff] }
0x10bd   :  { %v1939_v15 = vpop.xlane.xlu1 %1938 }
0x10be   :  { %5348 = vrcp.f32 %v1939_v15  ;;  %v47_v15 = vld [vmem:[%s6258_s5 + $0x10] sm:$0xff] }
0x10c1   :  { %v2104_v2 = vpop.xlane.xlu1 %2103 }
0x10c2   :  { %v2109_v26 = vmul.f32 0.03125, %v2104_v2 }
0x10c4   :  { %v2111_v30 = vsub.f32 %v2100_v14, %v2109_v26 }
0x10c6   :  { %v2113_v33 = vmul.f32 %v2111_v30, %v2111_v30 }
0x10c8   :  { %v2115_v34 = vsel %vm66_vm0, %v2113_v33, 0.0 }
0x10cb   :  { %v5349_v23 = vpop.eup %5348 }
0x10cc   :  { %v1941_v24 = vmul.f32 %v5349_v23, %v5347_v11  ;;  %v46_v23 = vld [vmem:[%s6258_s5 + $0x8] sm:$0xff] }
0x10ce   :  { %1943 = vst.msk [vmem:[#allocation4 + $0x38] sm:$0xff] %vm151_vm2, %v1941_v24  ;;  %5071 = vmatmul.mubr.msk.f32.vlgmr.msra.gmra.mxu0 %vm151_vm2, %v1941_v24  ;;  %v45_v24 = vld [vmem:[%s6258_s5] sm:$0xff] }
0x10cf   :  { %5079 = vmatpush3.msra.mxu0 %v44_v53 }
0x10d0   :  { %5080 = vmatprep.subr.mxu0 %v43_v54 }
0x10d1   :  { %5081 = vmatpush3.msra.mxu0 %v43_v54  ;;  %v4728_v54 = vld [vmem:[%s6255_s2 + $0x30] sm:$0xff] }
0x10d2   :  { %5082 = vmatprep.subr.mxu0 %v42_v55 }
0x10d3   :  { %5083 = vmatpush3.msra.mxu0 %v42_v55  ;;  %v4727_v55 = vld [vmem:[%s6255_s2 + $0x28] sm:$0xff] }
0x10d4   :  { %5084 = vmatprep.subr.mxu0 %v41_v56 }
0x10d5   :  { %5085 = vmatpush3.msra.mxu0 %v41_v56  ;;  %v4726_v56 = vld [vmem:[%s6255_s2 + $0x20] sm:$0xff] }
0x118e   :  { %v2016_v17 = vpop.f32.mrf.mxu0 }
0x118f   :  { %5076 = vmatmul.mubr.msk.f32.vlgmr.msra.gmra.mxu1 %vm151_vm2, %v2016_v17  ;;  %v2144_v17 = vrot.slane %v5544_v10, %v5699_v48 }
0x1190   :  { %v5072_v25 = vpop.f32.mrf.mxu0  ;;  %5090 = vmatpush3.msra.mxu1 %v60_v57 }
0x1191   :  { %5091 = vmatprep.subr.mxu1 %v59_v58 }
0x1192   :  { %5092 = vmatpush3.msra.mxu1 %v59_v58 }
0x1193   :  { %5093 = vmatprep.subr.mxu1 %v58_v59 }
0x1194   :  { %5094 = vmatpush3.msra.mxu1 %v58_v59 }
0x1195   :  { %5095 = vmatprep.subr.mxu1 %v57_v60 }
0x1196   :  { %5096 = vmatpush3.msra.mxu1 %v57_v60 }
0x1197   :  { %5097 = vmatprep.subr.mxu1 %v56_v61 }
0x1198   :  { %5098 = vmatpush3.msra.mxu1 %v56_v61 }
0x1199   :  { %5099 = vmatprep.subr.mxu1 %v55_v18 }
0x119a   :  { %5100 = vmatpush3.msra.mxu1 %v55_v18 }
0x119b   :  { %5101 = vmatprep.subr.mxu1 %v54_v62 }
0x119c   :  { %5102 = vmatpush3.msra.mxu1 %v54_v62  ;;  %v2337_v62 = vsub.s32 6, %v5532_v8 }
0x119d   :  { %5103 = vmatprep.subr.mxu1 %v53_v47 }
0x119e   :  { %5104 = vmatpush3.msra.mxu1 %v53_v47  ;;  %v2343_v47 = vsub.s32 7, %v5532_v8 }
0x119f   :  { %5105 = vmatprep.subr.mxu1 %v52_v63 }
0x11a0   :  { %5106 = vmatpush3.msra.mxu1 %v52_v63  ;;  %v2338_v63 = vrot.slane %v5544_v10, %v2337_v62 }
0x11a1   :  { %5107 = vmatprep.subr.mxu1 %v51_v0 }
0x11a2   :  { %5108 = vmatpush3.msra.mxu1 %v51_v0 }
0x11a3   :  { %5109 = vmatprep.subr.mxu1 %v50_v1 }
0x11a4   :  { %5110 = vmatpush3.msra.mxu1 %v50_v1 }
0x124f   :  { %v2089_v27 = vpop.f32.mrf.mxu1 }
0x1250   :  { %v2093_v28 = vadd.f32 %v2089_v27, %v1850_v21 }
0x1251   :  { %v5077_v29 = vpop.f32.mrf.mxu1 }
0x1252   :  { %v2099_v31 = vadd.f32 %v2097_v4, %v2093_v28  ;;  %v49_v4 = vld [vmem:[%s6258_s5 + $0x20] sm:$0xff] }
0x1253   :  { %5111 = vmatprep.subr.mxu1 %v49_v4 }
0x1254   :  { %v2101_v32 = vadd.f32 %v2099_v31, %v5526_v5  ;;  %v2131_v5 = vsub.s32 3, %v5532_v8  ;;  %5112 = vmatpush3.msra.mxu1 %v49_v4  ;;  %v2344_v4 = vrot.slane %v5544_v10, %v2343_v47 }
0x1255   :  { %5113 = vmatprep.subr.mxu1 %v48_v22 }
0x1256   :  { %v2105_v35 = vsel %vm66_vm0, %v2101_v32, 0.0  ;;  %v2132_v44 = vrot.slane %v5544_v10, %v2131_v5  ;;  %5114 = vmatpush3.msra.mxu1 %v48_v22 }
0x1257   :  { %2106 = vadd.xlane.f32.xlu1 %v2105_v35  ;;  %5115 = vmatprep.subr.mxu1 %v47_v15 }
0x1258   :  { %5116 = vmatpush3.msra.mxu1 %v47_v15 }
0x1259   :  { %5117 = vmatprep.subr.mxu1 %v46_v23 }
0x125a   :  { %5118 = vmatpush3.msra.mxu1 %v46_v23 }
0x125b   :  { %2116 = vadd.xlane.f32.xlu1 %v2115_v34  ;;  %5119 = vmatprep.subr.mxu1 %v45_v24 }
0x125c   :  { %5120 = vmatpush3.msra.mxu1 %v45_v24 }
0x125d   :  { %5160 = vmatprep.subr.mxu1 %v5442_v6 }
0x12e0   :  { %v2107_v36 = vpop.xlane.xlu1 %2106 }
0x12e1   :  { %v2110_v37 = vmul.f32 0.03125, %v2107_v36 }
0x12e3   :  { %v5790_v38 = vsub.f32 %v2101_v32, %v2110_v37 }
0x12e4   :  { %v2117_v39 = vpop.xlane.xlu1 %2116 }
0x12e5   :  { %v2121_v40 = vmul.f32 0.03125, %v2117_v39  ;;  %v2114_v41 = vmul.f32 %v5790_v38, %v5790_v38 }
0x12e7   :  { %v2123_v42 = vadd.f32 1e-05, %v2121_v40  ;;  %v2118_v43 = vsel %vm66_vm0, %v2114_v41, 0.0 }
0x12e8   :  { %2119 = vadd.xlane.f32.xlu1 %v2118_v43 }
0x12e9   :  { %5350 = vrsqrt.f32 %v2123_v42 }
0x12f6   :  { %v5351_v45 = vpop.eup %5350 }
0x12f7   :  { %v2127_v46 = vmul.f32 %v5351_v45, %v2111_v30  ;;  %v2230_v30 = vsub.s32 5, %v5532_v8 }
0x12f9   :  { %v2133_v50 = vmul.f32 %v2132_v44, %v2127_v46  ;;  %v2231_v31 = vrot.slane %v5544_v10, %v2230_v30  ;;  %v5917_v10 = vld [vmem:[%s6259_s6 + $0x8] sm:$0xff] }
0x12fb   :  { %v5803_v52 = vadd.f32 %v2138_v49, %v2133_v50 }
0x12fd   :  { %5086 = vmatprep.mubr.msk.f32.mxu0 %vm66_vm0, %v5803_v52 }
0x1371   :  { %v2120_v7 = vpop.xlane.xlu1 %2119 }
0x1372   :  { %v2122_v11 = vmul.f32 0.03125, %v2120_v7 }
0x1374   :  { %v2124_v12 = vadd.f32 1e-05, %v2122_v11 }
0x1376   :  { %5352 = vrsqrt.f32 %v2124_v12 }
0x1383   :  { %v5353_v14 = vpop.eup %5352 }
0x1384   :  { %v2128_v13 = vmul.f32 %v5353_v14, %v5790_v38 }
0x1386   :  { %v2134_v20 = vmul.f32 %v2132_v44, %v2128_v13 }
0x1388   :  { %v2140_v21 = vadd.f32 %v2138_v49, %v2134_v20 }
0x138a   :  { %5087 = vmatmul.mubr.msk.f32.vlgmr.msra.gmra.mxu0 %vm66_vm0, %v2140_v21 }
0x144a   :  { %v5088_v25 = vpop.f32.mrf.mxu0 }
0x144b   :  { %v2223_v2 = vadd.f32 %v5088_v25, %v2144_v17 }
0x144c   :  { %v2217_v26 = vpop.f32.mrf.mxu0 }
0x144d   :  { %v2218_v27 = vadd.f32 %v2217_v26, %v2144_v17  ;;  %v2227_v29 = vmax.f32 %v2223_v2, 0.0 }
0x144f   :  { %v2226_v28 = vmax.f32 %v2218_v27, 0.0 }
0x1451   :  { %5121 = vmatprep.mubr.f32.mxu1 %v2226_v28 }
0x1452   :  { %5122 = vmatmul.mubr.f32.vlgmr.msra.gmra.mxu1 %v2227_v29 }
0x1453   :  { %5162 = vmatprep.mubr.msk.f32.mxu1 %vm5443_vm1, %v5442_v6 }
0x1512   :  { %v5123_v32 = vpop.f32.mrf.mxu1 }
0x1513   :  { %v2304_v35 = vadd.f32 %v5123_v32, %v2231_v31 }
0x1514   :  { %v2298_v33 = vpop.f32.mrf.mxu1 }
0x1515   :  { %v2299_v34 = vadd.f32 %v2298_v33, %v2231_v31  ;;  %v2308_v36 = vadd.f32 %v2304_v35, %v2140_v21  ;;  %v2384_v21 = vrot.slane %v5917_v10, %v5535_v9 }
0x1517   :  { %v2312_v37 = vsel %vm66_vm0, %v2308_v36, 0.0  ;;  %v2307_v38 = vadd.f32 %v2299_v34, %v5803_v52  ;;  %v4729_v52 = vld [vmem:[%s6255_s2 + $0x38] sm:$0xff] }
0x1518   :  { %2313 = vadd.xlane.f32.xlu1 %v2312_v37  ;;  %5124 = vmatprep.subr.mxu0 %v4729_v52 }
0x1519   :  { %v2309_v39 = vsel %vm66_vm0, %v2307_v38, 0.0  ;;  %5125 = vmatpush3.msra.mxu0 %v4729_v52 }
0x151a   :  { %2310 = vadd.xlane.f32.xlu0 %v2309_v39  ;;  %5126 = vmatprep.subr.mxu0 %v4728_v54 }
0x151b   :  { %5127 = vmatpush3.msra.mxu0 %v4728_v54 }
0x151c   :  { %5128 = vmatprep.subr.mxu0 %v4727_v55 }
0x151d   :  { %5129 = vmatpush3.msra.mxu0 %v4727_v55 }
0x151e   :  { %5130 = vmatprep.subr.mxu0 %v4726_v56 }
0x151f   :  { %5131 = vmatpush3.msra.mxu0 %v4726_v56 }
0x1520   :  { %5135 = vmatprep.subr.mxu0 %v5442_v6 }
0x15a1   :  { %v2314_v40 = vpop.xlane.xlu1 %2313 }
0x15a2   :  { %v2316_v41 = vmul.f32 0.03125, %v2314_v40  ;;  %v5955_v40 = vld [vmem:[%s6256_s3 + $0x20] sm:$0xff] }
0x15a3   :  { %v2311_v42 = vpop.xlane.xlu0 %2310  ;;  %5161 = vmatpush3.msra.mxu1 %v5955_v40 }
0x15a4   :  { %v2315_v43 = vmul.f32 0.03125, %v2311_v42  ;;  %v2318_v44 = vsub.f32 %v2308_v36, %v2316_v41  ;;  %5170 = vmatprep.subr.mxu1 %v5442_v6 }
0x15a6   :  { %v2317_v45 = vsub.f32 %v2307_v38, %v2315_v43  ;;  %v2320_v50 = vmul.f32 %v2318_v44, %v2318_v44 }
0x15a8   :  { %v2319_v46 = vmul.f32 %v2317_v45, %v2317_v45  ;;  %v2324_v53 = vsel %vm66_vm0, %v2320_v50, 0.0 }
0x15aa   :  { %v2321_v49 = vsel %vm66_vm0, %v2319_v46, 0.0 }
0x15ab   :  { %2322 = vadd.xlane.f32.xlu1 %v2321_v49 }
0x15af   :  { %2325 = vadd.xlane.f32.xlu1 %v2324_v53 }
0x1634   :  { %v2323_v57 = vpop.xlane.xlu1 %2322 }
0x1635   :  { %v2327_v58 = vmul.f32 0.03125, %v2323_v57 }
0x1637   :  { %v2329_v59 = vadd.f32 1e-05, %v2327_v58 }
0x1638   :  { %v2326_v60 = vpop.xlane.xlu1 %2325 }
0x1639   :  { %5354 = vrsqrt.f32 %v2329_v59  ;;  %v2328_v61 = vmul.f32 0.03125, %v2326_v60 }
0x163b   :  { %v2330_v18 = vadd.f32 1e-05, %v2328_v61 }
0x163d   :  { %5356 = vrsqrt.f32 %v2330_v18 }
0x1646   :  { %v5355_v0 = vpop.eup %5354 }
0x1647   :  { %v2333_v1 = vmul.f32 %v5355_v0, %v2317_v45 }
0x1649   :  { %v2339_v7 = vmul.f32 %v2338_v63, %v2333_v1 }
0x164a   :  { %v5357_v11 = vpop.eup %5356 }
0x164b   :  { %v2334_v12 = vmul.f32 %v5357_v11, %v2318_v44  ;;  %v5904_v14 = vadd.f32 %v2344_v4, %v2339_v7 }
0x164d   :  { %v2340_v13 = vmul.f32 %v2338_v63, %v2334_v12  ;;  %5132 = vmatprep.mubr.msk.f32.mxu0 %vm66_vm0, %v5904_v14  ;;  %v5980_v63 = vld [vmem:[%s6256_s3 + $0x28] sm:$0xff] }
0x164f   :  { %v5908_v20 = vadd.f32 %v2344_v4, %v2340_v13 }
0x1651   :  { %5133 = vmatmul.mubr.msk.f32.vlgmr.msra.gmra.mxu0 %vm66_vm0, %v5908_v20 }
0x1652   :  { %5137 = vmatprep.mubr.msk.f32.mxu0 %vm5443_vm1, %v5442_v6 }
0x1711   :  { %v5134_v22 = vpop.f32.mrf.mxu0 }
0x1712   :  { %v5921_v15 = vadd.f32 %v5134_v22, %v2384_v21 }
0x1713   :  { %v2457_v23 = vpop.f32.mrf.mxu0 }
0x1714   :  { %v5923_v24 = vadd.f32 %v2457_v23, %v2384_v21 }
0x1716   :  { %2558 = vrot.lane.b32.xlu0 %v5923_v24, %s5444_s18  ;;  %2467 = vrot.lane.b32.xlu1 %v5923_v24, %s5445_s19 }
0x1788   :  { %v2468_v17 = vpop.permute.xlu1 %2467  ;;  %v2559_v25 = vpop.permute.xlu0 %2558 }
0x1789   :  { %5136 = vmatpush3.xpose.msk.msra.mxu0 %vm151_vm2, %v2468_v17 }
0x178a   :  { %5140 = vmatprep.subr.mxu0 %v5442_v6 }
0x178c   :  { %5138 = vmatmul.mubr.msk.f32.vlgmr.msra.gmra.mxu0 %vm151_vm2, %v5923_v24 }
0x178d   :  { %5141 = vmatpush3.msra.mxu0 %v2559_v25  ;;  %5142 = vmatprep.mubr.msk.f32.mxu0 %vm5443_vm1, %v5442_v6 }
0x178e   :  { %5145 = vmatprep.subr.mxu0 %v5442_v6 }
0x184c   :  { %v2539_v9 = vpop.f32.mrf.mxu0 }
0x184d   :  { %v2543_v2 = vmul.f32 0.35355338, %v2539_v9 }
0x184e   :  { %v5139_v26 = vpop.f32.mrf.mxu0 }
0x184f   :  { %v2544_v27 = vadd.f32 %v2543_v2, %v5572_v19 }
0x1851   :  { %v2545_v28 = vsel %vm151_vm2, %v2544_v27, -inf }
0x1852   :  { %2546 = vmax.xlane.f32.xlu1 %v2545_v28  ;;  %v6012_v28 = vld [vmem:[%s6256_s3 + $0x30] sm:$0xff] }
0x18db   :  { %v2547_v29 = vpop.xlane.xlu1 %2546 }
0x18dc   :  { %v2548_v31 = vsub.f32 %v2544_v27, %v2547_v29 }
0x18de   :  { %v2549_v32 = vmul.f32 1.442695, %v2548_v31 }
0x18e0   :  { %5358 = vpow2.f32 %v2549_v32 }
0x18ed   :  { %v5359_v35 = vpop.eup %5358 }
0x18ee   :  { %v2551_v33 = vsel %vm151_vm2, %v5359_v35, 0.0 }
0x18ef   :  { %2552 = vadd.xlane.f32.xlu0 %v2551_v33 }
0x1905   :  { %2636 = vrot.lane.b32.xlu0 %v5923_v24, %s5446_s20 }
0x1909   :  { %2634 = vrot.lane.b32.xlu0 %v5923_v24, %s5447_s1 }
0x1978   :  { %v2553_v34 = vpop.xlane.xlu0 %2552 }
0x1979   :  { %5360 = vrcp.f32 %v2553_v34 }
0x197c   :  { %v2637_v37 = vpop.permute.xlu0 %2636 }
0x1980   :  { %v2635_v39 = vpop.permute.xlu0 %2634 }
0x1986   :  { %v5361_v36 = vpop.eup %5360 }
0x1987   :  { %v2555_v38 = vmul.f32 %v5361_v36, %v5359_v35 }
0x1989   :  { %2557 = vst.msk [vmem:[#allocation4 + $0x40] sm:$0xff] %vm151_vm2, %v2555_v38  ;;  %5143 = vmatmul.mubr.msk.f32.vlgmr.msra.gmra.mxu0 %vm151_vm2, %v2555_v38 }
0x198a   :  { %5146 = vmatpush3.xpose.msk.msra.mxu0 %vm151_vm2, %v2637_v37  ;;  %5147 = vmatprep.mubr.msk.f32.mxu0 %vm5443_vm1, %v5442_v6 }
0x198b   :  { %5150 = vmatprep.subr.mxu0 %v5442_v6 }
0x198d   :  { %5148 = vmatmul.mubr.msk.f32.vlgmr.msra.gmra.mxu0 %vm151_vm2, %v2635_v39 }
0x198e   :  { %5152 = vmatprep.mubr.msk.f32.mxu0 %vm5443_vm1, %v5442_v6 }
0x1a49   :  { %v2630_v41 = vpop.f32.mrf.mxu0 }
0x1a4a   :  { %5163 = vmatmul.mubr.msk.f32.vlgmr.msra.gmra.mxu1 %vm151_vm2, %v2630_v41 }
0x1a4b   :  { %v5144_v42 = vpop.f32.mrf.mxu0  ;;  %5172 = vmatprep.mubr.msk.f32.mxu1 %vm5443_vm1, %v5442_v6 }
0x1a4d   :  { %v2708_v43 = vpop.f32.mrf.mxu0 }
0x1a4e   :  { %v2712_v44 = vmul.f32 0.35355338, %v2708_v43 }
0x1a4f   :  { %v5149_v45 = vpop.f32.mrf.mxu0 }
0x1a50   :  { %v2713_v46 = vadd.f32 %v2712_v44, %v5572_v19 }
0x1a52   :  { %v2714_v49 = vsel %vm151_vm2, %v2713_v46, -inf }
0x1a53   :  { %2715 = vmax.xlane.f32.xlu0 %v2714_v49 }
0x1a69   :  { %3042 = vrot.lane.b32.xlu0 %v5923_v24, %s5451_s30 }
0x1adc   :  { %v2716_v50 = vpop.xlane.xlu0 %2715 }
0x1add   :  { %v2717_v53 = vsub.f32 %v2713_v46, %v2716_v50 }
0x1adf   :  { %v2718_v52 = vmul.f32 1.442695, %v2717_v53 }
0x1ae0   :  { %v3043_v54 = vpop.permute.xlu0 %3042 }
0x1ae1   :  { %5362 = vpow2.f32 %v2718_v52  ;;  %5171 = vmatpush3.msra.mxu1 %v3043_v54 }
0x1ae2   :  { %5180 = vmatprep.subr.mxu1 %v5442_v6 }
0x1aee   :  { %v5363_v55 = vpop.eup %5362 }
0x1aef   :  { %v2720_v56 = vsel %vm151_vm2, %v5363_v55, 0.0 }
0x1af0   :  { %2721 = vadd.xlane.f32.xlu1 %v2720_v56 }
0x1b01   :  { %2727 = vrot.lane.b32.xlu1 %v5923_v24, %s5448_s25 }
0x1b05   :  { %2951 = vrot.lane.b32.xlu1 %v5923_v24, %s5449_s26 }
0x1b09   :  { %2949 = vrot.lane.b32.xlu1 %v5923_v24, %s5450_s27 }
0x1b0a   :  { %v5974_v57 = vpop.f32.mrf.mxu1 }
0x1b0c   :  { %v5164_v58 = vpop.f32.mrf.mxu1 }
0x1b79   :  { %v2722_v59 = vpop.xlane.xlu1 %2721 }
0x1b7a   :  { %5364 = vrcp.f32 %v2722_v59 }
0x1b7d   :  { %v2728_v60 = vpop.permute.xlu1 %2727 }
0x1b7e   :  { %5151 = vmatpush3.msra.mxu0 %v2728_v60  ;;  %v6055_v60 = vld [vmem:[%s6256_s3 + $0x38] sm:$0xff] }
0x1b7f   :  { %5155 = vmatprep.subr.mxu0 %v5442_v6 }
0x1b81   :  { %v2952_v0 = vpop.permute.xlu1 %2951 }
0x1b85   :  { %v2950_v7 = vpop.permute.xlu1 %2949 }
0x1b87   :  { %v5365_v61 = vpop.eup %5364 }
0x1b88   :  { %v2724_v18 = vmul.f32 %v5365_v61, %v5363_v55 }
0x1b8a   :  { %2726 = vst.msk [vmem:[#allocation4 + $0x48] sm:$0xff] %vm151_vm2, %v2724_v18  ;;  %5153 = vmatmul.mubr.msk.f32.vlgmr.msra.gmra.mxu0 %vm151_vm2, %v2724_v18 }
0x1b8b   :  { %5156 = vmatpush3.msra.mxu0 %v5980_v63  ;;  %5157 = vmatprep.mubr.msk.f32.mxu0 %vm5443_vm1, %v5442_v6 }
0x1b8c   :  { %5165 = vmatprep.subr.mxu0 %v5442_v6 }
0x1c4a   :  { %v2799_v1 = vpop.f32.mrf.mxu0 }
0x1c4b   :  { %5158 = vmatmul.mubr.msk.f32.vlgmr.msra.gmra.mxu0 %vm151_vm2, %v2799_v1 }
0x1c4c   :  { %5166 = vmatpush3.xpose.msk.msra.mxu0 %vm151_vm2, %v2952_v0  ;;  %v5154_v4 = vpop.f32.mrf.mxu0  ;;  %5167 = vmatprep.mubr.msk.f32.mxu0 %vm5443_vm1, %v5442_v6 }
0x1c4d   :  { %5175 = vmatprep.subr.mxu0 %v5442_v6 }
0x1c4f   :  { %5168 = vmatmul.mubr.msk.f32.vlgmr.msra.gmra.mxu0 %vm151_vm2, %v2950_v7 }
0x1c50   :  { %5177 = vmatprep.mubr.msk.f32.mxu0 %vm5443_vm1, %v5442_v6  ;;  %5176 = vmatpush3.msra.mxu0 %v6012_v28 }
0x1c51   :  { %5185 = vmatprep.subr.mxu0 %v5442_v6 }
0x1d0b   :  { %v2872_v11 = vpop.f32.mrf.mxu0 }
0x1d0c   :  { %v2946_v50 = vadd.f32 %v5974_v57, %v2872_v11 }
0x1d0d   :  { %v5159_v12 = vpop.f32.mrf.mxu0 }
0x1d0f   :  { %v3023_v13 = vpop.f32.mrf.mxu0 }
0x1d10   :  { %v3027_v21 = vmul.f32 0.35355338, %v3023_v13 }
0x1d11   :  { %v5169_v22 = vpop.f32.mrf.mxu0 }
0x1d12   :  { %v3028_v23 = vadd.f32 %v3027_v21, %v5572_v19 }
0x1d14   :  { %v3029_v17 = vsel %vm151_vm2, %v3028_v23, -inf }
0x1d15   :  { %3030 = vmax.xlane.f32.xlu1 %v3029_v17 }
0x1d26   :  { %3285 = vrot.lane.b32.xlu1 %v5923_v24, %s5454_s11 }
0x1d2a   :  { %3436 = vrot.lane.b32.xlu1 %v5921_v15, %s5445_s19 }
0x1d2e   :  { %3605 = vrot.lane.b32.xlu1 %v5921_v15, %s5446_s20 }
0x1d9e   :  { %v3031_v25 = vpop.xlane.xlu1 %3030 }
0x1d9f   :  { %v3032_v9 = vsub.f32 %v3028_v23, %v3031_v25 }
0x1da1   :  { %v3033_v2 = vmul.f32 1.442695, %v3032_v9 }
0x1da2   :  { %v3286_v34 = vpop.permute.xlu1 %3285 }
0x1da3   :  { %5366 = vpow2.f32 %v3033_v2 }
0x1db0   :  { %v5367_v26 = vpop.eup %5366 }
0x1db1   :  { %v3035_v27 = vsel %vm151_vm2, %v5367_v26, 0.0 }
0x1db2   :  { %3036 = vadd.xlane.f32.xlu0 %v3035_v27 }
0x1dc8   :  { %3194 = vrot.lane.b32.xlu0 %v5923_v24, %s5452_s9 }
0x1dcc   :  { %3192 = vrot.lane.b32.xlu0 %v5923_v24, %s5453_s10 }
0x1e3b   :  { %v3037_v29 = vpop.xlane.xlu0 %3036 }
0x1e3c   :  { %5368 = vrcp.f32 %v3037_v29 }
0x1e3f   :  { %v3195_v32 = vpop.permute.xlu0 %3194 }
0x1e43   :  { %v3193_v24 = vpop.permute.xlu0 %3192 }
0x1e49   :  { %v5369_v31 = vpop.eup %5368 }
0x1e4a   :  { %v3039_v35 = vmul.f32 %v5369_v31, %v5367_v26 }
0x1e4c   :  { %3041 = vst.msk [vmem:[#allocation4 + $0x50] sm:$0xff] %vm151_vm2, %v3039_v35  ;;  %5173 = vmatmul.mubr.msk.f32.vlgmr.msra.gmra.mxu1 %vm151_vm2, %v3039_v35 }
0x1e4d   :  { %5181 = vmatpush3.xpose.msk.msra.mxu1 %vm151_vm2, %v3195_v32  ;;  %5182 = vmatprep.mubr.msk.f32.mxu1 %vm5443_vm1, %v5442_v6 }
0x1e4e   :  { %5190 = vmatprep.subr.mxu1 %v5442_v6 }
0x1e50   :  { %5183 = vmatmul.mubr.msk.f32.vlgmr.msra.gmra.mxu1 %vm151_vm2, %v3193_v24 }
0x1e51   :  { %5192 = vmatprep.mubr.msk.f32.mxu1 %vm5443_vm1, %v5442_v6  ;;  %5191 = vmatpush3.msra.mxu1 %v6055_v60 }
0x1e52   :  { %5200 = vmatprep.subr.mxu1 %v5442_v6 }
0x1f0c   :  { %v3114_v33 = vpop.f32.mrf.mxu1 }
0x1f0d   :  { %5178 = vmatmul.mubr.msk.f32.vlgmr.msra.gmra.mxu0 %vm151_vm2, %v3114_v33 }
0x1f0e   :  { %5186 = vmatpush3.msra.mxu0 %v3286_v34  ;;  %v5174_v36 = vpop.f32.mrf.mxu1  ;;  %5187 = vmatprep.mubr.msk.f32.mxu0 %vm5443_vm1, %v5442_v6 }
0x1f0f   :  { %5195 = vmatprep.subr.mxu0 %v5442_v6 }
0x1f10   :  { %v3266_v37 = vpop.f32.mrf.mxu1 }
0x1f11   :  { %v3270_v38 = vmul.f32 0.35355338, %v3266_v37 }
0x1f12   :  { %v5184_v39 = vpop.f32.mrf.mxu1 }
0x1f13   :  { %v3271_v41 = vadd.f32 %v3270_v38, %v5572_v19  ;;  %v3437_v19 = vpop.permute.xlu1 %3436 }
0x1f15   :  { %v3272_v42 = vsel %vm151_vm2, %v3271_v41, -inf }
0x1f16   :  { %3273 = vmax.xlane.f32.xlu0 %v3272_v42 }
0x1f17   :  { %v3606_v55 = vpop.permute.xlu1 %3605 }
0x1f9f   :  { %v3274_v43 = vpop.xlane.xlu0 %3273 }
0x1fa0   :  { %v3275_v44 = vsub.f32 %v3271_v41, %v3274_v43 }
0x1fa2   :  { %v3276_v45 = vmul.f32 1.442695, %v3275_v44 }
0x1fa4   :  { %5370 = vpow2.f32 %v3276_v45 }
0x1fb1   :  { %v5371_v46 = vpop.eup %5370 }
0x1fb2   :  { %v3278_v49 = vsel %vm151_vm2, %v5371_v46, 0.0 }
0x1fb3   :  { %3279 = vadd.xlane.f32.xlu1 %v3278_v49 }
0x1fc4   :  { %3603 = vrot.lane.b32.xlu1 %v5921_v15, %s5447_s1 }
0x1fcd   :  { %v3187_v53 = vpop.f32.mrf.mxu0 }
0x1fce   :  { %v3191_v52 = vadd.f32 %v3187_v53, %v2946_v50 }
0x1fcf   :  { %v5179_v54 = vpop.f32.mrf.mxu0 }
0x203c   :  { %v3280_v56 = vpop.xlane.xlu1 %3279 }
0x203d   :  { %5372 = vrcp.f32 %v3280_v56 }
0x2040   :  { %v3604_v57 = vpop.permute.xlu1 %3603 }
0x204a   :  { %v5373_v58 = vpop.eup %5372 }
0x204b   :  { %v3282_v59 = vmul.f32 %v5373_v58, %v5371_v46 }
0x204d   :  { %3284 = vst.msk [vmem:[#allocation4 + $0x58] sm:$0xff] %vm151_vm2, %v3282_v59  ;;  %5188 = vmatmul.mubr.msk.f32.vlgmr.msra.gmra.mxu0 %vm151_vm2, %v3282_v59 }
0x204e   :  { %5196 = vmatpush3.xpose.msk.msra.mxu0 %vm151_vm2, %v3437_v19  ;;  %5197 = vmatprep.mubr.msk.f32.mxu0 %vm5443_vm1, %v5442_v6 }
0x204f   :  { %5205 = vmatprep.subr.mxu0 %v5442_v6 }
0x2051   :  { %5198 = vmatmul.mubr.msk.f32.vlgmr.msra.gmra.mxu0 %vm151_vm2, %v5921_v15 }
0x2052   :  { %5206 = vmatpush3.xpose.msk.msra.mxu0 %vm151_vm2, %v3606_v55  ;;  %5207 = vmatprep.mubr.msk.f32.mxu0 %vm5443_vm1, %v5442_v6 }
0x2053   :  { %5215 = vmatprep.subr.mxu0 %v5442_v6 }
0x2055   :  { %5208 = vmatmul.mubr.msk.f32.vlgmr.msra.gmra.mxu0 %vm151_vm2, %v3604_v57 }
0x2056   :  { %5216 = vmatpush3.msra.mxu0 %v5980_v63  ;;  %5217 = vmatprep.mubr.msk.f32.mxu0 %vm5443_vm1, %v5442_v6 }
0x2057   :  { %5225 = vmatprep.subr.mxu0 %v5442_v6 }
0x210d   :  { %v3357_v61 = vpop.f32.mrf.mxu0 }
0x210e   :  { %5193 = vmatmul.mubr.msk.f32.vlgmr.msra.gmra.mxu1 %vm151_vm2, %v3357_v61 }
0x210f   :  { %v5189_v18 = vpop.f32.mrf.mxu0  ;;  %5202 = vmatprep.mubr.msk.f32.mxu1 %vm5443_vm1, %v5442_v6 }
0x2111   :  { %v3508_v63 = vpop.f32.mrf.mxu0 }
0x2112   :  { %v3512_v0 = vmul.f32 0.35355338, %v3508_v63 }
0x2113   :  { %v5199_v1 = vpop.f32.mrf.mxu0 }
0x2114   :  { %v3513_v4 = vadd.f32 %v3512_v0, %v5706_v51 }
0x2115   :  { %v3677_v7 = vpop.f32.mrf.mxu0 }
0x2116   :  { %v3681_v11 = vmul.f32 0.35355338, %v3677_v7  ;;  %v3514_v12 = vsel %vm151_vm2, %v3513_v4, -inf }
0x2117   :  { %3515 = vmax.xlane.f32.xlu0 %v3514_v12  ;;  %v5209_v13 = vpop.f32.mrf.mxu0 }
0x2118   :  { %v3682_v21 = vadd.f32 %v3681_v11, %v5706_v51 }
0x211a   :  { %v3683_v22 = vsel %vm151_vm2, %v3682_v21, -inf }
0x211b   :  { %3684 = vmax.xlane.f32.xlu1 %v3683_v22 }
0x212c   :  { %3918 = vrot.lane.b32.xlu1 %v5921_v15, %s5450_s27 }
0x212d   :  { %3527 = vrot.lane.b32.xlu0 %v5921_v15, %s5444_s18 }
0x21a0   :  { %v3516_v23 = vpop.xlane.xlu0 %3515 }
0x21a1   :  { %v3517_v17 = vsub.f32 %v3513_v4, %v3516_v23 }
0x21a3   :  { %v3518_v25 = vmul.f32 1.442695, %v3517_v17 }
0x21a4   :  { %v3528_v9 = vpop.permute.xlu0 %3527  ;;  %v3685_v2 = vpop.xlane.xlu1 %3684 }
0x21a5   :  { %5374 = vpow2.f32 %v3518_v25  ;;  %v3686_v26 = vsub.f32 %v3682_v21, %v3685_v2  ;;  %5201 = vmatpush3.msra.mxu1 %v3528_v9 }
0x21a6   :  { %5210 = vmatprep.subr.mxu1 %v5442_v6 }
0x21a7   :  { %v3687_v27 = vmul.f32 1.442695, %v3686_v26 }
0x21a9   :  { %5376 = vpow2.f32 %v3687_v27 }
0x21b2   :  { %v5375_v29 = vpop.eup %5374 }
0x21b3   :  { %v3520_v31 = vsel %vm151_vm2, %v5375_v29, 0.0 }
0x21b4   :  { %3521 = vadd.xlane.f32.xlu0 %v3520_v31 }
0x21b6   :  { %v5377_v32 = vpop.eup %5376 }
0x21b7   :  { %v3689_v35 = vsel %vm151_vm2, %v5377_v32, 0.0 }
0x21b8   :  { %3690 = vadd.xlane.f32.xlu0 %v3689_v35 }
0x21ce   :  { %v3430_v24 = vpop.f32.mrf.mxu1  ;;  %3696 = vrot.lane.b32.xlu0 %v5921_v15, %s5448_s25 }
0x21cf   :  { %v6075_v33 = vadd.f32 %v3430_v24, %v3191_v52 }
0x21d0   :  { %v5194_v34 = vpop.f32.mrf.mxu1 }
0x21d2   :  { %3920 = vrot.lane.b32.xlu0 %v5921_v15, %s5449_s26 }
0x223d   :  { %v3522_v36 = vpop.xlane.xlu0 %3521 }
0x223e   :  { %5378 = vrcp.f32 %v3522_v36 }
0x2241   :  { %v3691_v37 = vpop.xlane.xlu0 %3690 }
0x2242   :  { %5380 = vrcp.f32 %v3691_v37 }
0x2245   :  { %v3697_v41 = vpop.permute.xlu0 %3696 }
0x2249   :  { %v3921_v49 = vpop.permute.xlu0 %3920 }
0x224b   :  { %v5379_v38 = vpop.eup %5378 }
0x224c   :  { %v3524_v39 = vmul.f32 %v5379_v38, %v5375_v29 }
0x224e   :  { %3526 = vst.msk [vmem:[#allocation4 + $0x60] sm:$0xff] %vm151_vm2, %v3524_v39  ;;  %5203 = vmatmul.mubr.msk.f32.vlgmr.msra.gmra.mxu1 %vm151_vm2, %v3524_v39 }
0x224f   :  { %v5381_v42 = vpop.eup %5380  ;;  %5211 = vmatpush3.msra.mxu1 %v3697_v41  ;;  %5212 = vmatprep.mubr.msk.f32.mxu1 %vm5443_vm1, %v5442_v6 }
0x2250   :  { %v3693_v43 = vmul.f32 %v5381_v42, %v5377_v32  ;;  %5220 = vmatprep.subr.mxu1 %v5442_v6 }
0x2252   :  { %3695 = vst.msk [vmem:[#allocation4 + $0x68] sm:$0xff] %vm151_vm2, %v3693_v43  ;;  %5213 = vmatmul.mubr.msk.f32.vlgmr.msra.gmra.mxu1 %vm151_vm2, %v3693_v43 }
0x2253   :  { %5221 = vmatpush3.msra.mxu1 %v5955_v40  ;;  %5222 = vmatprep.mubr.msk.f32.mxu1 %vm5443_vm1, %v5442_v6  ;;  %v3919_v40 = vpop.permute.xlu1 %3918 }
0x2254   :  { %5230 = vmatprep.subr.mxu1 %v5442_v6 }
0x230e   :  { %v3599_v44 = vpop.f32.mrf.mxu1 }
0x230f   :  { %5223 = vmatmul.mubr.msk.f32.vlgmr.msra.gmra.mxu1 %vm151_vm2, %v3599_v44 }
0x2310   :  { %v5204_v45 = vpop.f32.mrf.mxu1  ;;  %5232 = vmatprep.mubr.msk.f32.mxu1 %vm5443_vm1, %v5442_v6 }
0x2312   :  { %v3768_v46 = vpop.f32.mrf.mxu1 }
0x2313   :  { %5218 = vmatmul.mubr.msk.f32.vlgmr.msra.gmra.mxu0 %vm151_vm2, %v3768_v46 }
0x2314   :  { %5226 = vmatpush3.xpose.msk.msra.mxu0 %vm151_vm2, %v3921_v49  ;;  %v5214_v50 = vpop.f32.mrf.mxu1  ;;  %5227 = vmatprep.mubr.msk.f32.mxu0 %vm5443_vm1, %v5442_v6  ;;  %v6143_v49 = vrot.slane %v5917_v10, %v2131_v5 }
0x2315   :  { %5235 = vmatprep.subr.mxu0 %v5442_v6 }
0x2317   :  { %5228 = vmatmul.mubr.msk.f32.vlgmr.msra.gmra.mxu0 %vm151_vm2, %v3919_v40 }
0x2318   :  { %5236 = vmatpush3.msra.mxu0 %v6012_v28  ;;  %5237 = vmatprep.mubr.msk.f32.mxu0 %vm5443_vm1, %v5442_v6 }
0x2319   :  { %5245 = vmatprep.subr.mxu0 %v5442_v6 }
0x23cf   :  { %v3914_v53 = vpop.f32.mrf.mxu1 }
0x23d1   :  { %v5224_v52 = vpop.f32.mrf.mxu1 }
0x23d3   :  { %v3841_v54 = vpop.f32.mrf.mxu0 }
0x23d4   :  { %v3915_v19 = vadd.f32 %v3914_v53, %v3841_v54  ;;  %v6148_v53 = vrot.slane %v5917_v10, %v2137_v16 }
0x23d5   :  { %v5219_v55 = vpop.f32.mrf.mxu0 }
0x23d7   :  { %v3992_v56 = vpop.f32.mrf.mxu0 }
0x23d8   :  { %v3996_v58 = vmul.f32 0.35355338, %v3992_v56 }
0x23d9   :  { %v5229_v59 = vpop.f32.mrf.mxu0 }
0x23da   :  { %v3997_v57 = vadd.f32 %v3996_v58, %v5706_v51 }
0x23dc   :  { %v3998_v61 = vsel %vm151_vm2, %v3997_v57, -inf }
0x23dd   :  { %3999 = vmax.xlane.f32.xlu0 %v3998_v61 }
0x23f3   :  { %4011 = vrot.lane.b32.xlu0 %v5921_v15, %s5451_s30 }
0x23f7   :  { %4161 = vrot.lane.b32.xlu0 %v5921_v15, %s5453_s10 }
0x2466   :  { %v4000_v28 = vpop.xlane.xlu0 %3999 }
0x2467   :  { %v4001_v18 = vsub.f32 %v3997_v57, %v4000_v28 }
0x2469   :  { %v4002_v63 = vmul.f32 1.442695, %v4001_v18 }
0x246a   :  { %v4012_v0 = vpop.permute.xlu0 %4011 }
0x246b   :  { %5382 = vpow2.f32 %v4002_v63  ;;  %5231 = vmatpush3.msra.mxu1 %v4012_v0 }
0x246c   :  { %5240 = vmatprep.subr.mxu1 %v5442_v6 }
0x246e   :  { %v4162_v21 = vpop.permute.xlu0 %4161 }
0x2478   :  { %v5383_v1 = vpop.eup %5382 }
0x2479   :  { %v4004_v4 = vsel %vm151_vm2, %v5383_v1, 0.0 }
0x247a   :  { %4005 = vadd.xlane.f32.xlu1 %v4004_v4  ;;  %v4735_v4 = vld [vmem:[%s6257_s4 + $0x28] sm:$0xff] }
0x248b   :  { %4163 = vrot.lane.b32.xlu1 %v5921_v15, %s5452_s9 }
0x2503   :  { %v4006_v7 = vpop.xlane.xlu1 %4005 }
0x2504   :  { %5384 = vrcp.f32 %v4006_v7  ;;  %v4734_v7 = vld [vmem:[%s6257_s4 + $0x20] sm:$0xff] }
0x2507   :  { %v4164_v13 = vpop.permute.xlu1 %4163 }
0x2511   :  { %v5385_v11 = vpop.eup %5384 }
0x2512   :  { %v4008_v12 = vmul.f32 %v5385_v11, %v5383_v1  ;;  %v4737_v1 = vld [vmem:[%s6257_s4 + $0x38] sm:$0xff] }
0x2513   :  { %v4753_v11 = vld [vmem:[%s6258_s5 + $0xf8] sm:$0xff] }
0x2514   :  { %4010 = vst.msk [vmem:[#allocation4 + $0x70] sm:$0xff] %vm151_vm2, %v4008_v12  ;;  %5233 = vmatmul.mubr.msk.f32.vlgmr.msra.gmra.mxu1 %vm151_vm2, %v4008_v12  ;;  %v4752_v12 = vld [vmem:[%s6258_s5 + $0xf0] sm:$0xff] }
0x2515   :  { %5241 = vmatpush3.xpose.msk.msra.mxu1 %vm151_vm2, %v4164_v13  ;;  %5242 = vmatprep.mubr.msk.f32.mxu1 %vm5443_vm1, %v5442_v6  ;;  %v4751_v13 = vld [vmem:[%s6258_s5 + $0xe8] sm:$0xff] }
0x2516   :  { %5250 = vmatprep.subr.mxu1 %v5442_v6 }
0x2518   :  { %5243 = vmatmul.mubr.msk.f32.vlgmr.msra.gmra.mxu1 %vm151_vm2, %v4162_v21  ;;  %v4750_v21 = vld [vmem:[%s6258_s5 + $0xe0] sm:$0xff] }
0x2519   :  { %5251 = vmatpush3.msra.mxu1 %v6055_v60  ;;  %5252 = vmatprep.mubr.msk.f32.mxu1 %vm5443_vm1, %v5442_v6 }
0x251a   :  { %5266 = vmatprep.subr.mxu1 %v4753_v11 }
0x25d4   :  { %v4083_v22 = vpop.f32.mrf.mxu1 }
0x25d5   :  { %5238 = vmatmul.mubr.msk.f32.vlgmr.msra.gmra.mxu0 %vm151_vm2, %v4083_v22  ;;  %v4749_v22 = vld [vmem:[%s6258_s5 + $0xd8] sm:$0xff] }
0x25d6   :  { %v5234_v23 = vpop.f32.mrf.mxu1  ;;  %5247 = vmatprep.mubr.msk.f32.mxu0 %vm5443_vm1, %v5442_v6  ;;  %v4407_v6 = vrot.slane %v5917_v10, %v2096_v3 }
0x25d7   :  { %v4748_v23 = vld [vmem:[%s6258_s5 + $0xd0] sm:$0xff] }
0x25d8   :  { %v4235_v17 = vpop.f32.mrf.mxu1  ;;  %v4408_v32 = vadd.f32 %v4407_v6, %v6075_v33 }
0x25d9   :  { %v4239_v25 = vmul.f32 0.35355338, %v4235_v17  ;;  %v4747_v17 = vld [vmem:[%s6258_s5 + $0xc8] sm:$0xff] }
0x25da   :  { %v5244_v9 = vpop.f32.mrf.mxu1  ;;  %v4410_v24 = vadd.f32 %v4408_v32, %v5904_v14 }
0x25db   :  { %v4240_v2 = vadd.f32 %v4239_v25, %v5706_v51  ;;  %v4746_v25 = vld [vmem:[%s6258_s5 + $0xc0] sm:$0xff]  ;;  %v4745_v9 = vld [vmem:[%s6258_s5 + $0xb8] sm:$0xff] }
0x25dd   :  { %v4241_v26 = vsel %vm151_vm2, %v4240_v2, -inf }
0x25de   :  { %4242 = vmax.xlane.f32.xlu0 %v4241_v26  ;;  %v4743_v26 = vld [vmem:[%s6258_s5 + $0xa8] sm:$0xff] }
0x25f4   :  { %4254 = vrot.lane.b32.xlu0 %v5921_v15, %s5454_s11  ;;  %v4412_v15 = vsel %vm66_vm0, %v4410_v24, 0.0 }
0x2667   :  { %v4243_v60 = vpop.xlane.xlu0 %4242 }
0x2668   :  { %v4244_v27 = vsub.f32 %v4240_v2, %v4243_v60  ;;  %v4744_v2 = vld [vmem:[%s6258_s5 + $0xb0] sm:$0xff]  ;;  %v4742_v60 = vld [vmem:[%s6258_s5 + $0xa0] sm:$0xff] }
0x266a   :  { %v4245_v29 = vmul.f32 1.442695, %v4244_v27 }
0x266b   :  { %v4255_v31 = vpop.permute.xlu0 %4254 }
0x266c   :  { %5386 = vpow2.f32 %v4245_v29  ;;  %5246 = vmatpush3.msra.mxu0 %v4255_v31 }
0x266d   :  { %5255 = vmatprep.subr.mxu0 %v4737_v1 }
0x2679   :  { %v5387_v35 = vpop.eup %5386 }
0x267a   :  { %v4247_v51 = vsel %vm151_vm2, %v5387_v35, 0.0 }
0x267b   :  { %4248 = vadd.xlane.f32.xlu1 %v4247_v51 }
0x267f   :  { %4413 = vadd.xlane.f32.xlu1 %v4412_v15  ;;  %v4740_v15 = vld [vmem:[%s6258_s5 + $0x90] sm:$0xff] }
0x2695   :  { %v4156_v34 = vpop.f32.mrf.mxu0 }
0x2696   :  { %v4160_v36 = vadd.f32 %v4156_v34, %v3915_v19  ;;  %v4739_v34 = vld [vmem:[%s6258_s5 + $0x88] sm:$0xff] }
0x2697   :  { %v5239_v37 = vpop.f32.mrf.mxu0 }
0x2698   :  { %v4453_v37 = vrot.slane %v5917_v10, %v5699_v48 }
0x2704   :  { %v4249_v38 = vpop.xlane.xlu1 %4248 }
0x2705   :  { %5388 = vrcp.f32 %v4249_v38 }
0x2708   :  { %v4414_v39 = vpop.xlane.xlu1 %4413 }
0x2709   :  { %v4418_v41 = vmul.f32 0.03125, %v4414_v39 }
0x270b   :  { %v4420_v42 = vsub.f32 %v4410_v24, %v4418_v41  ;;  %v4741_v24 = vld [vmem:[%s6258_s5 + $0x98] sm:$0xff] }
0x270d   :  { %v4422_v3 = vmul.f32 %v4420_v42, %v4420_v42 }
0x270f   :  { %v4424_v33 = vsel %vm66_vm0, %v4422_v3, 0.0 }
0x2710   :  { %4425 = vadd.xlane.f32.xlu0 %v4424_v33 }
0x2712   :  { %v5389_v43 = vpop.eup %5388 }
0x2713   :  { %v4251_v44 = vmul.f32 %v5389_v43, %v5387_v35  ;;  %v4540_v43 = vrot.slane %v5917_v10, %v2230_v30 }
0x2715   :  { %4253 = vst.msk [vmem:[#allocation4 + $0x78] sm:$0xff] %vm151_vm2, %v4251_v44  ;;  %5248 = vmatmul.mubr.msk.f32.vlgmr.msra.gmra.mxu0 %vm151_vm2, %v4251_v44 }
0x2716   :  { %5256 = vmatpush3.msra.mxu0 %v4737_v1 }
0x2799   :  { %v4426_v14 = vpop.xlane.xlu0 %4425 }
0x279a   :  { %v4430_v45 = vmul.f32 0.03125, %v4426_v14 }
0x279c   :  { %v4432_v46 = vadd.f32 1e-05, %v4430_v45 }
0x279e   :  { %5390 = vrsqrt.f32 %v4432_v46 }
0x27ab   :  { %v5391_v50 = vpop.eup %5390 }
0x27ac   :  { %v4436_v40 = vmul.f32 %v5391_v50, %v4420_v42 }
0x27ae   :  { %v4442_v52 = vmul.f32 %v6143_v49, %v4436_v40 }
0x27b0   :  { %v6152_v54 = vadd.f32 %v6148_v53, %v4442_v52 }
0x27b2   :  { %5263 = vmatprep.mubr.msk.f32.mxu0 %vm66_vm0, %v6152_v54 }
0x27d5   :  { %v4326_v19 = vpop.f32.mrf.mxu0 }
0x27d6   :  { %5253 = vmatmul.mubr.msk.f32.vlgmr.msra.gmra.mxu1 %vm151_vm2, %v4326_v19 }
0x27d7   :  { %v5249_v5 = vpop.f32.mrf.mxu0  ;;  %5267 = vmatpush3.msra.mxu1 %v4753_v11 }
0x27d8   :  { %5268 = vmatprep.subr.mxu1 %v4752_v12 }
0x27d9   :  { %5269 = vmatpush3.msra.mxu1 %v4752_v12 }
0x27da   :  { %5270 = vmatprep.subr.mxu1 %v4751_v13 }
0x27db   :  { %5271 = vmatpush3.msra.mxu1 %v4751_v13 }
0x27dc   :  { %5272 = vmatprep.subr.mxu1 %v4750_v21 }
0x27dd   :  { %5273 = vmatpush3.msra.mxu1 %v4750_v21 }
0x27de   :  { %5274 = vmatprep.subr.mxu1 %v4749_v22 }
0x27df   :  { %5275 = vmatpush3.msra.mxu1 %v4749_v22 }
0x27e0   :  { %5276 = vmatprep.subr.mxu1 %v4748_v23 }
0x27e1   :  { %5277 = vmatpush3.msra.mxu1 %v4748_v23 }
0x27e2   :  { %5278 = vmatprep.subr.mxu1 %v4747_v17 }
0x27e3   :  { %5279 = vmatpush3.msra.mxu1 %v4747_v17 }
0x27e4   :  { %5280 = vmatprep.subr.mxu1 %v4746_v25 }
0x27e5   :  { %5281 = vmatpush3.msra.mxu1 %v4746_v25 }
0x27e6   :  { %5282 = vmatprep.subr.mxu1 %v4745_v9 }
0x27e7   :  { %5283 = vmatpush3.msra.mxu1 %v4745_v9 }
0x27e8   :  { %5284 = vmatprep.subr.mxu1 %v4744_v2 }
0x27e9   :  { %5285 = vmatpush3.msra.mxu1 %v4744_v2 }
0x27ea   :  { %5286 = vmatprep.subr.mxu1 %v4743_v26 }
0x27eb   :  { %5287 = vmatpush3.msra.mxu1 %v4743_v26 }
0x27ec   :  { %5288 = vmatprep.subr.mxu1 %v4742_v60 }
0x27ed   :  { %5289 = vmatpush3.msra.mxu1 %v4742_v60 }
0x27ee   :  { %5290 = vmatprep.subr.mxu1 %v4741_v24 }
0x27ef   :  { %5291 = vmatpush3.msra.mxu1 %v4741_v24 }
0x27f0   :  { %5292 = vmatprep.subr.mxu1 %v4740_v15 }
0x27f1   :  { %5293 = vmatpush3.msra.mxu1 %v4740_v15 }
0x27f2   :  { %5294 = vmatprep.subr.mxu1 %v4739_v34 }
0x27f3   :  { %5295 = vmatpush3.msra.mxu1 %v4739_v34 }
0x2896   :  { %v4399_v55 = vpop.f32.mrf.mxu1 }
0x2897   :  { %v4403_v56 = vadd.f32 %v4399_v55, %v4160_v36  ;;  %v4738_v36 = vld [vmem:[%s6258_s5 + $0x80] sm:$0xff]  ;;  %s5455_s5 = smov [#allocation4]  }
0x2898   :  { %v5254_v58 = vpop.f32.mrf.mxu1  ;;  %5296 = vmatprep.subr.mxu1 %v4738_v36  ;;  %s4675_s22 = sshll.u32 %s5455_s5, 4  ;;  %s4676_s22 = int_to_ptr.vmem [resolvable:$true] %s4675_s22 }
0x2899   :  { %v4409_v59 = vadd.f32 %v4407_v6, %v4403_v56  ;;  %5297 = vmatpush3.msra.mxu1 %v4738_v36  ;;  %s5398_s23 = scalar_lea.vmem %s4676_s22, 2048  ;;  %p5403_p1 = scmp.lt.s32.totalorder %s4676_s22, %s4676_s22 }
0x289a   :  { %p5399_p0 = scmp.ne.s32.totalorder %s4676_s22, %s5398_s23  ;;  %p5404_p2 = scmp.lt.s32.totalorder %s5398_s23, %s5398_s23 }
0x289b   :  { %v4411_v57 = vadd.f32 %v4409_v59, %v5908_v20  ;;  %v4736_v20 = vld [vmem:[%s6257_s4 + $0x30] sm:$0xff] }
0x289c   :  { %5257 = vmatprep.subr.mxu0 %v4736_v20  ;;  %p5405_p3 = por %p5404_p2, %p5403_p1 }
0x289d   :  { %v4415_v16 = vsel %vm66_vm0, %v4411_v57, 0.0  ;;  %5258 = vmatpush3.msra.mxu0 %v4736_v20 }
0x289e   :  { %4416 = vadd.xlane.f32.xlu1 %v4415_v16  ;;  %5259 = vmatprep.subr.mxu0 %v4735_v4  ;;  %p5406_p4 = pnand %p5405_p3, %p5399_p0 }
0x289f   :  { %5260 = vmatpush3.msra.mxu0 %v4735_v4 }
0x28a0   :  { %5261 = vmatprep.subr.mxu0 %v4734_v7 }
0x28a1   :  { %5262 = vmatpush3.msra.mxu0 %v4734_v7 }
0x2927   :  { %v4417_v61 = vpop.xlane.xlu1 %4416 }
0x2928   :  { %v4419_v28 = vmul.f32 0.03125, %v4417_v61 }
0x292a   :  { %v4421_v18 = vsub.f32 %v4411_v57, %v4419_v28 }
0x292c   :  { %v4423_v63 = vmul.f32 %v4421_v18, %v4421_v18 }
0x292e   :  { %v4427_v0 = vsel %vm66_vm0, %v4423_v63, 0.0 }
0x292f   :  { %4428 = vadd.xlane.f32.xlu1 %v4427_v0 }
0x29b8   :  { %v4429_v27 = vpop.xlane.xlu1 %4428 }
0x29b9   :  { %v4431_v29 = vmul.f32 0.03125, %v4429_v27 }
0x29bb   :  { %v4433_v31 = vadd.f32 1e-05, %v4431_v29 }
0x29bd   :  { %5392 = vrsqrt.f32 %v4433_v31 }
0x29ca   :  { %v5393_v6 = vpop.eup %5392 }
0x29cb   :  { %v4437_v32 = vmul.f32 %v5393_v6, %v4421_v18 }
0x29cd   :  { %v4443_v35 = vmul.f32 %v6143_v49, %v4437_v32 }
0x29cf   :  { %v4449_v51 = vadd.f32 %v6148_v53, %v4443_v35 }
0x29d1   :  { %5264 = vmatmul.mubr.msk.f32.vlgmr.msra.gmra.mxu0 %vm66_vm0, %v4449_v51 }
0x2a91   :  { %v5265_v38 = vpop.f32.mrf.mxu0 }
0x2a92   :  { %v4532_v39 = vadd.f32 %v5265_v38, %v4453_v37 }
0x2a93   :  { %v4526_v41 = vpop.f32.mrf.mxu0 }
0x2a94   :  { %v4527_v42 = vadd.f32 %v4526_v41, %v4453_v37  ;;  %v4536_v33 = vmax.f32 %v4532_v39, 0.0 }
0x2a96   :  { %v4535_v3 = vmax.f32 %v4527_v42, 0.0 }
0x2a98   :  { %5298 = vmatprep.mubr.f32.mxu1 %v4535_v3 }
0x2a99   :  { %5299 = vmatmul.mubr.f32.vlgmr.msra.gmra.mxu1 %v4536_v33 }
0x2b59   :  { %v5300_v44 = vpop.f32.mrf.mxu1 }
0x2b5a   :  { %v4613_v45 = vadd.f32 %v5300_v44, %v4540_v43 }
0x2b5b   :  { %v4607_v14 = vpop.f32.mrf.mxu1 }
0x2b5c   :  { %v4608_v46 = vadd.f32 %v4607_v14, %v4540_v43  ;;  %v4617_v50 = vadd.f32 %v4613_v45, %v4449_v51 }
0x2b5e   :  { %v4616_v49 = vadd.f32 %v4608_v46, %v6152_v54  ;;  %v4621_v40 = vsel %vm66_vm0, %v4617_v50, 0.0 }
0x2b60   :  { %v4618_v48 = vsel %vm66_vm0, %v4616_v49, 0.0 }
0x2b61   :  { %4619 = vadd.xlane.f32.xlu1 %v4618_v48 }
0x2b65   :  { %4622 = vadd.xlane.f32.xlu1 %v4621_v40 }
0x2bea   :  { %v4620_v53 = vpop.xlane.xlu1 %4619 }
0x2beb   :  { %v4624_v52 = vmul.f32 0.03125, %v4620_v53 }
0x2bed   :  { %v4626_v19 = vsub.f32 %v4616_v49, %v4624_v52 }
0x2bee   :  { %v4623_v5 = vpop.xlane.xlu1 %4622 }
0x2bef   :  { %v4625_v55 = vmul.f32 0.03125, %v4623_v5  ;;  %v4628_v56 = vmul.f32 %v4626_v19, %v4626_v19 }
0x2bf1   :  { %v4627_v30 = vsub.f32 %v4617_v50, %v4625_v55  ;;  %v4630_v58 = vsel %vm66_vm0, %v4628_v56, 0.0 }
0x2bf2   :  { %4631 = vadd.xlane.f32.xlu1 %v4630_v58 }
0x2bf3   :  { %v4629_v59 = vmul.f32 %v4627_v30, %v4627_v30 }
0x2bf5   :  { %v4633_v54 = vsel %vm66_vm0, %v4629_v59, 0.0 }
0x2bf6   :  { %4634 = vadd.xlane.f32.xlu1 %v4633_v54 }
0x2bf7   :  { %5409 = shalt.err (!%p5406_p4)
}
0x2bf8   :  { %s5456_s4 = smov 128   ;;  %s5457_s24 = smov 8   ;;  %v4647_v0 = vrot.slane %v5917_v10, %v2337_v62  ;;  %v4653_v4 = vrot.slane %v5917_v10, %v2343_v47 }
0x2bf9   :  { %4681 = dma.vmem_to_hbm [thread:$0]  %s4676_s22, 2048, %s6261_s8, [#allocation5], %s5456_s4, %s5456_s4, %s5457_s24  }
0x2bfa   :  { %s5458_s8 = smov [#allocation2]  }
0x2bfb   :  { %s4663_s2 = sshll.u32 %s5458_s8, 4  ;;  %s4664_s2 = int_to_ptr.vmem [resolvable:$true] %s4663_s2 }
0x2bfc   :  { %s5418_s12 = scalar_lea.vmem %s4664_s2, 256  ;;  %p5423_p6 = scmp.lt.s32.totalorder %s4664_s2, %s4664_s2 }
0x2bfd   :  { %p5419_p5 = scmp.ne.s32.totalorder %s4664_s2, %s5418_s12  ;;  %p5424_p7 = scmp.lt.s32.totalorder %s5418_s12, %s5418_s12 }
0x2bff   :  { %p5425_p8 = por %p5424_p7, %p5423_p6 }
0x2c01   :  { %p5426_p9 = pnand %p5425_p8, %p5419_p5 }
0x2c7b   :  { %v4632_v57 = vpop.xlane.xlu1 %4631 }
0x2c7c   :  { %v4636_v16 = vmul.f32 0.03125, %v4632_v57 }
0x2c7e   :  { %v4638_v61 = vadd.f32 1e-05, %v4636_v16 }
0x2c7f   :  { %v4635_v28 = vpop.xlane.xlu1 %4634 }
0x2c80   :  { %5394 = vrsqrt.f32 %v4638_v61  ;;  %v4637_v18 = vmul.f32 0.03125, %v4635_v28 }
0x2c82   :  { %v4639_v63 = vadd.f32 1e-05, %v4637_v18 }
0x2c84   :  { %5396 = vrsqrt.f32 %v4639_v63 }
0x2c8d   :  { %v5395_v1 = vpop.eup %5394 }
0x2c8e   :  { %v4642_v20 = vmul.f32 %v5395_v1, %v4626_v19 }
0x2c90   :  { %v4648_v7 = vmul.f32 %v4647_v0, %v4642_v20 }
0x2c91   :  { %v5397_v11 = vpop.eup %5396 }
0x2c92   :  { %v4643_v12 = vmul.f32 %v5397_v11, %v4627_v30  ;;  %v4654_v13 = vadd.f32 %v4653_v4, %v4648_v7 }
0x2c94   :  { %v4649_v21 = vmul.f32 %v4647_v0, %v4643_v12  ;;  %4656 = vst.msk [vmem:[#allocation2] sm:$0xff] %vm66_vm0, %v4654_v13 }
0x2c96   :  { %v4655_v22 = vadd.f32 %v4653_v4, %v4649_v21 }
0x2c98   :  { %4657 = vst.msk [vmem:[#allocation2 + $0x8] sm:$0xff] %vm66_vm0, %v4655_v22 }
0x2c99   :  { %5429 = shalt.err (!%p5426_p9)
}
0x2c9a   :  { %4669 = dma.vmem_to_hbm [thread:$0]  %s4664_s2, 256, %s6260_s7, [#allocation3], %s5456_s4, %s5456_s4, %s5457_s24  }
0x2c9b   :  { %5438 = dma.done.wait [#allocation3], 256  }
0x2c9c   :  { %5439 = vsyncadd [#allocation3], 4294967040 }
0x2c9d   :  { %5440 = dma.done.wait [#allocation5], 2048  }
0x2c9e   :  { %5441 = vsyncadd [#allocation5], 4294965248 }
0x2c9f   :  { %4688 = vsyncpa [#allocation3], 1 }
0x2ca0   :  { %4689 = vsyncpa [#allocation5], 1 }

</bundles_post_ra>
